<compile_context>
chip_gen: v7x
topology: tpu7x:2x2x1
jax: 0.10.0
libtpu: 0.0.40
codegen_flags: <defaults>
</compile_context>

<pallas_src>
import jax
import jax.numpy as jnp
from jax.experimental import pallas as pl
from jax.experimental.pallas import tpu as pltpu

# ----------------------------- config (small, consistent with the module) ----------
CFG = dict(
    enc_in=4, dec_in=4, c_out=4,
    d_model=32,
    e_layers=2, d_layers=1,
    seq_len=8, label_len=4, pred_len=4,
    kernel_size=3,
    mark_dim=4,           # time-feature dim (freq='h' -> 4 features, timeF embed)
)

_VMEM = pl.BlockSpec(memory_space=pltpu.MemorySpace.VMEM)


# ----------------------------- single fused kernel ----------------------------------
def _make_fused_kernel(cfg, B):
    L = cfg["seq_len"]
    H = cfg["d_model"]
    K = cfg["kernel_size"]
    pad = (K - 1) // 2
    e_layers = cfg["e_layers"]
    d_layers = cfg["d_layers"]
    pred_len = cfg["pred_len"]
    f32, bf16 = jnp.float32, jnp.bfloat16

    def sig(x):
        # exact sigmoid via a single tanh EUP push
        return 0.5 * jnp.tanh(0.5 * x) + 0.5

    def lstm_cell(gates, c):
        i = sig(gates[:, 0 * H:1 * H])          # PyTorch gate order i, f, g, o
        f = sig(gates[:, 1 * H:2 * H])
        g = jnp.tanh(gates[:, 2 * H:3 * H])
        o = sig(gates[:, 3 * H:4 * H])
        c = f * c + i * g
        h = o * jnp.tanh(c)
        return h, c

    def kernel(*refs):
        (x_ref, mark_ref, seed_ref,
         wconv_ref, wmark_ref, wih_ref, whh_ref, b_ref) = refs[:8]
        dwih = refs[8:8 + d_layers]
        dwhh = refs[8 + d_layers:8 + 2 * d_layers]
        db = refs[8 + 2 * d_layers:8 + 3 * d_layers]
        fcw_ref = refs[8 + 3 * d_layers]
        fcb_ref = refs[9 + 3 * d_layers]
        out_ref = refs[10 + 3 * d_layers]
        seq_ref = refs[11 + 3 * d_layers]       # VMEM scratch (L, B, H)  f32
        xproj_ref = refs[12 + 3 * d_layers]     # VMEM scratch (L, B, 4H) f32

        # ---- value embedding (circular Conv1d as K shifted matmuls) + timeF embedding
        wmark = wmark_ref[...]                                       # (C_mark, H) bf16
        for t in range(L):                                           # hoisted, off recurrence
            v = jnp.dot(mark_ref[t].astype(bf16), wmark,
                        preferred_element_type=f32)                  # (B, H)
            for k in range(K):
                ts = (t + k - pad) % L                               # circular padding
                v = v + jnp.dot(x_ref[ts].astype(bf16), wconv_ref[k],
                                preferred_element_type=f32)
            seq_ref[t] = v

        # ---- encoder LSTM stack; only the final (h, c) leave this section -----------
        hs, cs = [], []
        for l in range(e_layers):
            w_ih = wih_ref[l]                                        # (H, 4H) bf16, resident
            w_hh = whh_ref[l]                                        # (H, 4H) bf16, resident
            bias = b_ref[l]                                          # (1, 4H) f32
            # hoisted input projection: not on the serial h->h dependency chain
            for t in range(L):
                xproj_ref[t] = jnp.dot(seq_ref[t].astype(bf16), w_ih,
                                       preferred_element_type=f32) + bias
            h = jnp.zeros((B, H), f32)
            c = jnp.zeros((B, H), f32)
            last = (l == e_layers - 1)
            for t in range(L):                                       # serial recurrence
                gates = xproj_ref[t] + jnp.dot(h.astype(bf16), w_hh,
                                               preferred_element_type=f32)
                h, c = lstm_cell(gates, c)
                if not last:
                    seq_ref[t] = h                                   # feeds next layer, in place
            hs.append(h)
            cs.append(c)

        # hand off the last d_layers states (stays in vregs, never touches HBM)
        hs = hs[-d_layers:]
        cs = cs[-d_layers:]

        # ---- recursive decoder: pred_len x (d_layers cells + fused FC + feedback) ----
        fc_w = fcw_ref[...]                                          # (H, c_out) bf16
        fc_b = fcb_ref[...]                                          # (1, c_out) f32
        dec_inp = seed_ref[...]                                      # (B, c_out) f32
        outs = []
        for _ in range(pred_len):                                    # strictly serial
            layer_in = dec_inp
            for l in range(d_layers):
                gates = (jnp.dot(layer_in.astype(bf16), dwih[l][...],
                                 preferred_element_type=f32)
                         + jnp.dot(hs[l].astype(bf16), dwhh[l][...],
                                   preferred_element_type=f32)
                         + db[l][...])
                hs[l], cs[l] = lstm_cell(gates, cs[l])
                layer_in = hs[l]
            dec_out = jnp.dot(layer_in.astype(bf16), fc_w,
                              preferred_element_type=f32) + fc_b     # (B, c_out)
            outs.append(dec_out)
            dec_inp = dec_out                                        # 4-wide feedback stays in vregs

        # single store, already in (B, pred_len*c_out) layout -> wrapper only reshapes
        out_ref[...] = jnp.concatenate(outs, axis=-1)

    return kernel


# ----------------------------- full model forward (one pallas_call) -----------------
def model_forward(params, x_enc, x_mark_enc, x_dec, x_mark_dec, cfg):
    del x_mark_dec  # unused by the reference forward
    B, L, _ = x_enc.shape
    H = cfg["d_model"]
    pred_len, c_out = cfg["pred_len"], cfg["c_out"]
    d_layers, e_layers = cfg["d_layers"], cfg["e_layers"]
    assert d_layers <= e_layers

    # the only host-graph glue: time-major views + decoder seed slice (all tiny)
    x_tb = jnp.transpose(x_enc, (1, 0, 2))            # (L, B, C_in)
    m_tb = jnp.transpose(x_mark_enc, (1, 0, 2))       # (L, B, C_mark)
    seed = x_dec[:, -(pred_len + 1), -c_out:]         # (B, c_out)

    kernel = _make_fused_kernel(cfg, B)
    args = [x_tb, m_tb, seed,
            params["enc_wconv"], params["enc_wmark"], params["enc_wih"],
            params["enc_whh"], params["enc_b"],
            *params["dec_wih"], *params["dec_whh"], *params["dec_b"],
            params["dec_fc_w"], params["dec_fc_b"]]

    out_flat = pl.pallas_call(
        kernel,
        out_shape=jax.ShapeDtypeStruct((B, pred_len * c_out), jnp.float32),
        in_specs=[_VMEM] * len(args),
        out_specs=_VMEM,
        scratch_shapes=[pltpu.VMEM((L, B, H), jnp.float32),
                        pltpu.VMEM((L, B, 4 * H), jnp.float32)],
    )(*args)
    return out_flat.reshape(B, pred_len, c_out)


# ----------------------------- deterministic parameter init -------------------------
def init_params(cfg, key):
    H = cfg["d_model"]
    K = cfg["kernel_size"]
    ks = iter(jax.random.split(key, 64))
    bf = jnp.bfloat16

    def u(shape, scale, dtype=jnp.float32):
        return jax.random.uniform(next(ks), shape, jnp.float32, -scale, scale).astype(dtype)

    s = 1.0 / float(H) ** 0.5
    params = {
        # token conv weight (K, C_in, d_model): wconv[k][c, h] == W_torch[h, c, k];
        # time-feature linear (mark_dim, d_model); both bias-free like the reference.
        "enc_wconv": u((K, cfg["enc_in"], H), 0.2, bf),
        "enc_wmark": u((cfg["mark_dim"], H), 0.2, bf),
        # encoder LSTM, stacked per layer (input size == d_model for every layer);
        # single combined bias (b_ih + b_hh folded) per layer.
        "enc_wih": u((cfg["e_layers"], H, 4 * H), s, bf),
        "enc_whh": u((cfg["e_layers"], H, 4 * H), s, bf),
        "enc_b": u((cfg["e_layers"], 1, 4 * H), s),
        # decoder LSTM: separate W_ih / W_hh per layer (layer0 input = c_out, rest = H)
        "dec_wih": [], "dec_whh": [], "dec_b": [],
        "dec_fc_w": u((H, cfg["c_out"]), s, bf),
        "dec_fc_b": u((1, cfg["c_out"]), s),
    }
    for l in range(cfg["d_layers"]):
        in_dim = cfg["c_out"] if l == 0 else H
        params["dec_wih"].append(u((in_dim, 4 * H), s, bf))
        params["dec_whh"].append(u((H, 4 * H), s, bf))
        params["dec_b"].append(u((1, 4 * H), s))
    return params


# ----------------------------- main ---------------------------------------------------
if __name__ == "__main__":
    cfg = CFG
    key = jax.random.PRNGKey(0)
    k1, k2, k3, k4, kp = jax.random.split(key, 5)

    B = 2
    dec_len = cfg["label_len"] + cfg["pred_len"]
    x_enc = jax.random.normal(k1, (B, cfg["seq_len"], cfg["enc_in"]), jnp.float32)
    x_mark_enc = jax.random.normal(k2, (B, cfg["seq_len"], cfg["mark_dim"]), jnp.float32)
    x_dec = jax.random.normal(k3, (B, dec_len, cfg["dec_in"]), jnp.float32)
    x_mark_dec = jax.random.normal(k4, (B, dec_len, cfg["mark_dim"]), jnp.float32)

    params = init_params(cfg, kp)

    fwd = jax.jit(lambda p, a, b, c, d: model_forward(p, a, b, c, d, cfg))
    out = fwd(params, x_enc, x_mark_enc, x_dec, x_mark_dec)
    out = jax.block_until_ready(out)

    assert out.shape == (B, cfg["pred_len"], cfg["c_out"]), out.shape
    assert jnp.all(jnp.isfinite(out))
    print("KERNEL_OK")
</pallas_src>

<mosaic_0001>
module attributes {stable_mosaic.version = 11 : i64} {
  func.func @kernel(%arg0: memref<8x2x4xf32, #tpu.memory_space<vmem>>, %arg1: memref<8x2x4xf32, #tpu.memory_space<vmem>>, %arg2: memref<2x4xf32, #tpu.memory_space<vmem>>, %arg3: memref<3x4x32xbf16, #tpu.memory_space<vmem>>, %arg4: memref<4x32xbf16, #tpu.memory_space<vmem>>, %arg5: memref<2x32x128xbf16, #tpu.memory_space<vmem>>, %arg6: memref<2x32x128xbf16, #tpu.memory_space<vmem>>, %arg7: memref<2x1x128xf32, #tpu.memory_space<vmem>>, %arg8: memref<4x128xbf16, #tpu.memory_space<vmem>>, %arg9: memref<32x128xbf16, #tpu.memory_space<vmem>>, %arg10: memref<1x128xf32, #tpu.memory_space<vmem>>, %arg11: memref<32x4xbf16, #tpu.memory_space<vmem>>, %arg12: memref<1x4xf32, #tpu.memory_space<vmem>>, %arg13: memref<2x16xf32, #tpu.memory_space<vmem>>, %arg14: memref<8x2x32xf32, #tpu.memory_space<vmem>>, %arg15: memref<8x2x128xf32, #tpu.memory_space<vmem>>) attributes {dimension_semantics = [], scalar_prefetch = 0 : i64, scratch_operands = 2 : i64, tpu.core_type = #tpu.core_type<tc>} {
    %c0 = arith.constant 0 : index
    %c0_0 = arith.constant 0 : index
    %0 = vector.load %arg4[%c0, %c0_0] : memref<4x32xbf16, #tpu.memory_space<vmem>>, vector<4x32xbf16>
    %c0_1 = arith.constant 0 : index
    %c0_2 = arith.constant 0 : index
    %c0_3 = arith.constant 0 : index
    %1 = vector.load %arg1[%c0_1, %c0_2, %c0_3] : memref<8x2x4xf32, #tpu.memory_space<vmem>>, vector<1x2x4xf32>
    %2 = vector.shape_cast %1 : vector<1x2x4xf32> to vector<2x4xf32>
    %3 = arith.truncf %2 : vector<2x4xf32> to vector<2x4xbf16>
    %cst = arith.constant dense<0.000000e+00> : vector<2x32xf32>
    %4 = tpu.matmul %3, %0, %cst {dimension_numbers = #tpu.dot_dimension_numbers<[1], [0], [0], [1], [0, 0, 1, 1], [], []>} : vector<2x4xbf16>, vector<4x32xbf16>, vector<2x32xf32> -> vector<2x32xf32>
    %c7 = arith.constant 7 : index
    %c0_4 = arith.constant 0 : index
    %c0_5 = arith.constant 0 : index
    %5 = vector.load %arg0[%c7, %c0_4, %c0_5] : memref<8x2x4xf32, #tpu.memory_space<vmem>>, vector<1x2x4xf32>
    %6 = vector.shape_cast %5 : vector<1x2x4xf32> to vector<2x4xf32>
    %7 = arith.truncf %6 : vector<2x4xf32> to vector<2x4xbf16>
    %c0_6 = arith.constant 0 : index
    %c0_7 = arith.constant 0 : index
    %c0_8 = arith.constant 0 : index
    %8 = vector.load %arg3[%c0_6, %c0_7, %c0_8] : memref<3x4x32xbf16, #tpu.memory_space<vmem>>, vector<1x4x32xbf16>
    %9 = vector.shape_cast %8 : vector<1x4x32xbf16> to vector<4x32xbf16>
    %cst_9 = arith.constant dense<0.000000e+00> : vector<2x32xf32>
    %10 = tpu.matmul %7, %9, %cst_9 {dimension_numbers = #tpu.dot_dimension_numbers<[1], [0], [0], [1], [0, 0, 1, 1], [], []>} : vector<2x4xbf16>, vector<4x32xbf16>, vector<2x32xf32> -> vector<2x32xf32>
    %11 = arith.addf %4, %10 : vector<2x32xf32>
    %c0_10 = arith.constant 0 : index
    %c0_11 = arith.constant 0 : index
    %c0_12 = arith.constant 0 : index
    %12 = vector.load %arg0[%c0_10, %c0_11, %c0_12] : memref<8x2x4xf32, #tpu.memory_space<vmem>>, vector<1x2x4xf32>
    %13 = vector.shape_cast %12 : vector<1x2x4xf32> to vector<2x4xf32>
    %14 = arith.truncf %13 : vector<2x4xf32> to vector<2x4xbf16>
    %c1 = arith.constant 1 : index
    %c0_13 = arith.constant 0 : index
    %c0_14 = arith.constant 0 : index
    %15 = vector.load %arg3[%c1, %c0_13, %c0_14] : memref<3x4x32xbf16, #tpu.memory_space<vmem>>, vector<1x4x32xbf16>
    %16 = vector.shape_cast %15 : vector<1x4x32xbf16> to vector<4x32xbf16>
    %cst_15 = arith.constant dense<0.000000e+00> : vector<2x32xf32>
    %17 = tpu.matmul %14, %16, %cst_15 {dimension_numbers = #tpu.dot_dimension_numbers<[1], [0], [0], [1], [0, 0, 1, 1], [], []>} : vector<2x4xbf16>, vector<4x32xbf16>, vector<2x32xf32> -> vector<2x32xf32>
    %18 = arith.addf %11, %17 : vector<2x32xf32>
    %c1_16 = arith.constant 1 : index
    %c0_17 = arith.constant 0 : index
    %c0_18 = arith.constant 0 : index
    %19 = vector.load %arg0[%c1_16, %c0_17, %c0_18] : memref<8x2x4xf32, #tpu.memory_space<vmem>>, vector<1x2x4xf32>
    %20 = vector.shape_cast %19 : vector<1x2x4xf32> to vector<2x4xf32>
    %21 = arith.truncf %20 : vector<2x4xf32> to vector<2x4xbf16>
    %c2 = arith.constant 2 : index
    %c0_19 = arith.constant 0 : index
    %c0_20 = arith.constant 0 : index
    %22 = vector.load %arg3[%c2, %c0_19, %c0_20] : memref<3x4x32xbf16, #tpu.memory_space<vmem>>, vector<1x4x32xbf16>
    %23 = vector.shape_cast %22 : vector<1x4x32xbf16> to vector<4x32xbf16>
    %cst_21 = arith.constant dense<0.000000e+00> : vector<2x32xf32>
    %24 = tpu.matmul %21, %23, %cst_21 {dimension_numbers = #tpu.dot_dimension_numbers<[1], [0], [0], [1], [0, 0, 1, 1], [], []>} : vector<2x4xbf16>, vector<4x32xbf16>, vector<2x32xf32> -> vector<2x32xf32>
    %25 = arith.addf %18, %24 : vector<2x32xf32>
    %c0_22 = arith.constant 0 : index
    %c0_23 = arith.constant 0 : index
    %c0_24 = arith.constant 0 : index
    %26 = vector.load %arg14[%c0_22, %c0_23, %c0_24] : memref<8x2x32xf32, #tpu.memory_space<vmem>>, vector<1x2x32xf32>
    %27 = vector.shape_cast %26 : vector<1x2x32xf32> to vector<2x32xf32>
    %28 = vector.shape_cast %25 : vector<2x32xf32> to vector<1x2x32xf32>
    tpu.vector_store %arg14[%c0_22, %c0_23, %c0_24], %28 {strides = array<i32>} : memref<8x2x32xf32, #tpu.memory_space<vmem>>, vector<1x2x32xf32>,
    %c1_25 = arith.constant 1 : index
    %c0_26 = arith.constant 0 : index
    %c0_27 = arith.constant 0 : index
    %29 = vector.load %arg1[%c1_25, %c0_26, %c0_27] : memref<8x2x4xf32, #tpu.memory_space<vmem>>, vector<1x2x4xf32>
    %30 = vector.shape_cast %29 : vector<1x2x4xf32> to vector<2x4xf32>
    %31 = arith.truncf %30 : vector<2x4xf32> to vector<2x4xbf16>
    %cst_28 = arith.constant dense<0.000000e+00> : vector<2x32xf32>
    %32 = tpu.matmul %31, %0, %cst_28 {dimension_numbers = #tpu.dot_dimension_numbers<[1], [0], [0], [1], [0, 0, 1, 1], [], []>} : vector<2x4xbf16>, vector<4x32xbf16>, vector<2x32xf32> -> vector<2x32xf32>
    %c0_29 = arith.constant 0 : index
    %c0_30 = arith.constant 0 : index
    %c0_31 = arith.constant 0 : index
    %33 = vector.load %arg0[%c0_29, %c0_30, %c0_31] : memref<8x2x4xf32, #tpu.memory_space<vmem>>, vector<1x2x4xf32>
    %34 = vector.shape_cast %33 : vector<1x2x4xf32> to vector<2x4xf32>
    %35 = arith.truncf %34 : vector<2x4xf32> to vector<2x4xbf16>
    %c0_32 = arith.constant 0 : index
    %c0_33 = arith.constant 0 : index
    %c0_34 = arith.constant 0 : index
    %36 = vector.load %arg3[%c0_32, %c0_33, %c0_34] : memref<3x4x32xbf16, #tpu.memory_space<vmem>>, vector<1x4x32xbf16>
    %37 = vector.shape_cast %36 : vector<1x4x32xbf16> to vector<4x32xbf16>
    %cst_35 = arith.constant dense<0.000000e+00> : vector<2x32xf32>
    %38 = tpu.matmul %35, %37, %cst_35 {dimension_numbers = #tpu.dot_dimension_numbers<[1], [0], [0], [1], [0, 0, 1, 1], [], []>} : vector<2x4xbf16>, vector<4x32xbf16>, vector<2x32xf32> -> vector<2x32xf32>
    %39 = arith.addf %32, %38 : vector<2x32xf32>
    %c1_36 = arith.constant 1 : index
    %c0_37 = arith.constant 0 : index
    %c0_38 = arith.constant 0 : index
    %40 = vector.load %arg0[%c1_36, %c0_37, %c0_38] : memref<8x2x4xf32, #tpu.memory_space<vmem>>, vector<1x2x4xf32>
    %41 = vector.shape_cast %40 : vector<1x2x4xf32> to vector<2x4xf32>
    %42 = arith.truncf %41 : vector<2x4xf32> to vector<2x4xbf16>
    %c1_39 = arith.constant 1 : index
    %c0_40 = arith.constant 0 : index
    %c0_41 = arith.constant 0 : index
    %43 = vector.load %arg3[%c1_39, %c0_40, %c0_41] : memref<3x4x32xbf16, #tpu.memory_space<vmem>>, vector<1x4x32xbf16>
    %44 = vector.shape_cast %43 : vector<1x4x32xbf16> to vector<4x32xbf16>
    %cst_42 = arith.constant dense<0.000000e+00> : vector<2x32xf32>
    %45 = tpu.matmul %42, %44, %cst_42 {dimension_numbers = #tpu.dot_dimension_numbers<[1], [0], [0], [1], [0, 0, 1, 1], [], []>} : vector<2x4xbf16>, vector<4x32xbf16>, vector<2x32xf32> -> vector<2x32xf32>
    %46 = arith.addf %39, %45 : vector<2x32xf32>
    %c2_43 = arith.constant 2 : index
    %c0_44 = arith.constant 0 : index
    %c0_45 = arith.constant 0 : index
    %47 = vector.load %arg0[%c2_43, %c0_44, %c0_45] : memref<8x2x4xf32, #tpu.memory_space<vmem>>, vector<1x2x4xf32>
    %48 = vector.shape_cast %47 : vector<1x2x4xf32> to vector<2x4xf32>
    %49 = arith.truncf %48 : vector<2x4xf32> to vector<2x4xbf16>
    %c2_46 = arith.constant 2 : index
    %c0_47 = arith.constant 0 : index
    %c0_48 = arith.constant 0 : index
    %50 = vector.load %arg3[%c2_46, %c0_47, %c0_48] : memref<3x4x32xbf16, #tpu.memory_space<vmem>>, vector<1x4x32xbf16>
    %51 = vector.shape_cast %50 : vector<1x4x32xbf16> to vector<4x32xbf16>
    %cst_49 = arith.constant dense<0.000000e+00> : vector<2x32xf32>
    %52 = tpu.matmul %49, %51, %cst_49 {dimension_numbers = #tpu.dot_dimension_numbers<[1], [0], [0], [1], [0, 0, 1, 1], [], []>} : vector<2x4xbf16>, vector<4x32xbf16>, vector<2x32xf32> -> vector<2x32xf32>
    %53 = arith.addf %46, %52 : vector<2x32xf32>
    %c1_50 = arith.constant 1 : index
    %c0_51 = arith.constant 0 : index
    %c0_52 = arith.constant 0 : index
    %54 = vector.load %arg14[%c1_50, %c0_51, %c0_52] : memref<8x2x32xf32, #tpu.memory_space<vmem>>, vector<1x2x32xf32>
    %55 = vector.shape_cast %54 : vector<1x2x32xf32> to vector<2x32xf32>
    %56 = vector.shape_cast %53 : vector<2x32xf32> to vector<1x2x32xf32>
    tpu.vector_store %arg14[%c1_50, %c0_51, %c0_52], %56 {strides = array<i32>} : memref<8x2x32xf32, #tpu.memory_space<vmem>>, vector<1x2x32xf32>,
    %c2_53 = arith.constant 2 : index
    %c0_54 = arith.constant 0 : index
    %c0_55 = arith.constant 0 : index
    %57 = vector.load %arg1[%c2_53, %c0_54, %c0_55] : memref<8x2x4xf32, #tpu.memory_space<vmem>>, vector<1x2x4xf32>
    %58 = vector.shape_cast %57 : vector<1x2x4xf32> to vector<2x4xf32>
    %59 = arith.truncf %58 : vector<2x4xf32> to vector<2x4xbf16>
    %cst_56 = arith.constant dense<0.000000e+00> : vector<2x32xf32>
    %60 = tpu.matmul %59, %0, %cst_56 {dimension_numbers = #tpu.dot_dimension_numbers<[1], [0], [0], [1], [0, 0, 1, 1], [], []>} : vector<2x4xbf16>, vector<4x32xbf16>, vector<2x32xf32> -> vector<2x32xf32>
    %c1_57 = arith.constant 1 : index
    %c0_58 = arith.constant 0 : index
    %c0_59 = arith.constant 0 : index
    %61 = vector.load %arg0[%c1_57, %c0_58, %c0_59] : memref<8x2x4xf32, #tpu.memory_space<vmem>>, vector<1x2x4xf32>
    %62 = vector.shape_cast %61 : vector<1x2x4xf32> to vector<2x4xf32>
    %63 = arith.truncf %62 : vector<2x4xf32> to vector<2x4xbf16>
    %c0_60 = arith.constant 0 : index
    %c0_61 = arith.constant 0 : index
    %c0_62 = arith.constant 0 : index
    %64 = vector.load %arg3[%c0_60, %c0_61, %c0_62] : memref<3x4x32xbf16, #tpu.memory_space<vmem>>, vector<1x4x32xbf16>
    %65 = vector.shape_cast %64 : vector<1x4x32xbf16> to vector<4x32xbf16>
    %cst_63 = arith.constant dense<0.000000e+00> : vector<2x32xf32>
    %66 = tpu.matmul %63, %65, %cst_63 {dimension_numbers = #tpu.dot_dimension_numbers<[1], [0], [0], [1], [0, 0, 1, 1], [], []>} : vector<2x4xbf16>, vector<4x32xbf16>, vector<2x32xf32> -> vector<2x32xf32>
    %67 = arith.addf %60, %66 : vector<2x32xf32>
    %c2_64 = arith.constant 2 : index
    %c0_65 = arith.constant 0 : index
    %c0_66 = arith.constant 0 : index
    %68 = vector.load %arg0[%c2_64, %c0_65, %c0_66] : memref<8x2x4xf32, #tpu.memory_space<vmem>>, vector<1x2x4xf32>
    %69 = vector.shape_cast %68 : vector<1x2x4xf32> to vector<2x4xf32>
    %70 = arith.truncf %69 : vector<2x4xf32> to vector<2x4xbf16>
    %c1_67 = arith.constant 1 : index
    %c0_68 = arith.constant 0 : index
    %c0_69 = arith.constant 0 : index
    %71 = vector.load %arg3[%c1_67, %c0_68, %c0_69] : memref<3x4x32xbf16, #tpu.memory_space<vmem>>, vector<1x4x32xbf16>
    %72 = vector.shape_cast %71 : vector<1x4x32xbf16> to vector<4x32xbf16>
    %cst_70 = arith.constant dense<0.000000e+00> : vector<2x32xf32>
    %73 = tpu.matmul %70, %72, %cst_70 {dimension_numbers = #tpu.dot_dimension_numbers<[1], [0], [0], [1], [0, 0, 1, 1], [], []>} : vector<2x4xbf16>, vector<4x32xbf16>, vector<2x32xf32> -> vector<2x32xf32>
    %74 = arith.addf %67, %73 : vector<2x32xf32>
    %c3 = arith.constant 3 : index
    %c0_71 = arith.constant 0 : index
    %c0_72 = arith.constant 0 : index
    %75 = vector.load %arg0[%c3, %c0_71, %c0_72] : memref<8x2x4xf32, #tpu.memory_space<vmem>>, vector<1x2x4xf32>
    %76 = vector.shape_cast %75 : vector<1x2x4xf32> to vector<2x4xf32>
    %77 = arith.truncf %76 : vector<2x4xf32> to vector<2x4xbf16>
    %c2_73 = arith.constant 2 : index
    %c0_74 = arith.constant 0 : index
    %c0_75 = arith.constant 0 : index
    %78 = vector.load %arg3[%c2_73, %c0_74, %c0_75] : memref<3x4x32xbf16, #tpu.memory_space<vmem>>, vector<1x4x32xbf16>
    %79 = vector.shape_cast %78 : vector<1x4x32xbf16> to vector<4x32xbf16>
    %cst_76 = arith.constant dense<0.000000e+00> : vector<2x32xf32>
    %80 = tpu.matmul %77, %79, %cst_76 {dimension_numbers = #tpu.dot_dimension_numbers<[1], [0], [0], [1], [0, 0, 1, 1], [], []>} : vector<2x4xbf16>, vector<4x32xbf16>, vector<2x32xf32> -> vector<2x32xf32>
    %81 = arith.addf %74, %80 : vector<2x32xf32>
    %c2_77 = arith.constant 2 : index
    %c0_78 = arith.constant 0 : index
    %c0_79 = arith.constant 0 : index
    %82 = vector.load %arg14[%c2_77, %c0_78, %c0_79] : memref<8x2x32xf32, #tpu.memory_space<vmem>>, vector<1x2x32xf32>
    %83 = vector.shape_cast %82 : vector<1x2x32xf32> to vector<2x32xf32>
    %84 = vector.shape_cast %81 : vector<2x32xf32> to vector<1x2x32xf32>
    tpu.vector_store %arg14[%c2_77, %c0_78, %c0_79], %84 {strides = array<i32>} : memref<8x2x32xf32, #tpu.memory_space<vmem>>, vector<1x2x32xf32>,
    %c3_80 = arith.constant 3 : index
    %c0_81 = arith.constant 0 : index
    %c0_82 = arith.constant 0 : index
    %85 = vector.load %arg1[%c3_80, %c0_81, %c0_82] : memref<8x2x4xf32, #tpu.memory_space<vmem>>, vector<1x2x4xf32>
    %86 = vector.shape_cast %85 : vector<1x2x4xf32> to vector<2x4xf32>
    %87 = arith.truncf %86 : vector<2x4xf32> to vector<2x4xbf16>
    %cst_83 = arith.constant dense<0.000000e+00> : vector<2x32xf32>
    %88 = tpu.matmul %87, %0, %cst_83 {dimension_numbers = #tpu.dot_dimension_numbers<[1], [0], [0], [1], [0, 0, 1, 1], [], []>} : vector<2x4xbf16>, vector<4x32xbf16>, vector<2x32xf32> -> vector<2x32xf32>
    %c2_84 = arith.constant 2 : index
    %c0_85 = arith.constant 0 : index
    %c0_86 = arith.constant 0 : index
    %89 = vector.load %arg0[%c2_84, %c0_85, %c0_86] : memref<8x2x4xf32, #tpu.memory_space<vmem>>, vector<1x2x4xf32>
    %90 = vector.shape_cast %89 : vector<1x2x4xf32> to vector<2x4xf32>
    %91 = arith.truncf %90 : vector<2x4xf32> to vector<2x4xbf16>
    %c0_87 = arith.constant 0 : index
    %c0_88 = arith.constant 0 : index
    %c0_89 = arith.constant 0 : index
    %92 = vector.load %arg3[%c0_87, %c0_88, %c0_89] : memref<3x4x32xbf16, #tpu.memory_space<vmem>>, vector<1x4x32xbf16>
    %93 = vector.shape_cast %92 : vector<1x4x32xbf16> to vector<4x32xbf16>
    %cst_90 = arith.constant dense<0.000000e+00> : vector<2x32xf32>
    %94 = tpu.matmul %91, %93, %cst_90 {dimension_numbers = #tpu.dot_dimension_numbers<[1], [0], [0], [1], [0, 0, 1, 1], [], []>} : vector<2x4xbf16>, vector<4x32xbf16>, vector<2x32xf32> -> vector<2x32xf32>
    %95 = arith.addf %88, %94 : vector<2x32xf32>
    %c3_91 = arith.constant 3 : index
    %c0_92 = arith.constant 0 : index
    %c0_93 = arith.constant 0 : index
    %96 = vector.load %arg0[%c3_91, %c0_92, %c0_93] : memref<8x2x4xf32, #tpu.memory_space<vmem>>, vector<1x2x4xf32>
    %97 = vector.shape_cast %96 : vector<1x2x4xf32> to vector<2x4xf32>
    %98 = arith.truncf %97 : vector<2x4xf32> to vector<2x4xbf16>
    %c1_94 = arith.constant 1 : index
    %c0_95 = arith.constant 0 : index
    %c0_96 = arith.constant 0 : index
    %99 = vector.load %arg3[%c1_94, %c0_95, %c0_96] : memref<3x4x32xbf16, #tpu.memory_space<vmem>>, vector<1x4x32xbf16>
    %100 = vector.shape_cast %99 : vector<1x4x32xbf16> to vector<4x32xbf16>
    %cst_97 = arith.constant dense<0.000000e+00> : vector<2x32xf32>
    %101 = tpu.matmul %98, %100, %cst_97 {dimension_numbers = #tpu.dot_dimension_numbers<[1], [0], [0], [1], [0, 0, 1, 1], [], []>} : vector<2x4xbf16>, vector<4x32xbf16>, vector<2x32xf32> -> vector<2x32xf32>
    %102 = arith.addf %95, %101 : vector<2x32xf32>
    %c4 = arith.constant 4 : index
    %c0_98 = arith.constant 0 : index
    %c0_99 = arith.constant 0 : index
    %103 = vector.load %arg0[%c4, %c0_98, %c0_99] : memref<8x2x4xf32, #tpu.memory_space<vmem>>, vector<1x2x4xf32>
    %104 = vector.shape_cast %103 : vector<1x2x4xf32> to vector<2x4xf32>
    %105 = arith.truncf %104 : vector<2x4xf32> to vector<2x4xbf16>
    %c2_100 = arith.constant 2 : index
    %c0_101 = arith.constant 0 : index
    %c0_102 = arith.constant 0 : index
    %106 = vector.load %arg3[%c2_100, %c0_101, %c0_102] : memref<3x4x32xbf16, #tpu.memory_space<vmem>>, vector<1x4x32xbf16>
    %107 = vector.shape_cast %106 : vector<1x4x32xbf16> to vector<4x32xbf16>
    %cst_103 = arith.constant dense<0.000000e+00> : vector<2x32xf32>
    %108 = tpu.matmul %105, %107, %cst_103 {dimension_numbers = #tpu.dot_dimension_numbers<[1], [0], [0], [1], [0, 0, 1, 1], [], []>} : vector<2x4xbf16>, vector<4x32xbf16>, vector<2x32xf32> -> vector<2x32xf32>
    %109 = arith.addf %102, %108 : vector<2x32xf32>
    %c3_104 = arith.constant 3 : index
    %c0_105 = arith.constant 0 : index
    %c0_106 = arith.constant 0 : index
    %110 = vector.load %arg14[%c3_104, %c0_105, %c0_106] : memref<8x2x32xf32, #tpu.memory_space<vmem>>, vector<1x2x32xf32>
    %111 = vector.shape_cast %110 : vector<1x2x32xf32> to vector<2x32xf32>
    %112 = vector.shape_cast %109 : vector<2x32xf32> to vector<1x2x32xf32>
    tpu.vector_store %arg14[%c3_104, %c0_105, %c0_106], %112 {strides = array<i32>} : memref<8x2x32xf32, #tpu.memory_space<vmem>>, vector<1x2x32xf32>,
    %c4_107 = arith.constant 4 : index
    %c0_108 = arith.constant 0 : index
    %c0_109 = arith.constant 0 : index
    %113 = vector.load %arg1[%c4_107, %c0_108, %c0_109] : memref<8x2x4xf32, #tpu.memory_space<vmem>>, vector<1x2x4xf32>
    %114 = vector.shape_cast %113 : vector<1x2x4xf32> to vector<2x4xf32>
    %115 = arith.truncf %114 : vector<2x4xf32> to vector<2x4xbf16>
    %cst_110 = arith.constant dense<0.000000e+00> : vector<2x32xf32>
    %116 = tpu.matmul %115, %0, %cst_110 {dimension_numbers = #tpu.dot_dimension_numbers<[1], [0], [0], [1], [0, 0, 1, 1], [], []>} : vector<2x4xbf16>, vector<4x32xbf16>, vector<2x32xf32> -> vector<2x32xf32>
    %c3_111 = arith.constant 3 : index
    %c0_112 = arith.constant 0 : index
    %c0_113 = arith.constant 0 : index
    %117 = vector.load %arg0[%c3_111, %c0_112, %c0_113] : memref<8x2x4xf32, #tpu.memory_space<vmem>>, vector<1x2x4xf32>
    %118 = vector.shape_cast %117 : vector<1x2x4xf32> to vector<2x4xf32>
    %119 = arith.truncf %118 : vector<2x4xf32> to vector<2x4xbf16>
    %c0_114 = arith.constant 0 : index
    %c0_115 = arith.constant 0 : index
    %c0_116 = arith.constant 0 : index
    %120 = vector.load %arg3[%c0_114, %c0_115, %c0_116] : memref<3x4x32xbf16, #tpu.memory_space<vmem>>, vector<1x4x32xbf16>
    %121 = vector.shape_cast %120 : vector<1x4x32xbf16> to vector<4x32xbf16>
    %cst_117 = arith.constant dense<0.000000e+00> : vector<2x32xf32>
    %122 = tpu.matmul %119, %121, %cst_117 {dimension_numbers = #tpu.dot_dimension_numbers<[1], [0], [0], [1], [0, 0, 1, 1], [], []>} : vector<2x4xbf16>, vector<4x32xbf16>, vector<2x32xf32> -> vector<2x32xf32>
    %123 = arith.addf %116, %122 : vector<2x32xf32>
    %c4_118 = arith.constant 4 : index
    %c0_119 = arith.constant 0 : index
    %c0_120 = arith.constant 0 : index
    %124 = vector.load %arg0[%c4_118, %c0_119, %c0_120] : memref<8x2x4xf32, #tpu.memory_space<vmem>>, vector<1x2x4xf32>
    %125 = vector.shape_cast %124 : vector<1x2x4xf32> to vector<2x4xf32>
    %126 = arith.truncf %125 : vector<2x4xf32> to vector<2x4xbf16>
    %c1_121 = arith.constant 1 : index
    %c0_122 = arith.constant 0 : index
    %c0_123 = arith.constant 0 : index
    %127 = vector.load %arg3[%c1_121, %c0_122, %c0_123] : memref<3x4x32xbf16, #tpu.memory_space<vmem>>, vector<1x4x32xbf16>
    %128 = vector.shape_cast %127 : vector<1x4x32xbf16> to vector<4x32xbf16>
    %cst_124 = arith.constant dense<0.000000e+00> : vector<2x32xf32>
    %129 = tpu.matmul %126, %128, %cst_124 {dimension_numbers = #tpu.dot_dimension_numbers<[1], [0], [0], [1], [0, 0, 1, 1], [], []>} : vector<2x4xbf16>, vector<4x32xbf16>, vector<2x32xf32> -> vector<2x32xf32>
    %130 = arith.addf %123, %129 : vector<2x32xf32>
    %c5 = arith.constant 5 : index
    %c0_125 = arith.constant 0 : index
    %c0_126 = arith.constant 0 : index
    %131 = vector.load %arg0[%c5, %c0_125, %c0_126] : memref<8x2x4xf32, #tpu.memory_space<vmem>>, vector<1x2x4xf32>
    %132 = vector.shape_cast %131 : vector<1x2x4xf32> to vector<2x4xf32>
    %133 = arith.truncf %132 : vector<2x4xf32> to vector<2x4xbf16>
    %c2_127 = arith.constant 2 : index
    %c0_128 = arith.constant 0 : index
    %c0_129 = arith.constant 0 : index
    %134 = vector.load %arg3[%c2_127, %c0_128, %c0_129] : memref<3x4x32xbf16, #tpu.memory_space<vmem>>, vector<1x4x32xbf16>
    %135 = vector.shape_cast %134 : vector<1x4x32xbf16> to vector<4x32xbf16>
    %cst_130 = arith.constant dense<0.000000e+00> : vector<2x32xf32>
    %136 = tpu.matmul %133, %135, %cst_130 {dimension_numbers = #tpu.dot_dimension_numbers<[1], [0], [0], [1], [0, 0, 1, 1], [], []>} : vector<2x4xbf16>, vector<4x32xbf16>, vector<2x32xf32> -> vector<2x32xf32>
    %137 = arith.addf %130, %136 : vector<2x32xf32>
    %c4_131 = arith.constant 4 : index
    %c0_132 = arith.constant 0 : index
    %c0_133 = arith.constant 0 : index
    %138 = vector.load %arg14[%c4_131, %c0_132, %c0_133] : memref<8x2x32xf32, #tpu.memory_space<vmem>>, vector<1x2x32xf32>
    %139 = vector.shape_cast %138 : vector<1x2x32xf32> to vector<2x32xf32>
    %140 = vector.shape_cast %137 : vector<2x32xf32> to vector<1x2x32xf32>
    tpu.vector_store %arg14[%c4_131, %c0_132, %c0_133], %140 {strides = array<i32>} : memref<8x2x32xf32, #tpu.memory_space<vmem>>, vector<1x2x32xf32>,
    %c5_134 = arith.constant 5 : index
    %c0_135 = arith.constant 0 : index
    %c0_136 = arith.constant 0 : index
    %141 = vector.load %arg1[%c5_134, %c0_135, %c0_136] : memref<8x2x4xf32, #tpu.memory_space<vmem>>, vector<1x2x4xf32>
    %142 = vector.shape_cast %141 : vector<1x2x4xf32> to vector<2x4xf32>
    %143 = arith.truncf %142 : vector<2x4xf32> to vector<2x4xbf16>
    %cst_137 = arith.constant dense<0.000000e+00> : vector<2x32xf32>
    %144 = tpu.matmul %143, %0, %cst_137 {dimension_numbers = #tpu.dot_dimension_numbers<[1], [0], [0], [1], [0, 0, 1, 1], [], []>} : vector<2x4xbf16>, vector<4x32xbf16>, vector<2x32xf32> -> vector<2x32xf32>
    %c4_138 = arith.constant 4 : index
    %c0_139 = arith.constant 0 : index
    %c0_140 = arith.constant 0 : index
    %145 = vector.load %arg0[%c4_138, %c0_139, %c0_140] : memref<8x2x4xf32, #tpu.memory_space<vmem>>, vector<1x2x4xf32>
    %146 = vector.shape_cast %145 : vector<1x2x4xf32> to vector<2x4xf32>
    %147 = arith.truncf %146 : vector<2x4xf32> to vector<2x4xbf16>
    %c0_141 = arith.constant 0 : index
    %c0_142 = arith.constant 0 : index
    %c0_143 = arith.constant 0 : index
    %148 = vector.load %arg3[%c0_141, %c0_142, %c0_143] : memref<3x4x32xbf16, #tpu.memory_space<vmem>>, vector<1x4x32xbf16>
    %149 = vector.shape_cast %148 : vector<1x4x32xbf16> to vector<4x32xbf16>
    %cst_144 = arith.constant dense<0.000000e+00> : vector<2x32xf32>
    %150 = tpu.matmul %147, %149, %cst_144 {dimension_numbers = #tpu.dot_dimension_numbers<[1], [0], [0], [1], [0, 0, 1, 1], [], []>} : vector<2x4xbf16>, vector<4x32xbf16>, vector<2x32xf32> -> vector<2x32xf32>
    %151 = arith.addf %144, %150 : vector<2x32xf32>
    %c5_145 = arith.constant 5 : index
    %c0_146 = arith.constant 0 : index
    %c0_147 = arith.constant 0 : index
    %152 = vector.load %arg0[%c5_145, %c0_146, %c0_147] : memref<8x2x4xf32, #tpu.memory_space<vmem>>, vector<1x2x4xf32>
    %153 = vector.shape_cast %152 : vector<1x2x4xf32> to vector<2x4xf32>
    %154 = arith.truncf %153 : vector<2x4xf32> to vector<2x4xbf16>
    %c1_148 = arith.constant 1 : index
    %c0_149 = arith.constant 0 : index
    %c0_150 = arith.constant 0 : index
    %155 = vector.load %arg3[%c1_148, %c0_149, %c0_150] : memref<3x4x32xbf16, #tpu.memory_space<vmem>>, vector<1x4x32xbf16>
    %156 = vector.shape_cast %155 : vector<1x4x32xbf16> to vector<4x32xbf16>
    %cst_151 = arith.constant dense<0.000000e+00> : vector<2x32xf32>
    %157 = tpu.matmul %154, %156, %cst_151 {dimension_numbers = #tpu.dot_dimension_numbers<[1], [0], [0], [1], [0, 0, 1, 1], [], []>} : vector<2x4xbf16>, vector<4x32xbf16>, vector<2x32xf32> -> vector<2x32xf32>
    %158 = arith.addf %151, %157 : vector<2x32xf32>
    %c6 = arith.constant 6 : index
    %c0_152 = arith.constant 0 : index
    %c0_153 = arith.constant 0 : index
    %159 = vector.load %arg0[%c6, %c0_152, %c0_153] : memref<8x2x4xf32, #tpu.memory_space<vmem>>, vector<1x2x4xf32>
    %160 = vector.shape_cast %159 : vector<1x2x4xf32> to vector<2x4xf32>
    %161 = arith.truncf %160 : vector<2x4xf32> to vector<2x4xbf16>
    %c2_154 = arith.constant 2 : index
    %c0_155 = arith.constant 0 : index
    %c0_156 = arith.constant 0 : index
    %162 = vector.load %arg3[%c2_154, %c0_155, %c0_156] : memref<3x4x32xbf16, #tpu.memory_space<vmem>>, vector<1x4x32xbf16>
    %163 = vector.shape_cast %162 : vector<1x4x32xbf16> to vector<4x32xbf16>
    %cst_157 = arith.constant dense<0.000000e+00> : vector<2x32xf32>
    %164 = tpu.matmul %161, %163, %cst_157 {dimension_numbers = #tpu.dot_dimension_numbers<[1], [0], [0], [1], [0, 0, 1, 1], [], []>} : vector<2x4xbf16>, vector<4x32xbf16>, vector<2x32xf32> -> vector<2x32xf32>
    %165 = arith.addf %158, %164 : vector<2x32xf32>
    %c5_158 = arith.constant 5 : index
    %c0_159 = arith.constant 0 : index
    %c0_160 = arith.constant 0 : index
    %166 = vector.load %arg14[%c5_158, %c0_159, %c0_160] : memref<8x2x32xf32, #tpu.memory_space<vmem>>, vector<1x2x32xf32>
    %167 = vector.shape_cast %166 : vector<1x2x32xf32> to vector<2x32xf32>
    %168 = vector.shape_cast %165 : vector<2x32xf32> to vector<1x2x32xf32>
    tpu.vector_store %arg14[%c5_158, %c0_159, %c0_160], %168 {strides = array<i32>} : memref<8x2x32xf32, #tpu.memory_space<vmem>>, vector<1x2x32xf32>,
    %c6_161 = arith.constant 6 : index
    %c0_162 = arith.constant 0 : index
    %c0_163 = arith.constant 0 : index
    %169 = vector.load %arg1[%c6_161, %c0_162, %c0_163] : memref<8x2x4xf32, #tpu.memory_space<vmem>>, vector<1x2x4xf32>
    %170 = vector.shape_cast %169 : vector<1x2x4xf32> to vector<2x4xf32>
    %171 = arith.truncf %170 : vector<2x4xf32> to vector<2x4xbf16>
    %cst_164 = arith.constant dense<0.000000e+00> : vector<2x32xf32>
    %172 = tpu.matmul %171, %0, %cst_164 {dimension_numbers = #tpu.dot_dimension_numbers<[1], [0], [0], [1], [0, 0, 1, 1], [], []>} : vector<2x4xbf16>, vector<4x32xbf16>, vector<2x32xf32> -> vector<2x32xf32>
    %c5_165 = arith.constant 5 : index
    %c0_166 = arith.constant 0 : index
    %c0_167 = arith.constant 0 : index
    %173 = vector.load %arg0[%c5_165, %c0_166, %c0_167] : memref<8x2x4xf32, #tpu.memory_space<vmem>>, vector<1x2x4xf32>
    %174 = vector.shape_cast %173 : vector<1x2x4xf32> to vector<2x4xf32>
    %175 = arith.truncf %174 : vector<2x4xf32> to vector<2x4xbf16>
    %c0_168 = arith.constant 0 : index
    %c0_169 = arith.constant 0 : index
    %c0_170 = arith.constant 0 : index
    %176 = vector.load %arg3[%c0_168, %c0_169, %c0_170] : memref<3x4x32xbf16, #tpu.memory_space<vmem>>, vector<1x4x32xbf16>
    %177 = vector.shape_cast %176 : vector<1x4x32xbf16> to vector<4x32xbf16>
    %cst_171 = arith.constant dense<0.000000e+00> : vector<2x32xf32>
    %178 = tpu.matmul %175, %177, %cst_171 {dimension_numbers = #tpu.dot_dimension_numbers<[1], [0], [0], [1], [0, 0, 1, 1], [], []>} : vector<2x4xbf16>, vector<4x32xbf16>, vector<2x32xf32> -> vector<2x32xf32>
    %179 = arith.addf %172, %178 : vector<2x32xf32>
    %c6_172 = arith.constant 6 : index
    %c0_173 = arith.constant 0 : index
    %c0_174 = arith.constant 0 : index
    %180 = vector.load %arg0[%c6_172, %c0_173, %c0_174] : memref<8x2x4xf32, #tpu.memory_space<vmem>>, vector<1x2x4xf32>
    %181 = vector.shape_cast %180 : vector<1x2x4xf32> to vector<2x4xf32>
    %182 = arith.truncf %181 : vector<2x4xf32> to vector<2x4xbf16>
    %c1_175 = arith.constant 1 : index
    %c0_176 = arith.constant 0 : index
    %c0_177 = arith.constant 0 : index
    %183 = vector.load %arg3[%c1_175, %c0_176, %c0_177] : memref<3x4x32xbf16, #tpu.memory_space<vmem>>, vector<1x4x32xbf16>
    %184 = vector.shape_cast %183 : vector<1x4x32xbf16> to vector<4x32xbf16>
    %cst_178 = arith.constant dense<0.000000e+00> : vector<2x32xf32>
    %185 = tpu.matmul %182, %184, %cst_178 {dimension_numbers = #tpu.dot_dimension_numbers<[1], [0], [0], [1], [0, 0, 1, 1], [], []>} : vector<2x4xbf16>, vector<4x32xbf16>, vector<2x32xf32> -> vector<2x32xf32>
    %186 = arith.addf %179, %185 : vector<2x32xf32>
    %c7_179 = arith.constant 7 : index
    %c0_180 = arith.constant 0 : index
    %c0_181 = arith.constant 0 : index
    %187 = vector.load %arg0[%c7_179, %c0_180, %c0_181] : memref<8x2x4xf32, #tpu.memory_space<vmem>>, vector<1x2x4xf32>
    %188 = vector.shape_cast %187 : vector<1x2x4xf32> to vector<2x4xf32>
    %189 = arith.truncf %188 : vector<2x4xf32> to vector<2x4xbf16>
    %c2_182 = arith.constant 2 : index
    %c0_183 = arith.constant 0 : index
    %c0_184 = arith.constant 0 : index
    %190 = vector.load %arg3[%c2_182, %c0_183, %c0_184] : memref<3x4x32xbf16, #tpu.memory_space<vmem>>, vector<1x4x32xbf16>
    %191 = vector.shape_cast %190 : vector<1x4x32xbf16> to vector<4x32xbf16>
    %cst_185 = arith.constant dense<0.000000e+00> : vector<2x32xf32>
    %192 = tpu.matmul %189, %191, %cst_185 {dimension_numbers = #tpu.dot_dimension_numbers<[1], [0], [0], [1], [0, 0, 1, 1], [], []>} : vector<2x4xbf16>, vector<4x32xbf16>, vector<2x32xf32> -> vector<2x32xf32>
    %193 = arith.addf %186, %192 : vector<2x32xf32>
    %c6_186 = arith.constant 6 : index
    %c0_187 = arith.constant 0 : index
    %c0_188 = arith.constant 0 : index
    %194 = vector.load %arg14[%c6_186, %c0_187, %c0_188] : memref<8x2x32xf32, #tpu.memory_space<vmem>>, vector<1x2x32xf32>
    %195 = vector.shape_cast %194 : vector<1x2x32xf32> to vector<2x32xf32>
    %196 = vector.shape_cast %193 : vector<2x32xf32> to vector<1x2x32xf32>
    tpu.vector_store %arg14[%c6_186, %c0_187, %c0_188], %196 {strides = array<i32>} : memref<8x2x32xf32, #tpu.memory_space<vmem>>, vector<1x2x32xf32>,
    %c7_189 = arith.constant 7 : index
    %c0_190 = arith.constant 0 : index
    %c0_191 = arith.constant 0 : index
    %197 = vector.load %arg1[%c7_189, %c0_190, %c0_191] : memref<8x2x4xf32, #tpu.memory_space<vmem>>, vector<1x2x4xf32>
    %198 = vector.shape_cast %197 : vector<1x2x4xf32> to vector<2x4xf32>
    %199 = arith.truncf %198 : vector<2x4xf32> to vector<2x4xbf16>
    %cst_192 = arith.constant dense<0.000000e+00> : vector<2x32xf32>
    %200 = tpu.matmul %199, %0, %cst_192 {dimension_numbers = #tpu.dot_dimension_numbers<[1], [0], [0], [1], [0, 0, 1, 1], [], []>} : vector<2x4xbf16>, vector<4x32xbf16>, vector<2x32xf32> -> vector<2x32xf32>
    %c6_193 = arith.constant 6 : index
    %c0_194 = arith.constant 0 : index
    %c0_195 = arith.constant 0 : index
    %201 = vector.load %arg0[%c6_193, %c0_194, %c0_195] : memref<8x2x4xf32, #tpu.memory_space<vmem>>, vector<1x2x4xf32>
    %202 = vector.shape_cast %201 : vector<1x2x4xf32> to vector<2x4xf32>
    %203 = arith.truncf %202 : vector<2x4xf32> to vector<2x4xbf16>
    %c0_196 = arith.constant 0 : index
    %c0_197 = arith.constant 0 : index
    %c0_198 = arith.constant 0 : index
    %204 = vector.load %arg3[%c0_196, %c0_197, %c0_198] : memref<3x4x32xbf16, #tpu.memory_space<vmem>>, vector<1x4x32xbf16>
    %205 = vector.shape_cast %204 : vector<1x4x32xbf16> to vector<4x32xbf16>
    %cst_199 = arith.constant dense<0.000000e+00> : vector<2x32xf32>
    %206 = tpu.matmul %203, %205, %cst_199 {dimension_numbers = #tpu.dot_dimension_numbers<[1], [0], [0], [1], [0, 0, 1, 1], [], []>} : vector<2x4xbf16>, vector<4x32xbf16>, vector<2x32xf32> -> vector<2x32xf32>
    %207 = arith.addf %200, %206 : vector<2x32xf32>
    %c7_200 = arith.constant 7 : index
    %c0_201 = arith.constant 0 : index
    %c0_202 = arith.constant 0 : index
    %208 = vector.load %arg0[%c7_200, %c0_201, %c0_202] : memref<8x2x4xf32, #tpu.memory_space<vmem>>, vector<1x2x4xf32>
    %209 = vector.shape_cast %208 : vector<1x2x4xf32> to vector<2x4xf32>
    %210 = arith.truncf %209 : vector<2x4xf32> to vector<2x4xbf16>
    %c1_203 = arith.constant 1 : index
    %c0_204 = arith.constant 0 : index
    %c0_205 = arith.constant 0 : index
    %211 = vector.load %arg3[%c1_203, %c0_204, %c0_205] : memref<3x4x32xbf16, #tpu.memory_space<vmem>>, vector<1x4x32xbf16>
    %212 = vector.shape_cast %211 : vector<1x4x32xbf16> to vector<4x32xbf16>
    %cst_206 = arith.constant dense<0.000000e+00> : vector<2x32xf32>
    %213 = tpu.matmul %210, %212, %cst_206 {dimension_numbers = #tpu.dot_dimension_numbers<[1], [0], [0], [1], [0, 0, 1, 1], [], []>} : vector<2x4xbf16>, vector<4x32xbf16>, vector<2x32xf32> -> vector<2x32xf32>
    %214 = arith.addf %207, %213 : vector<2x32xf32>
    %c0_207 = arith.constant 0 : index
    %c0_208 = arith.constant 0 : index
    %c0_209 = arith.constant 0 : index
    %215 = vector.load %arg0[%c0_207, %c0_208, %c0_209] : memref<8x2x4xf32, #tpu.memory_space<vmem>>, vector<1x2x4xf32>
    %216 = vector.shape_cast %215 : vector<1x2x4xf32> to vector<2x4xf32>
    %217 = arith.truncf %216 : vector<2x4xf32> to vector<2x4xbf16>
    %c2_210 = arith.constant 2 : index
    %c0_211 = arith.constant 0 : index
    %c0_212 = arith.constant 0 : index
    %218 = vector.load %arg3[%c2_210, %c0_211, %c0_212] : memref<3x4x32xbf16, #tpu.memory_space<vmem>>, vector<1x4x32xbf16>
    %219 = vector.shape_cast %218 : vector<1x4x32xbf16> to vector<4x32xbf16>
    %cst_213 = arith.constant dense<0.000000e+00> : vector<2x32xf32>
    %220 = tpu.matmul %217, %219, %cst_213 {dimension_numbers = #tpu.dot_dimension_numbers<[1], [0], [0], [1], [0, 0, 1, 1], [], []>} : vector<2x4xbf16>, vector<4x32xbf16>, vector<2x32xf32> -> vector<2x32xf32>
    %221 = arith.addf %214, %220 : vector<2x32xf32>
    %c7_214 = arith.constant 7 : index
    %c0_215 = arith.constant 0 : index
    %c0_216 = arith.constant 0 : index
    %222 = vector.load %arg14[%c7_214, %c0_215, %c0_216] : memref<8x2x32xf32, #tpu.memory_space<vmem>>, vector<1x2x32xf32>
    %223 = vector.shape_cast %222 : vector<1x2x32xf32> to vector<2x32xf32>
    %224 = vector.shape_cast %221 : vector<2x32xf32> to vector<1x2x32xf32>
    tpu.vector_store %arg14[%c7_214, %c0_215, %c0_216], %224 {strides = array<i32>} : memref<8x2x32xf32, #tpu.memory_space<vmem>>, vector<1x2x32xf32>,
    %c0_217 = arith.constant 0 : index
    %c0_218 = arith.constant 0 : index
    %c0_219 = arith.constant 0 : index
    %225 = vector.load %arg5[%c0_217, %c0_218, %c0_219] : memref<2x32x128xbf16, #tpu.memory_space<vmem>>, vector<1x32x128xbf16>
    %226 = vector.shape_cast %225 : vector<1x32x128xbf16> to vector<32x128xbf16>
    %c0_220 = arith.constant 0 : index
    %c0_221 = arith.constant 0 : index
    %c0_222 = arith.constant 0 : index
    %227 = vector.load %arg6[%c0_220, %c0_221, %c0_222] : memref<2x32x128xbf16, #tpu.memory_space<vmem>>, vector<1x32x128xbf16>
    %228 = vector.shape_cast %227 : vector<1x32x128xbf16> to vector<32x128xbf16>
    %c0_223 = arith.constant 0 : index
    %c0_224 = arith.constant 0 : index
    %c0_225 = arith.constant 0 : index
    %229 = vector.load %arg7[%c0_223, %c0_224, %c0_225] : memref<2x1x128xf32, #tpu.memory_space<vmem>>, vector<1x1x128xf32>
    %230 = vector.shape_cast %229 : vector<1x1x128xf32> to vector<1x128xf32>
    %c0_226 = arith.constant 0 : index
    %c0_227 = arith.constant 0 : index
    %c0_228 = arith.constant 0 : index
    %231 = vector.load %arg14[%c0_226, %c0_227, %c0_228] : memref<8x2x32xf32, #tpu.memory_space<vmem>>, vector<1x2x32xf32>
    %232 = vector.shape_cast %231 : vector<1x2x32xf32> to vector<2x32xf32>
    %233 = arith.truncf %232 : vector<2x32xf32> to vector<2x32xbf16>
    %cst_229 = arith.constant dense<0.000000e+00> : vector<2x128xf32>
    %234 = tpu.matmul %233, %226, %cst_229 {dimension_numbers = #tpu.dot_dimension_numbers<[1], [0], [0], [1], [0, 0, 1, 1], [], []>} : vector<2x32xbf16>, vector<32x128xbf16>, vector<2x128xf32> -> vector<2x128xf32>
    %235 = vector.broadcast %230 : vector<1x128xf32> to vector<2x128xf32>
    %236 = arith.addf %234, %235 : vector<2x128xf32>
    %c0_230 = arith.constant 0 : index
    %c0_231 = arith.constant 0 : index
    %c0_232 = arith.constant 0 : index
    %237 = vector.load %arg15[%c0_230, %c0_231, %c0_232] : memref<8x2x128xf32, #tpu.memory_space<vmem>>, vector<1x2x128xf32>
    %238 = vector.shape_cast %237 : vector<1x2x128xf32> to vector<2x128xf32>
    %239 = vector.shape_cast %236 : vector<2x128xf32> to vector<1x2x128xf32>
    tpu.vector_store %arg15[%c0_230, %c0_231, %c0_232], %239 {strides = array<i32>} : memref<8x2x128xf32, #tpu.memory_space<vmem>>, vector<1x2x128xf32>,
    %c1_233 = arith.constant 1 : index
    %c0_234 = arith.constant 0 : index
    %c0_235 = arith.constant 0 : index
    %240 = vector.load %arg14[%c1_233, %c0_234, %c0_235] : memref<8x2x32xf32, #tpu.memory_space<vmem>>, vector<1x2x32xf32>
    %241 = vector.shape_cast %240 : vector<1x2x32xf32> to vector<2x32xf32>
    %242 = arith.truncf %241 : vector<2x32xf32> to vector<2x32xbf16>
    %cst_236 = arith.constant dense<0.000000e+00> : vector<2x128xf32>
    %243 = tpu.matmul %242, %226, %cst_236 {dimension_numbers = #tpu.dot_dimension_numbers<[1], [0], [0], [1], [0, 0, 1, 1], [], []>} : vector<2x32xbf16>, vector<32x128xbf16>, vector<2x128xf32> -> vector<2x128xf32>
    %244 = vector.broadcast %230 : vector<1x128xf32> to vector<2x128xf32>
    %245 = arith.addf %243, %244 : vector<2x128xf32>
    %c1_237 = arith.constant 1 : index
    %c0_238 = arith.constant 0 : index
    %c0_239 = arith.constant 0 : index
    %246 = vector.load %arg15[%c1_237, %c0_238, %c0_239] : memref<8x2x128xf32, #tpu.memory_space<vmem>>, vector<1x2x128xf32>
    %247 = vector.shape_cast %246 : vector<1x2x128xf32> to vector<2x128xf32>
    %248 = vector.shape_cast %245 : vector<2x128xf32> to vector<1x2x128xf32>
    tpu.vector_store %arg15[%c1_237, %c0_238, %c0_239], %248 {strides = array<i32>} : memref<8x2x128xf32, #tpu.memory_space<vmem>>, vector<1x2x128xf32>,
    %c2_240 = arith.constant 2 : index
    %c0_241 = arith.constant 0 : index
    %c0_242 = arith.constant 0 : index
    %249 = vector.load %arg14[%c2_240, %c0_241, %c0_242] : memref<8x2x32xf32, #tpu.memory_space<vmem>>, vector<1x2x32xf32>
    %250 = vector.shape_cast %249 : vector<1x2x32xf32> to vector<2x32xf32>
    %251 = arith.truncf %250 : vector<2x32xf32> to vector<2x32xbf16>
    %cst_243 = arith.constant dense<0.000000e+00> : vector<2x128xf32>
    %252 = tpu.matmul %251, %226, %cst_243 {dimension_numbers = #tpu.dot_dimension_numbers<[1], [0], [0], [1], [0, 0, 1, 1], [], []>} : vector<2x32xbf16>, vector<32x128xbf16>, vector<2x128xf32> -> vector<2x128xf32>
    %253 = vector.broadcast %230 : vector<1x128xf32> to vector<2x128xf32>
    %254 = arith.addf %252, %253 : vector<2x128xf32>
    %c2_244 = arith.constant 2 : index
    %c0_245 = arith.constant 0 : index
    %c0_246 = arith.constant 0 : index
    %255 = vector.load %arg15[%c2_244, %c0_245, %c0_246] : memref<8x2x128xf32, #tpu.memory_space<vmem>>, vector<1x2x128xf32>
    %256 = vector.shape_cast %255 : vector<1x2x128xf32> to vector<2x128xf32>
    %257 = vector.shape_cast %254 : vector<2x128xf32> to vector<1x2x128xf32>
    tpu.vector_store %arg15[%c2_244, %c0_245, %c0_246], %257 {strides = array<i32>} : memref<8x2x128xf32, #tpu.memory_space<vmem>>, vector<1x2x128xf32>,
    %c3_247 = arith.constant 3 : index
    %c0_248 = arith.constant 0 : index
    %c0_249 = arith.constant 0 : index
    %258 = vector.load %arg14[%c3_247, %c0_248, %c0_249] : memref<8x2x32xf32, #tpu.memory_space<vmem>>, vector<1x2x32xf32>
    %259 = vector.shape_cast %258 : vector<1x2x32xf32> to vector<2x32xf32>
    %260 = arith.truncf %259 : vector<2x32xf32> to vector<2x32xbf16>
    %cst_250 = arith.constant dense<0.000000e+00> : vector<2x128xf32>
    %261 = tpu.matmul %260, %226, %cst_250 {dimension_numbers = #tpu.dot_dimension_numbers<[1], [0], [0], [1], [0, 0, 1, 1], [], []>} : vector<2x32xbf16>, vector<32x128xbf16>, vector<2x128xf32> -> vector<2x128xf32>
    %262 = vector.broadcast %230 : vector<1x128xf32> to vector<2x128xf32>
    %263 = arith.addf %261, %262 : vector<2x128xf32>
    %c3_251 = arith.constant 3 : index
    %c0_252 = arith.constant 0 : index
    %c0_253 = arith.constant 0 : index
    %264 = vector.load %arg15[%c3_251, %c0_252, %c0_253] : memref<8x2x128xf32, #tpu.memory_space<vmem>>, vector<1x2x128xf32>
    %265 = vector.shape_cast %264 : vector<1x2x128xf32> to vector<2x128xf32>
    %266 = vector.shape_cast %263 : vector<2x128xf32> to vector<1x2x128xf32>
    tpu.vector_store %arg15[%c3_251, %c0_252, %c0_253], %266 {strides = array<i32>} : memref<8x2x128xf32, #tpu.memory_space<vmem>>, vector<1x2x128xf32>,
    %c4_254 = arith.constant 4 : index
    %c0_255 = arith.constant 0 : index
    %c0_256 = arith.constant 0 : index
    %267 = vector.load %arg14[%c4_254, %c0_255, %c0_256] : memref<8x2x32xf32, #tpu.memory_space<vmem>>, vector<1x2x32xf32>
    %268 = vector.shape_cast %267 : vector<1x2x32xf32> to vector<2x32xf32>
    %269 = arith.truncf %268 : vector<2x32xf32> to vector<2x32xbf16>
    %cst_257 = arith.constant dense<0.000000e+00> : vector<2x128xf32>
    %270 = tpu.matmul %269, %226, %cst_257 {dimension_numbers = #tpu.dot_dimension_numbers<[1], [0], [0], [1], [0, 0, 1, 1], [], []>} : vector<2x32xbf16>, vector<32x128xbf16>, vector<2x128xf32> -> vector<2x128xf32>
    %271 = vector.broadcast %230 : vector<1x128xf32> to vector<2x128xf32>
    %272 = arith.addf %270, %271 : vector<2x128xf32>
    %c4_258 = arith.constant 4 : index
    %c0_259 = arith.constant 0 : index
    %c0_260 = arith.constant 0 : index
    %273 = vector.load %arg15[%c4_258, %c0_259, %c0_260] : memref<8x2x128xf32, #tpu.memory_space<vmem>>, vector<1x2x128xf32>
    %274 = vector.shape_cast %273 : vector<1x2x128xf32> to vector<2x128xf32>
    %275 = vector.shape_cast %272 : vector<2x128xf32> to vector<1x2x128xf32>
    tpu.vector_store %arg15[%c4_258, %c0_259, %c0_260], %275 {strides = array<i32>} : memref<8x2x128xf32, #tpu.memory_space<vmem>>, vector<1x2x128xf32>,
    %c5_261 = arith.constant 5 : index
    %c0_262 = arith.constant 0 : index
    %c0_263 = arith.constant 0 : index
    %276 = vector.load %arg14[%c5_261, %c0_262, %c0_263] : memref<8x2x32xf32, #tpu.memory_space<vmem>>, vector<1x2x32xf32>
    %277 = vector.shape_cast %276 : vector<1x2x32xf32> to vector<2x32xf32>
    %278 = arith.truncf %277 : vector<2x32xf32> to vector<2x32xbf16>
    %cst_264 = arith.constant dense<0.000000e+00> : vector<2x128xf32>
    %279 = tpu.matmul %278, %226, %cst_264 {dimension_numbers = #tpu.dot_dimension_numbers<[1], [0], [0], [1], [0, 0, 1, 1], [], []>} : vector<2x32xbf16>, vector<32x128xbf16>, vector<2x128xf32> -> vector<2x128xf32>
    %280 = vector.broadcast %230 : vector<1x128xf32> to vector<2x128xf32>
    %281 = arith.addf %279, %280 : vector<2x128xf32>
    %c5_265 = arith.constant 5 : index
    %c0_266 = arith.constant 0 : index
    %c0_267 = arith.constant 0 : index
    %282 = vector.load %arg15[%c5_265, %c0_266, %c0_267] : memref<8x2x128xf32, #tpu.memory_space<vmem>>, vector<1x2x128xf32>
    %283 = vector.shape_cast %282 : vector<1x2x128xf32> to vector<2x128xf32>
    %284 = vector.shape_cast %281 : vector<2x128xf32> to vector<1x2x128xf32>
    tpu.vector_store %arg15[%c5_265, %c0_266, %c0_267], %284 {strides = array<i32>} : memref<8x2x128xf32, #tpu.memory_space<vmem>>, vector<1x2x128xf32>,
    %c6_268 = arith.constant 6 : index
    %c0_269 = arith.constant 0 : index
    %c0_270 = arith.constant 0 : index
    %285 = vector.load %arg14[%c6_268, %c0_269, %c0_270] : memref<8x2x32xf32, #tpu.memory_space<vmem>>, vector<1x2x32xf32>
    %286 = vector.shape_cast %285 : vector<1x2x32xf32> to vector<2x32xf32>
    %287 = arith.truncf %286 : vector<2x32xf32> to vector<2x32xbf16>
    %cst_271 = arith.constant dense<0.000000e+00> : vector<2x128xf32>
    %288 = tpu.matmul %287, %226, %cst_271 {dimension_numbers = #tpu.dot_dimension_numbers<[1], [0], [0], [1], [0, 0, 1, 1], [], []>} : vector<2x32xbf16>, vector<32x128xbf16>, vector<2x128xf32> -> vector<2x128xf32>
    %289 = vector.broadcast %230 : vector<1x128xf32> to vector<2x128xf32>
    %290 = arith.addf %288, %289 : vector<2x128xf32>
    %c6_272 = arith.constant 6 : index
    %c0_273 = arith.constant 0 : index
    %c0_274 = arith.constant 0 : index
    %291 = vector.load %arg15[%c6_272, %c0_273, %c0_274] : memref<8x2x128xf32, #tpu.memory_space<vmem>>, vector<1x2x128xf32>
    %292 = vector.shape_cast %291 : vector<1x2x128xf32> to vector<2x128xf32>
    %293 = vector.shape_cast %290 : vector<2x128xf32> to vector<1x2x128xf32>
    tpu.vector_store %arg15[%c6_272, %c0_273, %c0_274], %293 {strides = array<i32>} : memref<8x2x128xf32, #tpu.memory_space<vmem>>, vector<1x2x128xf32>,
    %c7_275 = arith.constant 7 : index
    %c0_276 = arith.constant 0 : index
    %c0_277 = arith.constant 0 : index
    %294 = vector.load %arg14[%c7_275, %c0_276, %c0_277] : memref<8x2x32xf32, #tpu.memory_space<vmem>>, vector<1x2x32xf32>
    %295 = vector.shape_cast %294 : vector<1x2x32xf32> to vector<2x32xf32>
    %296 = arith.truncf %295 : vector<2x32xf32> to vector<2x32xbf16>
    %cst_278 = arith.constant dense<0.000000e+00> : vector<2x128xf32>
    %297 = tpu.matmul %296, %226, %cst_278 {dimension_numbers = #tpu.dot_dimension_numbers<[1], [0], [0], [1], [0, 0, 1, 1], [], []>} : vector<2x32xbf16>, vector<32x128xbf16>, vector<2x128xf32> -> vector<2x128xf32>
    %298 = vector.broadcast %230 : vector<1x128xf32> to vector<2x128xf32>
    %299 = arith.addf %297, %298 : vector<2x128xf32>
    %c7_279 = arith.constant 7 : index
    %c0_280 = arith.constant 0 : index
    %c0_281 = arith.constant 0 : index
    %300 = vector.load %arg15[%c7_279, %c0_280, %c0_281] : memref<8x2x128xf32, #tpu.memory_space<vmem>>, vector<1x2x128xf32>
    %301 = vector.shape_cast %300 : vector<1x2x128xf32> to vector<2x128xf32>
    %302 = vector.shape_cast %299 : vector<2x128xf32> to vector<1x2x128xf32>
    tpu.vector_store %arg15[%c7_279, %c0_280, %c0_281], %302 {strides = array<i32>} : memref<8x2x128xf32, #tpu.memory_space<vmem>>, vector<1x2x128xf32>,
    %cst_282 = arith.constant 0.000000e+00 : f32
    %303 = vector.broadcast %cst_282 : f32 to vector<2x32xf32>
    %cst_283 = arith.constant 0.000000e+00 : f32
    %304 = vector.broadcast %cst_283 : f32 to vector<2x32xf32>
    %c0_284 = arith.constant 0 : index
    %c0_285 = arith.constant 0 : index
    %c0_286 = arith.constant 0 : index
    %305 = vector.load %arg15[%c0_284, %c0_285, %c0_286] : memref<8x2x128xf32, #tpu.memory_space<vmem>>, vector<1x2x128xf32>
    %306 = vector.shape_cast %305 : vector<1x2x128xf32> to vector<2x128xf32>
    %307 = arith.truncf %303 : vector<2x32xf32> to vector<2x32xbf16>
    %cst_287 = arith.constant dense<0.000000e+00> : vector<2x128xf32>
    %308 = tpu.matmul %307, %228, %cst_287 {dimension_numbers = #tpu.dot_dimension_numbers<[1], [0], [0], [1], [0, 0, 1, 1], [], []>} : vector<2x32xbf16>, vector<32x128xbf16>, vector<2x128xf32> -> vector<2x128xf32>
    %309 = arith.addf %306, %308 : vector<2x128xf32>
    %310 = vector.extract_strided_slice %309 {offsets = [0, 0], sizes = [2, 32], strides = [1, 1]} : vector<2x128xf32> to vector<2x32xf32>
    %cst_288 = arith.constant 5.000000e-01 : f32
    %311 = vector.broadcast %cst_288 : f32 to vector<2x32xf32>
    %312 = arith.mulf %311, %310 : vector<2x32xf32>
    %313 = math.tanh %312 : vector<2x32xf32>
    %cst_289 = arith.constant 5.000000e-01 : f32
    %314 = vector.broadcast %cst_289 : f32 to vector<2x32xf32>
    %315 = arith.mulf %314, %313 : vector<2x32xf32>
    %cst_290 = arith.constant 5.000000e-01 : f32
    %316 = vector.broadcast %cst_290 : f32 to vector<2x32xf32>
    %317 = arith.addf %315, %316 : vector<2x32xf32>
    %318 = vector.extract_strided_slice %309 {offsets = [0, 32], sizes = [2, 32], strides = [1, 1]} : vector<2x128xf32> to vector<2x32xf32>
    %cst_291 = arith.constant 5.000000e-01 : f32
    %319 = vector.broadcast %cst_291 : f32 to vector<2x32xf32>
    %320 = arith.mulf %319, %318 : vector<2x32xf32>
    %321 = math.tanh %320 : vector<2x32xf32>
    %cst_292 = arith.constant 5.000000e-01 : f32
    %322 = vector.broadcast %cst_292 : f32 to vector<2x32xf32>
    %323 = arith.mulf %322, %321 : vector<2x32xf32>
    %cst_293 = arith.constant 5.000000e-01 : f32
    %324 = vector.broadcast %cst_293 : f32 to vector<2x32xf32>
    %325 = arith.addf %323, %324 : vector<2x32xf32>
    %326 = vector.extract_strided_slice %309 {offsets = [0, 64], sizes = [2, 32], strides = [1, 1]} : vector<2x128xf32> to vector<2x32xf32>
    %327 = math.tanh %326 : vector<2x32xf32>
    %328 = vector.extract_strided_slice %309 {offsets = [0, 96], sizes = [2, 32], strides = [1, 1]} : vector<2x128xf32> to vector<2x32xf32>
    %cst_294 = arith.constant 5.000000e-01 : f32
    %329 = vector.broadcast %cst_294 : f32 to vector<2x32xf32>
    %330 = arith.mulf %329, %328 : vector<2x32xf32>
    %331 = math.tanh %330 : vector<2x32xf32>
    %cst_295 = arith.constant 5.000000e-01 : f32
    %332 = vector.broadcast %cst_295 : f32 to vector<2x32xf32>
    %333 = arith.mulf %332, %331 : vector<2x32xf32>
    %cst_296 = arith.constant 5.000000e-01 : f32
    %334 = vector.broadcast %cst_296 : f32 to vector<2x32xf32>
    %335 = arith.addf %333, %334 : vector<2x32xf32>
    %336 = arith.mulf %325, %304 : vector<2x32xf32>
    %337 = arith.mulf %317, %327 : vector<2x32xf32>
    %338 = arith.addf %336, %337 : vector<2x32xf32>
    %339 = math.tanh %338 : vector<2x32xf32>
    %340 = arith.mulf %335, %339 : vector<2x32xf32>
    %c0_297 = arith.constant 0 : index
    %c0_298 = arith.constant 0 : index
    %c0_299 = arith.constant 0 : index
    %341 = vector.load %arg14[%c0_297, %c0_298, %c0_299] : memref<8x2x32xf32, #tpu.memory_space<vmem>>, vector<1x2x32xf32>
    %342 = vector.shape_cast %341 : vector<1x2x32xf32> to vector<2x32xf32>
    %343 = vector.shape_cast %340 : vector<2x32xf32> to vector<1x2x32xf32>
    tpu.vector_store %arg14[%c0_297, %c0_298, %c0_299], %343 {strides = array<i32>} : memref<8x2x32xf32, #tpu.memory_space<vmem>>, vector<1x2x32xf32>,
    %c1_300 = arith.constant 1 : index
    %c0_301 = arith.constant 0 : index
    %c0_302 = arith.constant 0 : index
    %344 = vector.load %arg15[%c1_300, %c0_301, %c0_302] : memref<8x2x128xf32, #tpu.memory_space<vmem>>, vector<1x2x128xf32>
    %345 = vector.shape_cast %344 : vector<1x2x128xf32> to vector<2x128xf32>
    %346 = arith.truncf %340 : vector<2x32xf32> to vector<2x32xbf16>
    %cst_303 = arith.constant dense<0.000000e+00> : vector<2x128xf32>
    %347 = tpu.matmul %346, %228, %cst_303 {dimension_numbers = #tpu.dot_dimension_numbers<[1], [0], [0], [1], [0, 0, 1, 1], [], []>} : vector<2x32xbf16>, vector<32x128xbf16>, vector<2x128xf32> -> vector<2x128xf32>
    %348 = arith.addf %345, %347 : vector<2x128xf32>
    %349 = vector.extract_strided_slice %348 {offsets = [0, 0], sizes = [2, 32], strides = [1, 1]} : vector<2x128xf32> to vector<2x32xf32>
    %cst_304 = arith.constant 5.000000e-01 : f32
    %350 = vector.broadcast %cst_304 : f32 to vector<2x32xf32>
    %351 = arith.mulf %350, %349 : vector<2x32xf32>
    %352 = math.tanh %351 : vector<2x32xf32>
    %cst_305 = arith.constant 5.000000e-01 : f32
    %353 = vector.broadcast %cst_305 : f32 to vector<2x32xf32>
    %354 = arith.mulf %353, %352 : vector<2x32xf32>
    %cst_306 = arith.constant 5.000000e-01 : f32
    %355 = vector.broadcast %cst_306 : f32 to vector<2x32xf32>
    %356 = arith.addf %354, %355 : vector<2x32xf32>
    %357 = vector.extract_strided_slice %348 {offsets = [0, 32], sizes = [2, 32], strides = [1, 1]} : vector<2x128xf32> to vector<2x32xf32>
    %cst_307 = arith.constant 5.000000e-01 : f32
    %358 = vector.broadcast %cst_307 : f32 to vector<2x32xf32>
    %359 = arith.mulf %358, %357 : vector<2x32xf32>
    %360 = math.tanh %359 : vector<2x32xf32>
    %cst_308 = arith.constant 5.000000e-01 : f32
    %361 = vector.broadcast %cst_308 : f32 to vector<2x32xf32>
    %362 = arith.mulf %361, %360 : vector<2x32xf32>
    %cst_309 = arith.constant 5.000000e-01 : f32
    %363 = vector.broadcast %cst_309 : f32 to vector<2x32xf32>
    %364 = arith.addf %362, %363 : vector<2x32xf32>
    %365 = vector.extract_strided_slice %348 {offsets = [0, 64], sizes = [2, 32], strides = [1, 1]} : vector<2x128xf32> to vector<2x32xf32>
    %366 = math.tanh %365 : vector<2x32xf32>
    %367 = vector.extract_strided_slice %348 {offsets = [0, 96], sizes = [2, 32], strides = [1, 1]} : vector<2x128xf32> to vector<2x32xf32>
    %cst_310 = arith.constant 5.000000e-01 : f32
    %368 = vector.broadcast %cst_310 : f32 to vector<2x32xf32>
    %369 = arith.mulf %368, %367 : vector<2x32xf32>
    %370 = math.tanh %369 : vector<2x32xf32>
    %cst_311 = arith.constant 5.000000e-01 : f32
    %371 = vector.broadcast %cst_311 : f32 to vector<2x32xf32>
    %372 = arith.mulf %371, %370 : vector<2x32xf32>
    %cst_312 = arith.constant 5.000000e-01 : f32
    %373 = vector.broadcast %cst_312 : f32 to vector<2x32xf32>
    %374 = arith.addf %372, %373 : vector<2x32xf32>
    %375 = arith.mulf %364, %338 : vector<2x32xf32>
    %376 = arith.mulf %356, %366 : vector<2x32xf32>
    %377 = arith.addf %375, %376 : vector<2x32xf32>
    %378 = math.tanh %377 : vector<2x32xf32>
    %379 = arith.mulf %374, %378 : vector<2x32xf32>
    %c1_313 = arith.constant 1 : index
    %c0_314 = arith.constant 0 : index
    %c0_315 = arith.constant 0 : index
    %380 = vector.load %arg14[%c1_313, %c0_314, %c0_315] : memref<8x2x32xf32, #tpu.memory_space<vmem>>, vector<1x2x32xf32>
    %381 = vector.shape_cast %380 : vector<1x2x32xf32> to vector<2x32xf32>
    %382 = vector.shape_cast %379 : vector<2x32xf32> to vector<1x2x32xf32>
    tpu.vector_store %arg14[%c1_313, %c0_314, %c0_315], %382 {strides = array<i32>} : memref<8x2x32xf32, #tpu.memory_space<vmem>>, vector<1x2x32xf32>,
    %c2_316 = arith.constant 2 : index
    %c0_317 = arith.constant 0 : index
    %c0_318 = arith.constant 0 : index
    %383 = vector.load %arg15[%c2_316, %c0_317, %c0_318] : memref<8x2x128xf32, #tpu.memory_space<vmem>>, vector<1x2x128xf32>
    %384 = vector.shape_cast %383 : vector<1x2x128xf32> to vector<2x128xf32>
    %385 = arith.truncf %379 : vector<2x32xf32> to vector<2x32xbf16>
    %cst_319 = arith.constant dense<0.000000e+00> : vector<2x128xf32>
    %386 = tpu.matmul %385, %228, %cst_319 {dimension_numbers = #tpu.dot_dimension_numbers<[1], [0], [0], [1], [0, 0, 1, 1], [], []>} : vector<2x32xbf16>, vector<32x128xbf16>, vector<2x128xf32> -> vector<2x128xf32>
    %387 = arith.addf %384, %386 : vector<2x128xf32>
    %388 = vector.extract_strided_slice %387 {offsets = [0, 0], sizes = [2, 32], strides = [1, 1]} : vector<2x128xf32> to vector<2x32xf32>
    %cst_320 = arith.constant 5.000000e-01 : f32
    %389 = vector.broadcast %cst_320 : f32 to vector<2x32xf32>
    %390 = arith.mulf %389, %388 : vector<2x32xf32>
    %391 = math.tanh %390 : vector<2x32xf32>
    %cst_321 = arith.constant 5.000000e-01 : f32
    %392 = vector.broadcast %cst_321 : f32 to vector<2x32xf32>
    %393 = arith.mulf %392, %391 : vector<2x32xf32>
    %cst_322 = arith.constant 5.000000e-01 : f32
    %394 = vector.broadcast %cst_322 : f32 to vector<2x32xf32>
    %395 = arith.addf %393, %394 : vector<2x32xf32>
    %396 = vector.extract_strided_slice %387 {offsets = [0, 32], sizes = [2, 32], strides = [1, 1]} : vector<2x128xf32> to vector<2x32xf32>
    %cst_323 = arith.constant 5.000000e-01 : f32
    %397 = vector.broadcast %cst_323 : f32 to vector<2x32xf32>
    %398 = arith.mulf %397, %396 : vector<2x32xf32>
    %399 = math.tanh %398 : vector<2x32xf32>
    %cst_324 = arith.constant 5.000000e-01 : f32
    %400 = vector.broadcast %cst_324 : f32 to vector<2x32xf32>
    %401 = arith.mulf %400, %399 : vector<2x32xf32>
    %cst_325 = arith.constant 5.000000e-01 : f32
    %402 = vector.broadcast %cst_325 : f32 to vector<2x32xf32>
    %403 = arith.addf %401, %402 : vector<2x32xf32>
    %404 = vector.extract_strided_slice %387 {offsets = [0, 64], sizes = [2, 32], strides = [1, 1]} : vector<2x128xf32> to vector<2x32xf32>
    %405 = math.tanh %404 : vector<2x32xf32>
    %406 = vector.extract_strided_slice %387 {offsets = [0, 96], sizes = [2, 32], strides = [1, 1]} : vector<2x128xf32> to vector<2x32xf32>
    %cst_326 = arith.constant 5.000000e-01 : f32
    %407 = vector.broadcast %cst_326 : f32 to vector<2x32xf32>
    %408 = arith.mulf %407, %406 : vector<2x32xf32>
    %409 = math.tanh %408 : vector<2x32xf32>
    %cst_327 = arith.constant 5.000000e-01 : f32
    %410 = vector.broadcast %cst_327 : f32 to vector<2x32xf32>
    %411 = arith.mulf %410, %409 : vector<2x32xf32>
    %cst_328 = arith.constant 5.000000e-01 : f32
    %412 = vector.broadcast %cst_328 : f32 to vector<2x32xf32>
    %413 = arith.addf %411, %412 : vector<2x32xf32>
    %414 = arith.mulf %403, %377 : vector<2x32xf32>
    %415 = arith.mulf %395, %405 : vector<2x32xf32>
    %416 = arith.addf %414, %415 : vector<2x32xf32>
    %417 = math.tanh %416 : vector<2x32xf32>
    %418 = arith.mulf %413, %417 : vector<2x32xf32>
    %c2_329 = arith.constant 2 : index
    %c0_330 = arith.constant 0 : index
    %c0_331 = arith.constant 0 : index
    %419 = vector.load %arg14[%c2_329, %c0_330, %c0_331] : memref<8x2x32xf32, #tpu.memory_space<vmem>>, vector<1x2x32xf32>
    %420 = vector.shape_cast %419 : vector<1x2x32xf32> to vector<2x32xf32>
    %421 = vector.shape_cast %418 : vector<2x32xf32> to vector<1x2x32xf32>
    tpu.vector_store %arg14[%c2_329, %c0_330, %c0_331], %421 {strides = array<i32>} : memref<8x2x32xf32, #tpu.memory_space<vmem>>, vector<1x2x32xf32>,
    %c3_332 = arith.constant 3 : index
    %c0_333 = arith.constant 0 : index
    %c0_334 = arith.constant 0 : index
    %422 = vector.load %arg15[%c3_332, %c0_333, %c0_334] : memref<8x2x128xf32, #tpu.memory_space<vmem>>, vector<1x2x128xf32>
    %423 = vector.shape_cast %422 : vector<1x2x128xf32> to vector<2x128xf32>
    %424 = arith.truncf %418 : vector<2x32xf32> to vector<2x32xbf16>
    %cst_335 = arith.constant dense<0.000000e+00> : vector<2x128xf32>
    %425 = tpu.matmul %424, %228, %cst_335 {dimension_numbers = #tpu.dot_dimension_numbers<[1], [0], [0], [1], [0, 0, 1, 1], [], []>} : vector<2x32xbf16>, vector<32x128xbf16>, vector<2x128xf32> -> vector<2x128xf32>
    %426 = arith.addf %423, %425 : vector<2x128xf32>
    %427 = vector.extract_strided_slice %426 {offsets = [0, 0], sizes = [2, 32], strides = [1, 1]} : vector<2x128xf32> to vector<2x32xf32>
    %cst_336 = arith.constant 5.000000e-01 : f32
    %428 = vector.broadcast %cst_336 : f32 to vector<2x32xf32>
    %429 = arith.mulf %428, %427 : vector<2x32xf32>
    %430 = math.tanh %429 : vector<2x32xf32>
    %cst_337 = arith.constant 5.000000e-01 : f32
    %431 = vector.broadcast %cst_337 : f32 to vector<2x32xf32>
    %432 = arith.mulf %431, %430 : vector<2x32xf32>
    %cst_338 = arith.constant 5.000000e-01 : f32
    %433 = vector.broadcast %cst_338 : f32 to vector<2x32xf32>
    %434 = arith.addf %432, %433 : vector<2x32xf32>
    %435 = vector.extract_strided_slice %426 {offsets = [0, 32], sizes = [2, 32], strides = [1, 1]} : vector<2x128xf32> to vector<2x32xf32>
    %cst_339 = arith.constant 5.000000e-01 : f32
    %436 = vector.broadcast %cst_339 : f32 to vector<2x32xf32>
    %437 = arith.mulf %436, %435 : vector<2x32xf32>
    %438 = math.tanh %437 : vector<2x32xf32>
    %cst_340 = arith.constant 5.000000e-01 : f32
    %439 = vector.broadcast %cst_340 : f32 to vector<2x32xf32>
    %440 = arith.mulf %439, %438 : vector<2x32xf32>
    %cst_341 = arith.constant 5.000000e-01 : f32
    %441 = vector.broadcast %cst_341 : f32 to vector<2x32xf32>
    %442 = arith.addf %440, %441 : vector<2x32xf32>
    %443 = vector.extract_strided_slice %426 {offsets = [0, 64], sizes = [2, 32], strides = [1, 1]} : vector<2x128xf32> to vector<2x32xf32>
    %444 = math.tanh %443 : vector<2x32xf32>
    %445 = vector.extract_strided_slice %426 {offsets = [0, 96], sizes = [2, 32], strides = [1, 1]} : vector<2x128xf32> to vector<2x32xf32>
    %cst_342 = arith.constant 5.000000e-01 : f32
    %446 = vector.broadcast %cst_342 : f32 to vector<2x32xf32>
    %447 = arith.mulf %446, %445 : vector<2x32xf32>
    %448 = math.tanh %447 : vector<2x32xf32>
    %cst_343 = arith.constant 5.000000e-01 : f32
    %449 = vector.broadcast %cst_343 : f32 to vector<2x32xf32>
    %450 = arith.mulf %449, %448 : vector<2x32xf32>
    %cst_344 = arith.constant 5.000000e-01 : f32
    %451 = vector.broadcast %cst_344 : f32 to vector<2x32xf32>
    %452 = arith.addf %450, %451 : vector<2x32xf32>
    %453 = arith.mulf %442, %416 : vector<2x32xf32>
    %454 = arith.mulf %434, %444 : vector<2x32xf32>
    %455 = arith.addf %453, %454 : vector<2x32xf32>
    %456 = math.tanh %455 : vector<2x32xf32>
    %457 = arith.mulf %452, %456 : vector<2x32xf32>
    %c3_345 = arith.constant 3 : index
    %c0_346 = arith.constant 0 : index
    %c0_347 = arith.constant 0 : index
    %458 = vector.load %arg14[%c3_345, %c0_346, %c0_347] : memref<8x2x32xf32, #tpu.memory_space<vmem>>, vector<1x2x32xf32>
    %459 = vector.shape_cast %458 : vector<1x2x32xf32> to vector<2x32xf32>
    %460 = vector.shape_cast %457 : vector<2x32xf32> to vector<1x2x32xf32>
    tpu.vector_store %arg14[%c3_345, %c0_346, %c0_347], %460 {strides = array<i32>} : memref<8x2x32xf32, #tpu.memory_space<vmem>>, vector<1x2x32xf32>,
    %c4_348 = arith.constant 4 : index
    %c0_349 = arith.constant 0 : index
    %c0_350 = arith.constant 0 : index
    %461 = vector.load %arg15[%c4_348, %c0_349, %c0_350] : memref<8x2x128xf32, #tpu.memory_space<vmem>>, vector<1x2x128xf32>
    %462 = vector.shape_cast %461 : vector<1x2x128xf32> to vector<2x128xf32>
    %463 = arith.truncf %457 : vector<2x32xf32> to vector<2x32xbf16>
    %cst_351 = arith.constant dense<0.000000e+00> : vector<2x128xf32>
    %464 = tpu.matmul %463, %228, %cst_351 {dimension_numbers = #tpu.dot_dimension_numbers<[1], [0], [0], [1], [0, 0, 1, 1], [], []>} : vector<2x32xbf16>, vector<32x128xbf16>, vector<2x128xf32> -> vector<2x128xf32>
    %465 = arith.addf %462, %464 : vector<2x128xf32>
    %466 = vector.extract_strided_slice %465 {offsets = [0, 0], sizes = [2, 32], strides = [1, 1]} : vector<2x128xf32> to vector<2x32xf32>
    %cst_352 = arith.constant 5.000000e-01 : f32
    %467 = vector.broadcast %cst_352 : f32 to vector<2x32xf32>
    %468 = arith.mulf %467, %466 : vector<2x32xf32>
    %469 = math.tanh %468 : vector<2x32xf32>
    %cst_353 = arith.constant 5.000000e-01 : f32
    %470 = vector.broadcast %cst_353 : f32 to vector<2x32xf32>
    %471 = arith.mulf %470, %469 : vector<2x32xf32>
    %cst_354 = arith.constant 5.000000e-01 : f32
    %472 = vector.broadcast %cst_354 : f32 to vector<2x32xf32>
    %473 = arith.addf %471, %472 : vector<2x32xf32>
    %474 = vector.extract_strided_slice %465 {offsets = [0, 32], sizes = [2, 32], strides = [1, 1]} : vector<2x128xf32> to vector<2x32xf32>
    %cst_355 = arith.constant 5.000000e-01 : f32
    %475 = vector.broadcast %cst_355 : f32 to vector<2x32xf32>
    %476 = arith.mulf %475, %474 : vector<2x32xf32>
    %477 = math.tanh %476 : vector<2x32xf32>
    %cst_356 = arith.constant 5.000000e-01 : f32
    %478 = vector.broadcast %cst_356 : f32 to vector<2x32xf32>
    %479 = arith.mulf %478, %477 : vector<2x32xf32>
    %cst_357 = arith.constant 5.000000e-01 : f32
    %480 = vector.broadcast %cst_357 : f32 to vector<2x32xf32>
    %481 = arith.addf %479, %480 : vector<2x32xf32>
    %482 = vector.extract_strided_slice %465 {offsets = [0, 64], sizes = [2, 32], strides = [1, 1]} : vector<2x128xf32> to vector<2x32xf32>
    %483 = math.tanh %482 : vector<2x32xf32>
    %484 = vector.extract_strided_slice %465 {offsets = [0, 96], sizes = [2, 32], strides = [1, 1]} : vector<2x128xf32> to vector<2x32xf32>
    %cst_358 = arith.constant 5.000000e-01 : f32
    %485 = vector.broadcast %cst_358 : f32 to vector<2x32xf32>
    %486 = arith.mulf %485, %484 : vector<2x32xf32>
    %487 = math.tanh %486 : vector<2x32xf32>
    %cst_359 = arith.constant 5.000000e-01 : f32
    %488 = vector.broadcast %cst_359 : f32 to vector<2x32xf32>
    %489 = arith.mulf %488, %487 : vector<2x32xf32>
    %cst_360 = arith.constant 5.000000e-01 : f32
    %490 = vector.broadcast %cst_360 : f32 to vector<2x32xf32>
    %491 = arith.addf %489, %490 : vector<2x32xf32>
    %492 = arith.mulf %481, %455 : vector<2x32xf32>
    %493 = arith.mulf %473, %483 : vector<2x32xf32>
    %494 = arith.addf %492, %493 : vector<2x32xf32>
    %495 = math.tanh %494 : vector<2x32xf32>
    %496 = arith.mulf %491, %495 : vector<2x32xf32>
    %c4_361 = arith.constant 4 : index
    %c0_362 = arith.constant 0 : index
    %c0_363 = arith.constant 0 : index
    %497 = vector.load %arg14[%c4_361, %c0_362, %c0_363] : memref<8x2x32xf32, #tpu.memory_space<vmem>>, vector<1x2x32xf32>
    %498 = vector.shape_cast %497 : vector<1x2x32xf32> to vector<2x32xf32>
    %499 = vector.shape_cast %496 : vector<2x32xf32> to vector<1x2x32xf32>
    tpu.vector_store %arg14[%c4_361, %c0_362, %c0_363], %499 {strides = array<i32>} : memref<8x2x32xf32, #tpu.memory_space<vmem>>, vector<1x2x32xf32>,
    %c5_364 = arith.constant 5 : index
    %c0_365 = arith.constant 0 : index
    %c0_366 = arith.constant 0 : index
    %500 = vector.load %arg15[%c5_364, %c0_365, %c0_366] : memref<8x2x128xf32, #tpu.memory_space<vmem>>, vector<1x2x128xf32>
    %501 = vector.shape_cast %500 : vector<1x2x128xf32> to vector<2x128xf32>
    %502 = arith.truncf %496 : vector<2x32xf32> to vector<2x32xbf16>
    %cst_367 = arith.constant dense<0.000000e+00> : vector<2x128xf32>
    %503 = tpu.matmul %502, %228, %cst_367 {dimension_numbers = #tpu.dot_dimension_numbers<[1], [0], [0], [1], [0, 0, 1, 1], [], []>} : vector<2x32xbf16>, vector<32x128xbf16>, vector<2x128xf32> -> vector<2x128xf32>
    %504 = arith.addf %501, %503 : vector<2x128xf32>
    %505 = vector.extract_strided_slice %504 {offsets = [0, 0], sizes = [2, 32], strides = [1, 1]} : vector<2x128xf32> to vector<2x32xf32>
    %cst_368 = arith.constant 5.000000e-01 : f32
    %506 = vector.broadcast %cst_368 : f32 to vector<2x32xf32>
    %507 = arith.mulf %506, %505 : vector<2x32xf32>
    %508 = math.tanh %507 : vector<2x32xf32>
    %cst_369 = arith.constant 5.000000e-01 : f32
    %509 = vector.broadcast %cst_369 : f32 to vector<2x32xf32>
    %510 = arith.mulf %509, %508 : vector<2x32xf32>
    %cst_370 = arith.constant 5.000000e-01 : f32
    %511 = vector.broadcast %cst_370 : f32 to vector<2x32xf32>
    %512 = arith.addf %510, %511 : vector<2x32xf32>
    %513 = vector.extract_strided_slice %504 {offsets = [0, 32], sizes = [2, 32], strides = [1, 1]} : vector<2x128xf32> to vector<2x32xf32>
    %cst_371 = arith.constant 5.000000e-01 : f32
    %514 = vector.broadcast %cst_371 : f32 to vector<2x32xf32>
    %515 = arith.mulf %514, %513 : vector<2x32xf32>
    %516 = math.tanh %515 : vector<2x32xf32>
    %cst_372 = arith.constant 5.000000e-01 : f32
    %517 = vector.broadcast %cst_372 : f32 to vector<2x32xf32>
    %518 = arith.mulf %517, %516 : vector<2x32xf32>
    %cst_373 = arith.constant 5.000000e-01 : f32
    %519 = vector.broadcast %cst_373 : f32 to vector<2x32xf32>
    %520 = arith.addf %518, %519 : vector<2x32xf32>
    %521 = vector.extract_strided_slice %504 {offsets = [0, 64], sizes = [2, 32], strides = [1, 1]} : vector<2x128xf32> to vector<2x32xf32>
    %522 = math.tanh %521 : vector<2x32xf32>
    %523 = vector.extract_strided_slice %504 {offsets = [0, 96], sizes = [2, 32], strides = [1, 1]} : vector<2x128xf32> to vector<2x32xf32>
    %cst_374 = arith.constant 5.000000e-01 : f32
    %524 = vector.broadcast %cst_374 : f32 to vector<2x32xf32>
    %525 = arith.mulf %524, %523 : vector<2x32xf32>
    %526 = math.tanh %525 : vector<2x32xf32>
    %cst_375 = arith.constant 5.000000e-01 : f32
    %527 = vector.broadcast %cst_375 : f32 to vector<2x32xf32>
    %528 = arith.mulf %527, %526 : vector<2x32xf32>
    %cst_376 = arith.constant 5.000000e-01 : f32
    %529 = vector.broadcast %cst_376 : f32 to vector<2x32xf32>
    %530 = arith.addf %528, %529 : vector<2x32xf32>
    %531 = arith.mulf %520, %494 : vector<2x32xf32>
    %532 = arith.mulf %512, %522 : vector<2x32xf32>
    %533 = arith.addf %531, %532 : vector<2x32xf32>
    %534 = math.tanh %533 : vector<2x32xf32>
    %535 = arith.mulf %530, %534 : vector<2x32xf32>
    %c5_377 = arith.constant 5 : index
    %c0_378 = arith.constant 0 : index
    %c0_379 = arith.constant 0 : index
    %536 = vector.load %arg14[%c5_377, %c0_378, %c0_379] : memref<8x2x32xf32, #tpu.memory_space<vmem>>, vector<1x2x32xf32>
    %537 = vector.shape_cast %536 : vector<1x2x32xf32> to vector<2x32xf32>
    %538 = vector.shape_cast %535 : vector<2x32xf32> to vector<1x2x32xf32>
    tpu.vector_store %arg14[%c5_377, %c0_378, %c0_379], %538 {strides = array<i32>} : memref<8x2x32xf32, #tpu.memory_space<vmem>>, vector<1x2x32xf32>,
    %c6_380 = arith.constant 6 : index
    %c0_381 = arith.constant 0 : index
    %c0_382 = arith.constant 0 : index
    %539 = vector.load %arg15[%c6_380, %c0_381, %c0_382] : memref<8x2x128xf32, #tpu.memory_space<vmem>>, vector<1x2x128xf32>
    %540 = vector.shape_cast %539 : vector<1x2x128xf32> to vector<2x128xf32>
    %541 = arith.truncf %535 : vector<2x32xf32> to vector<2x32xbf16>
    %cst_383 = arith.constant dense<0.000000e+00> : vector<2x128xf32>
    %542 = tpu.matmul %541, %228, %cst_383 {dimension_numbers = #tpu.dot_dimension_numbers<[1], [0], [0], [1], [0, 0, 1, 1], [], []>} : vector<2x32xbf16>, vector<32x128xbf16>, vector<2x128xf32> -> vector<2x128xf32>
    %543 = arith.addf %540, %542 : vector<2x128xf32>
    %544 = vector.extract_strided_slice %543 {offsets = [0, 0], sizes = [2, 32], strides = [1, 1]} : vector<2x128xf32> to vector<2x32xf32>
    %cst_384 = arith.constant 5.000000e-01 : f32
    %545 = vector.broadcast %cst_384 : f32 to vector<2x32xf32>
    %546 = arith.mulf %545, %544 : vector<2x32xf32>
    %547 = math.tanh %546 : vector<2x32xf32>
    %cst_385 = arith.constant 5.000000e-01 : f32
    %548 = vector.broadcast %cst_385 : f32 to vector<2x32xf32>
    %549 = arith.mulf %548, %547 : vector<2x32xf32>
    %cst_386 = arith.constant 5.000000e-01 : f32
    %550 = vector.broadcast %cst_386 : f32 to vector<2x32xf32>
    %551 = arith.addf %549, %550 : vector<2x32xf32>
    %552 = vector.extract_strided_slice %543 {offsets = [0, 32], sizes = [2, 32], strides = [1, 1]} : vector<2x128xf32> to vector<2x32xf32>
    %cst_387 = arith.constant 5.000000e-01 : f32
    %553 = vector.broadcast %cst_387 : f32 to vector<2x32xf32>
    %554 = arith.mulf %553, %552 : vector<2x32xf32>
    %555 = math.tanh %554 : vector<2x32xf32>
    %cst_388 = arith.constant 5.000000e-01 : f32
    %556 = vector.broadcast %cst_388 : f32 to vector<2x32xf32>
    %557 = arith.mulf %556, %555 : vector<2x32xf32>
    %cst_389 = arith.constant 5.000000e-01 : f32
    %558 = vector.broadcast %cst_389 : f32 to vector<2x32xf32>
    %559 = arith.addf %557, %558 : vector<2x32xf32>
    %560 = vector.extract_strided_slice %543 {offsets = [0, 64], sizes = [2, 32], strides = [1, 1]} : vector<2x128xf32> to vector<2x32xf32>
    %561 = math.tanh %560 : vector<2x32xf32>
    %562 = vector.extract_strided_slice %543 {offsets = [0, 96], sizes = [2, 32], strides = [1, 1]} : vector<2x128xf32> to vector<2x32xf32>
    %cst_390 = arith.constant 5.000000e-01 : f32
    %563 = vector.broadcast %cst_390 : f32 to vector<2x32xf32>
    %564 = arith.mulf %563, %562 : vector<2x32xf32>
    %565 = math.tanh %564 : vector<2x32xf32>
    %cst_391 = arith.constant 5.000000e-01 : f32
    %566 = vector.broadcast %cst_391 : f32 to vector<2x32xf32>
    %567 = arith.mulf %566, %565 : vector<2x32xf32>
    %cst_392 = arith.constant 5.000000e-01 : f32
    %568 = vector.broadcast %cst_392 : f32 to vector<2x32xf32>
    %569 = arith.addf %567, %568 : vector<2x32xf32>
    %570 = arith.mulf %559, %533 : vector<2x32xf32>
    %571 = arith.mulf %551, %561 : vector<2x32xf32>
    %572 = arith.addf %570, %571 : vector<2x32xf32>
    %573 = math.tanh %572 : vector<2x32xf32>
    %574 = arith.mulf %569, %573 : vector<2x32xf32>
    %c6_393 = arith.constant 6 : index
    %c0_394 = arith.constant 0 : index
    %c0_395 = arith.constant 0 : index
    %575 = vector.load %arg14[%c6_393, %c0_394, %c0_395] : memref<8x2x32xf32, #tpu.memory_space<vmem>>, vector<1x2x32xf32>
    %576 = vector.shape_cast %575 : vector<1x2x32xf32> to vector<2x32xf32>
    %577 = vector.shape_cast %574 : vector<2x32xf32> to vector<1x2x32xf32>
    tpu.vector_store %arg14[%c6_393, %c0_394, %c0_395], %577 {strides = array<i32>} : memref<8x2x32xf32, #tpu.memory_space<vmem>>, vector<1x2x32xf32>,
    %c7_396 = arith.constant 7 : index
    %c0_397 = arith.constant 0 : index
    %c0_398 = arith.constant 0 : index
    %578 = vector.load %arg15[%c7_396, %c0_397, %c0_398] : memref<8x2x128xf32, #tpu.memory_space<vmem>>, vector<1x2x128xf32>
    %579 = vector.shape_cast %578 : vector<1x2x128xf32> to vector<2x128xf32>
    %580 = arith.truncf %574 : vector<2x32xf32> to vector<2x32xbf16>
    %cst_399 = arith.constant dense<0.000000e+00> : vector<2x128xf32>
    %581 = tpu.matmul %580, %228, %cst_399 {dimension_numbers = #tpu.dot_dimension_numbers<[1], [0], [0], [1], [0, 0, 1, 1], [], []>} : vector<2x32xbf16>, vector<32x128xbf16>, vector<2x128xf32> -> vector<2x128xf32>
    %582 = arith.addf %579, %581 : vector<2x128xf32>
    %583 = vector.extract_strided_slice %582 {offsets = [0, 0], sizes = [2, 32], strides = [1, 1]} : vector<2x128xf32> to vector<2x32xf32>
    %cst_400 = arith.constant 5.000000e-01 : f32
    %584 = vector.broadcast %cst_400 : f32 to vector<2x32xf32>
    %585 = arith.mulf %584, %583 : vector<2x32xf32>
    %586 = math.tanh %585 : vector<2x32xf32>
    %cst_401 = arith.constant 5.000000e-01 : f32
    %587 = vector.broadcast %cst_401 : f32 to vector<2x32xf32>
    %588 = arith.mulf %587, %586 : vector<2x32xf32>
    %cst_402 = arith.constant 5.000000e-01 : f32
    %589 = vector.broadcast %cst_402 : f32 to vector<2x32xf32>
    %590 = arith.addf %588, %589 : vector<2x32xf32>
    %591 = vector.extract_strided_slice %582 {offsets = [0, 32], sizes = [2, 32], strides = [1, 1]} : vector<2x128xf32> to vector<2x32xf32>
    %cst_403 = arith.constant 5.000000e-01 : f32
    %592 = vector.broadcast %cst_403 : f32 to vector<2x32xf32>
    %593 = arith.mulf %592, %591 : vector<2x32xf32>
    %594 = math.tanh %593 : vector<2x32xf32>
    %cst_404 = arith.constant 5.000000e-01 : f32
    %595 = vector.broadcast %cst_404 : f32 to vector<2x32xf32>
    %596 = arith.mulf %595, %594 : vector<2x32xf32>
    %cst_405 = arith.constant 5.000000e-01 : f32
    %597 = vector.broadcast %cst_405 : f32 to vector<2x32xf32>
    %598 = arith.addf %596, %597 : vector<2x32xf32>
    %599 = vector.extract_strided_slice %582 {offsets = [0, 64], sizes = [2, 32], strides = [1, 1]} : vector<2x128xf32> to vector<2x32xf32>
    %600 = math.tanh %599 : vector<2x32xf32>
    %601 = vector.extract_strided_slice %582 {offsets = [0, 96], sizes = [2, 32], strides = [1, 1]} : vector<2x128xf32> to vector<2x32xf32>
    %cst_406 = arith.constant 5.000000e-01 : f32
    %602 = vector.broadcast %cst_406 : f32 to vector<2x32xf32>
    %603 = arith.mulf %602, %601 : vector<2x32xf32>
    %604 = math.tanh %603 : vector<2x32xf32>
    %cst_407 = arith.constant 5.000000e-01 : f32
    %605 = vector.broadcast %cst_407 : f32 to vector<2x32xf32>
    %606 = arith.mulf %605, %604 : vector<2x32xf32>
    %cst_408 = arith.constant 5.000000e-01 : f32
    %607 = vector.broadcast %cst_408 : f32 to vector<2x32xf32>
    %608 = arith.addf %606, %607 : vector<2x32xf32>
    %609 = arith.mulf %598, %572 : vector<2x32xf32>
    %610 = arith.mulf %590, %600 : vector<2x32xf32>
    %611 = arith.addf %609, %610 : vector<2x32xf32>
    %612 = math.tanh %611 : vector<2x32xf32>
    %613 = arith.mulf %608, %612 : vector<2x32xf32>
    %c7_409 = arith.constant 7 : index
    %c0_410 = arith.constant 0 : index
    %c0_411 = arith.constant 0 : index
    %614 = vector.load %arg14[%c7_409, %c0_410, %c0_411] : memref<8x2x32xf32, #tpu.memory_space<vmem>>, vector<1x2x32xf32>
    %615 = vector.shape_cast %614 : vector<1x2x32xf32> to vector<2x32xf32>
    %616 = vector.shape_cast %613 : vector<2x32xf32> to vector<1x2x32xf32>
    tpu.vector_store %arg14[%c7_409, %c0_410, %c0_411], %616 {strides = array<i32>} : memref<8x2x32xf32, #tpu.memory_space<vmem>>, vector<1x2x32xf32>,
    %c1_412 = arith.constant 1 : index
    %c0_413 = arith.constant 0 : index
    %c0_414 = arith.constant 0 : index
    %617 = vector.load %arg5[%c1_412, %c0_413, %c0_414] : memref<2x32x128xbf16, #tpu.memory_space<vmem>>, vector<1x32x128xbf16>
    %618 = vector.shape_cast %617 : vector<1x32x128xbf16> to vector<32x128xbf16>
    %c1_415 = arith.constant 1 : index
    %c0_416 = arith.constant 0 : index
    %c0_417 = arith.constant 0 : index
    %619 = vector.load %arg6[%c1_415, %c0_416, %c0_417] : memref<2x32x128xbf16, #tpu.memory_space<vmem>>, vector<1x32x128xbf16>
    %620 = vector.shape_cast %619 : vector<1x32x128xbf16> to vector<32x128xbf16>
    %c1_418 = arith.constant 1 : index
    %c0_419 = arith.constant 0 : index
    %c0_420 = arith.constant 0 : index
    %621 = vector.load %arg7[%c1_418, %c0_419, %c0_420] : memref<2x1x128xf32, #tpu.memory_space<vmem>>, vector<1x1x128xf32>
    %622 = vector.shape_cast %621 : vector<1x1x128xf32> to vector<1x128xf32>
    %c0_421 = arith.constant 0 : index
    %c0_422 = arith.constant 0 : index
    %c0_423 = arith.constant 0 : index
    %623 = vector.load %arg14[%c0_421, %c0_422, %c0_423] : memref<8x2x32xf32, #tpu.memory_space<vmem>>, vector<1x2x32xf32>
    %624 = vector.shape_cast %623 : vector<1x2x32xf32> to vector<2x32xf32>
    %625 = arith.truncf %624 : vector<2x32xf32> to vector<2x32xbf16>
    %cst_424 = arith.constant dense<0.000000e+00> : vector<2x128xf32>
    %626 = tpu.matmul %625, %618, %cst_424 {dimension_numbers = #tpu.dot_dimension_numbers<[1], [0], [0], [1], [0, 0, 1, 1], [], []>} : vector<2x32xbf16>, vector<32x128xbf16>, vector<2x128xf32> -> vector<2x128xf32>
    %627 = vector.broadcast %622 : vector<1x128xf32> to vector<2x128xf32>
    %628 = arith.addf %626, %627 : vector<2x128xf32>
    %c0_425 = arith.constant 0 : index
    %c0_426 = arith.constant 0 : index
    %c0_427 = arith.constant 0 : index
    %629 = vector.load %arg15[%c0_425, %c0_426, %c0_427] : memref<8x2x128xf32, #tpu.memory_space<vmem>>, vector<1x2x128xf32>
    %630 = vector.shape_cast %629 : vector<1x2x128xf32> to vector<2x128xf32>
    %631 = vector.shape_cast %628 : vector<2x128xf32> to vector<1x2x128xf32>
    tpu.vector_store %arg15[%c0_425, %c0_426, %c0_427], %631 {strides = array<i32>} : memref<8x2x128xf32, #tpu.memory_space<vmem>>, vector<1x2x128xf32>,
    %c1_428 = arith.constant 1 : index
    %c0_429 = arith.constant 0 : index
    %c0_430 = arith.constant 0 : index
    %632 = vector.load %arg14[%c1_428, %c0_429, %c0_430] : memref<8x2x32xf32, #tpu.memory_space<vmem>>, vector<1x2x32xf32>
    %633 = vector.shape_cast %632 : vector<1x2x32xf32> to vector<2x32xf32>
    %634 = arith.truncf %633 : vector<2x32xf32> to vector<2x32xbf16>
    %cst_431 = arith.constant dense<0.000000e+00> : vector<2x128xf32>
    %635 = tpu.matmul %634, %618, %cst_431 {dimension_numbers = #tpu.dot_dimension_numbers<[1], [0], [0], [1], [0, 0, 1, 1], [], []>} : vector<2x32xbf16>, vector<32x128xbf16>, vector<2x128xf32> -> vector<2x128xf32>
    %636 = vector.broadcast %622 : vector<1x128xf32> to vector<2x128xf32>
    %637 = arith.addf %635, %636 : vector<2x128xf32>
    %c1_432 = arith.constant 1 : index
    %c0_433 = arith.constant 0 : index
    %c0_434 = arith.constant 0 : index
    %638 = vector.load %arg15[%c1_432, %c0_433, %c0_434] : memref<8x2x128xf32, #tpu.memory_space<vmem>>, vector<1x2x128xf32>
    %639 = vector.shape_cast %638 : vector<1x2x128xf32> to vector<2x128xf32>
    %640 = vector.shape_cast %637 : vector<2x128xf32> to vector<1x2x128xf32>
    tpu.vector_store %arg15[%c1_432, %c0_433, %c0_434], %640 {strides = array<i32>} : memref<8x2x128xf32, #tpu.memory_space<vmem>>, vector<1x2x128xf32>,
    %c2_435 = arith.constant 2 : index
    %c0_436 = arith.constant 0 : index
    %c0_437 = arith.constant 0 : index
    %641 = vector.load %arg14[%c2_435, %c0_436, %c0_437] : memref<8x2x32xf32, #tpu.memory_space<vmem>>, vector<1x2x32xf32>
    %642 = vector.shape_cast %641 : vector<1x2x32xf32> to vector<2x32xf32>
    %643 = arith.truncf %642 : vector<2x32xf32> to vector<2x32xbf16>
    %cst_438 = arith.constant dense<0.000000e+00> : vector<2x128xf32>
    %644 = tpu.matmul %643, %618, %cst_438 {dimension_numbers = #tpu.dot_dimension_numbers<[1], [0], [0], [1], [0, 0, 1, 1], [], []>} : vector<2x32xbf16>, vector<32x128xbf16>, vector<2x128xf32> -> vector<2x128xf32>
    %645 = vector.broadcast %622 : vector<1x128xf32> to vector<2x128xf32>
    %646 = arith.addf %644, %645 : vector<2x128xf32>
    %c2_439 = arith.constant 2 : index
    %c0_440 = arith.constant 0 : index
    %c0_441 = arith.constant 0 : index
    %647 = vector.load %arg15[%c2_439, %c0_440, %c0_441] : memref<8x2x128xf32, #tpu.memory_space<vmem>>, vector<1x2x128xf32>
    %648 = vector.shape_cast %647 : vector<1x2x128xf32> to vector<2x128xf32>
    %649 = vector.shape_cast %646 : vector<2x128xf32> to vector<1x2x128xf32>
    tpu.vector_store %arg15[%c2_439, %c0_440, %c0_441], %649 {strides = array<i32>} : memref<8x2x128xf32, #tpu.memory_space<vmem>>, vector<1x2x128xf32>,
    %c3_442 = arith.constant 3 : index
    %c0_443 = arith.constant 0 : index
    %c0_444 = arith.constant 0 : index
    %650 = vector.load %arg14[%c3_442, %c0_443, %c0_444] : memref<8x2x32xf32, #tpu.memory_space<vmem>>, vector<1x2x32xf32>
    %651 = vector.shape_cast %650 : vector<1x2x32xf32> to vector<2x32xf32>
    %652 = arith.truncf %651 : vector<2x32xf32> to vector<2x32xbf16>
    %cst_445 = arith.constant dense<0.000000e+00> : vector<2x128xf32>
    %653 = tpu.matmul %652, %618, %cst_445 {dimension_numbers = #tpu.dot_dimension_numbers<[1], [0], [0], [1], [0, 0, 1, 1], [], []>} : vector<2x32xbf16>, vector<32x128xbf16>, vector<2x128xf32> -> vector<2x128xf32>
    %654 = vector.broadcast %622 : vector<1x128xf32> to vector<2x128xf32>
    %655 = arith.addf %653, %654 : vector<2x128xf32>
    %c3_446 = arith.constant 3 : index
    %c0_447 = arith.constant 0 : index
    %c0_448 = arith.constant 0 : index
    %656 = vector.load %arg15[%c3_446, %c0_447, %c0_448] : memref<8x2x128xf32, #tpu.memory_space<vmem>>, vector<1x2x128xf32>
    %657 = vector.shape_cast %656 : vector<1x2x128xf32> to vector<2x128xf32>
    %658 = vector.shape_cast %655 : vector<2x128xf32> to vector<1x2x128xf32>
    tpu.vector_store %arg15[%c3_446, %c0_447, %c0_448], %658 {strides = array<i32>} : memref<8x2x128xf32, #tpu.memory_space<vmem>>, vector<1x2x128xf32>,
    %c4_449 = arith.constant 4 : index
    %c0_450 = arith.constant 0 : index
    %c0_451 = arith.constant 0 : index
    %659 = vector.load %arg14[%c4_449, %c0_450, %c0_451] : memref<8x2x32xf32, #tpu.memory_space<vmem>>, vector<1x2x32xf32>
    %660 = vector.shape_cast %659 : vector<1x2x32xf32> to vector<2x32xf32>
    %661 = arith.truncf %660 : vector<2x32xf32> to vector<2x32xbf16>
    %cst_452 = arith.constant dense<0.000000e+00> : vector<2x128xf32>
    %662 = tpu.matmul %661, %618, %cst_452 {dimension_numbers = #tpu.dot_dimension_numbers<[1], [0], [0], [1], [0, 0, 1, 1], [], []>} : vector<2x32xbf16>, vector<32x128xbf16>, vector<2x128xf32> -> vector<2x128xf32>
    %663 = vector.broadcast %622 : vector<1x128xf32> to vector<2x128xf32>
    %664 = arith.addf %662, %663 : vector<2x128xf32>
    %c4_453 = arith.constant 4 : index
    %c0_454 = arith.constant 0 : index
    %c0_455 = arith.constant 0 : index
    %665 = vector.load %arg15[%c4_453, %c0_454, %c0_455] : memref<8x2x128xf32, #tpu.memory_space<vmem>>, vector<1x2x128xf32>
    %666 = vector.shape_cast %665 : vector<1x2x128xf32> to vector<2x128xf32>
    %667 = vector.shape_cast %664 : vector<2x128xf32> to vector<1x2x128xf32>
    tpu.vector_store %arg15[%c4_453, %c0_454, %c0_455], %667 {strides = array<i32>} : memref<8x2x128xf32, #tpu.memory_space<vmem>>, vector<1x2x128xf32>,
    %c5_456 = arith.constant 5 : index
    %c0_457 = arith.constant 0 : index
    %c0_458 = arith.constant 0 : index
    %668 = vector.load %arg14[%c5_456, %c0_457, %c0_458] : memref<8x2x32xf32, #tpu.memory_space<vmem>>, vector<1x2x32xf32>
    %669 = vector.shape_cast %668 : vector<1x2x32xf32> to vector<2x32xf32>
    %670 = arith.truncf %669 : vector<2x32xf32> to vector<2x32xbf16>
    %cst_459 = arith.constant dense<0.000000e+00> : vector<2x128xf32>
    %671 = tpu.matmul %670, %618, %cst_459 {dimension_numbers = #tpu.dot_dimension_numbers<[1], [0], [0], [1], [0, 0, 1, 1], [], []>} : vector<2x32xbf16>, vector<32x128xbf16>, vector<2x128xf32> -> vector<2x128xf32>
    %672 = vector.broadcast %622 : vector<1x128xf32> to vector<2x128xf32>
    %673 = arith.addf %671, %672 : vector<2x128xf32>
    %c5_460 = arith.constant 5 : index
    %c0_461 = arith.constant 0 : index
    %c0_462 = arith.constant 0 : index
    %674 = vector.load %arg15[%c5_460, %c0_461, %c0_462] : memref<8x2x128xf32, #tpu.memory_space<vmem>>, vector<1x2x128xf32>
    %675 = vector.shape_cast %674 : vector<1x2x128xf32> to vector<2x128xf32>
    %676 = vector.shape_cast %673 : vector<2x128xf32> to vector<1x2x128xf32>
    tpu.vector_store %arg15[%c5_460, %c0_461, %c0_462], %676 {strides = array<i32>} : memref<8x2x128xf32, #tpu.memory_space<vmem>>, vector<1x2x128xf32>,
    %c6_463 = arith.constant 6 : index
    %c0_464 = arith.constant 0 : index
    %c0_465 = arith.constant 0 : index
    %677 = vector.load %arg14[%c6_463, %c0_464, %c0_465] : memref<8x2x32xf32, #tpu.memory_space<vmem>>, vector<1x2x32xf32>
    %678 = vector.shape_cast %677 : vector<1x2x32xf32> to vector<2x32xf32>
    %679 = arith.truncf %678 : vector<2x32xf32> to vector<2x32xbf16>
    %cst_466 = arith.constant dense<0.000000e+00> : vector<2x128xf32>
    %680 = tpu.matmul %679, %618, %cst_466 {dimension_numbers = #tpu.dot_dimension_numbers<[1], [0], [0], [1], [0, 0, 1, 1], [], []>} : vector<2x32xbf16>, vector<32x128xbf16>, vector<2x128xf32> -> vector<2x128xf32>
    %681 = vector.broadcast %622 : vector<1x128xf32> to vector<2x128xf32>
    %682 = arith.addf %680, %681 : vector<2x128xf32>
    %c6_467 = arith.constant 6 : index
    %c0_468 = arith.constant 0 : index
    %c0_469 = arith.constant 0 : index
    %683 = vector.load %arg15[%c6_467, %c0_468, %c0_469] : memref<8x2x128xf32, #tpu.memory_space<vmem>>, vector<1x2x128xf32>
    %684 = vector.shape_cast %683 : vector<1x2x128xf32> to vector<2x128xf32>
    %685 = vector.shape_cast %682 : vector<2x128xf32> to vector<1x2x128xf32>
    tpu.vector_store %arg15[%c6_467, %c0_468, %c0_469], %685 {strides = array<i32>} : memref<8x2x128xf32, #tpu.memory_space<vmem>>, vector<1x2x128xf32>,
    %c7_470 = arith.constant 7 : index
    %c0_471 = arith.constant 0 : index
    %c0_472 = arith.constant 0 : index
    %686 = vector.load %arg14[%c7_470, %c0_471, %c0_472] : memref<8x2x32xf32, #tpu.memory_space<vmem>>, vector<1x2x32xf32>
    %687 = vector.shape_cast %686 : vector<1x2x32xf32> to vector<2x32xf32>
    %688 = arith.truncf %687 : vector<2x32xf32> to vector<2x32xbf16>
    %cst_473 = arith.constant dense<0.000000e+00> : vector<2x128xf32>
    %689 = tpu.matmul %688, %618, %cst_473 {dimension_numbers = #tpu.dot_dimension_numbers<[1], [0], [0], [1], [0, 0, 1, 1], [], []>} : vector<2x32xbf16>, vector<32x128xbf16>, vector<2x128xf32> -> vector<2x128xf32>
    %690 = vector.broadcast %622 : vector<1x128xf32> to vector<2x128xf32>
    %691 = arith.addf %689, %690 : vector<2x128xf32>
    %c7_474 = arith.constant 7 : index
    %c0_475 = arith.constant 0 : index
    %c0_476 = arith.constant 0 : index
    %692 = vector.load %arg15[%c7_474, %c0_475, %c0_476] : memref<8x2x128xf32, #tpu.memory_space<vmem>>, vector<1x2x128xf32>
    %693 = vector.shape_cast %692 : vector<1x2x128xf32> to vector<2x128xf32>
    %694 = vector.shape_cast %691 : vector<2x128xf32> to vector<1x2x128xf32>
    tpu.vector_store %arg15[%c7_474, %c0_475, %c0_476], %694 {strides = array<i32>} : memref<8x2x128xf32, #tpu.memory_space<vmem>>, vector<1x2x128xf32>,
    %cst_477 = arith.constant 0.000000e+00 : f32
    %695 = vector.broadcast %cst_477 : f32 to vector<2x32xf32>
    %cst_478 = arith.constant 0.000000e+00 : f32
    %696 = vector.broadcast %cst_478 : f32 to vector<2x32xf32>
    %c0_479 = arith.constant 0 : index
    %c0_480 = arith.constant 0 : index
    %c0_481 = arith.constant 0 : index
    %697 = vector.load %arg15[%c0_479, %c0_480, %c0_481] : memref<8x2x128xf32, #tpu.memory_space<vmem>>, vector<1x2x128xf32>
    %698 = vector.shape_cast %697 : vector<1x2x128xf32> to vector<2x128xf32>
    %699 = arith.truncf %695 : vector<2x32xf32> to vector<2x32xbf16>
    %cst_482 = arith.constant dense<0.000000e+00> : vector<2x128xf32>
    %700 = tpu.matmul %699, %620, %cst_482 {dimension_numbers = #tpu.dot_dimension_numbers<[1], [0], [0], [1], [0, 0, 1, 1], [], []>} : vector<2x32xbf16>, vector<32x128xbf16>, vector<2x128xf32> -> vector<2x128xf32>
    %701 = arith.addf %698, %700 : vector<2x128xf32>
    %702 = vector.extract_strided_slice %701 {offsets = [0, 0], sizes = [2, 32], strides = [1, 1]} : vector<2x128xf32> to vector<2x32xf32>
    %cst_483 = arith.constant 5.000000e-01 : f32
    %703 = vector.broadcast %cst_483 : f32 to vector<2x32xf32>
    %704 = arith.mulf %703, %702 : vector<2x32xf32>
    %705 = math.tanh %704 : vector<2x32xf32>
    %cst_484 = arith.constant 5.000000e-01 : f32
    %706 = vector.broadcast %cst_484 : f32 to vector<2x32xf32>
    %707 = arith.mulf %706, %705 : vector<2x32xf32>
    %cst_485 = arith.constant 5.000000e-01 : f32
    %708 = vector.broadcast %cst_485 : f32 to vector<2x32xf32>
    %709 = arith.addf %707, %708 : vector<2x32xf32>
    %710 = vector.extract_strided_slice %701 {offsets = [0, 32], sizes = [2, 32], strides = [1, 1]} : vector<2x128xf32> to vector<2x32xf32>
    %cst_486 = arith.constant 5.000000e-01 : f32
    %711 = vector.broadcast %cst_486 : f32 to vector<2x32xf32>
    %712 = arith.mulf %711, %710 : vector<2x32xf32>
    %713 = math.tanh %712 : vector<2x32xf32>
    %cst_487 = arith.constant 5.000000e-01 : f32
    %714 = vector.broadcast %cst_487 : f32 to vector<2x32xf32>
    %715 = arith.mulf %714, %713 : vector<2x32xf32>
    %cst_488 = arith.constant 5.000000e-01 : f32
    %716 = vector.broadcast %cst_488 : f32 to vector<2x32xf32>
    %717 = arith.addf %715, %716 : vector<2x32xf32>
    %718 = vector.extract_strided_slice %701 {offsets = [0, 64], sizes = [2, 32], strides = [1, 1]} : vector<2x128xf32> to vector<2x32xf32>
    %719 = math.tanh %718 : vector<2x32xf32>
    %720 = vector.extract_strided_slice %701 {offsets = [0, 96], sizes = [2, 32], strides = [1, 1]} : vector<2x128xf32> to vector<2x32xf32>
    %cst_489 = arith.constant 5.000000e-01 : f32
    %721 = vector.broadcast %cst_489 : f32 to vector<2x32xf32>
    %722 = arith.mulf %721, %720 : vector<2x32xf32>
    %723 = math.tanh %722 : vector<2x32xf32>
    %cst_490 = arith.constant 5.000000e-01 : f32
    %724 = vector.broadcast %cst_490 : f32 to vector<2x32xf32>
    %725 = arith.mulf %724, %723 : vector<2x32xf32>
    %cst_491 = arith.constant 5.000000e-01 : f32
    %726 = vector.broadcast %cst_491 : f32 to vector<2x32xf32>
    %727 = arith.addf %725, %726 : vector<2x32xf32>
    %728 = arith.mulf %717, %696 : vector<2x32xf32>
    %729 = arith.mulf %709, %719 : vector<2x32xf32>
    %730 = arith.addf %728, %729 : vector<2x32xf32>
    %731 = math.tanh %730 : vector<2x32xf32>
    %732 = arith.mulf %727, %731 : vector<2x32xf32>
    %c1_492 = arith.constant 1 : index
    %c0_493 = arith.constant 0 : index
    %c0_494 = arith.constant 0 : index
    %733 = vector.load %arg15[%c1_492, %c0_493, %c0_494] : memref<8x2x128xf32, #tpu.memory_space<vmem>>, vector<1x2x128xf32>
    %734 = vector.shape_cast %733 : vector<1x2x128xf32> to vector<2x128xf32>
    %735 = arith.truncf %732 : vector<2x32xf32> to vector<2x32xbf16>
    %cst_495 = arith.constant dense<0.000000e+00> : vector<2x128xf32>
    %736 = tpu.matmul %735, %620, %cst_495 {dimension_numbers = #tpu.dot_dimension_numbers<[1], [0], [0], [1], [0, 0, 1, 1], [], []>} : vector<2x32xbf16>, vector<32x128xbf16>, vector<2x128xf32> -> vector<2x128xf32>
    %737 = arith.addf %734, %736 : vector<2x128xf32>
    %738 = vector.extract_strided_slice %737 {offsets = [0, 0], sizes = [2, 32], strides = [1, 1]} : vector<2x128xf32> to vector<2x32xf32>
    %cst_496 = arith.constant 5.000000e-01 : f32
    %739 = vector.broadcast %cst_496 : f32 to vector<2x32xf32>
    %740 = arith.mulf %739, %738 : vector<2x32xf32>
    %741 = math.tanh %740 : vector<2x32xf32>
    %cst_497 = arith.constant 5.000000e-01 : f32
    %742 = vector.broadcast %cst_497 : f32 to vector<2x32xf32>
    %743 = arith.mulf %742, %741 : vector<2x32xf32>
    %cst_498 = arith.constant 5.000000e-01 : f32
    %744 = vector.broadcast %cst_498 : f32 to vector<2x32xf32>
    %745 = arith.addf %743, %744 : vector<2x32xf32>
    %746 = vector.extract_strided_slice %737 {offsets = [0, 32], sizes = [2, 32], strides = [1, 1]} : vector<2x128xf32> to vector<2x32xf32>
    %cst_499 = arith.constant 5.000000e-01 : f32
    %747 = vector.broadcast %cst_499 : f32 to vector<2x32xf32>
    %748 = arith.mulf %747, %746 : vector<2x32xf32>
    %749 = math.tanh %748 : vector<2x32xf32>
    %cst_500 = arith.constant 5.000000e-01 : f32
    %750 = vector.broadcast %cst_500 : f32 to vector<2x32xf32>
    %751 = arith.mulf %750, %749 : vector<2x32xf32>
    %cst_501 = arith.constant 5.000000e-01 : f32
    %752 = vector.broadcast %cst_501 : f32 to vector<2x32xf32>
    %753 = arith.addf %751, %752 : vector<2x32xf32>
    %754 = vector.extract_strided_slice %737 {offsets = [0, 64], sizes = [2, 32], strides = [1, 1]} : vector<2x128xf32> to vector<2x32xf32>
    %755 = math.tanh %754 : vector<2x32xf32>
    %756 = vector.extract_strided_slice %737 {offsets = [0, 96], sizes = [2, 32], strides = [1, 1]} : vector<2x128xf32> to vector<2x32xf32>
    %cst_502 = arith.constant 5.000000e-01 : f32
    %757 = vector.broadcast %cst_502 : f32 to vector<2x32xf32>
    %758 = arith.mulf %757, %756 : vector<2x32xf32>
    %759 = math.tanh %758 : vector<2x32xf32>
    %cst_503 = arith.constant 5.000000e-01 : f32
    %760 = vector.broadcast %cst_503 : f32 to vector<2x32xf32>
    %761 = arith.mulf %760, %759 : vector<2x32xf32>
    %cst_504 = arith.constant 5.000000e-01 : f32
    %762 = vector.broadcast %cst_504 : f32 to vector<2x32xf32>
    %763 = arith.addf %761, %762 : vector<2x32xf32>
    %764 = arith.mulf %753, %730 : vector<2x32xf32>
    %765 = arith.mulf %745, %755 : vector<2x32xf32>
    %766 = arith.addf %764, %765 : vector<2x32xf32>
    %767 = math.tanh %766 : vector<2x32xf32>
    %768 = arith.mulf %763, %767 : vector<2x32xf32>
    %c2_505 = arith.constant 2 : index
    %c0_506 = arith.constant 0 : index
    %c0_507 = arith.constant 0 : index
    %769 = vector.load %arg15[%c2_505, %c0_506, %c0_507] : memref<8x2x128xf32, #tpu.memory_space<vmem>>, vector<1x2x128xf32>
    %770 = vector.shape_cast %769 : vector<1x2x128xf32> to vector<2x128xf32>
    %771 = arith.truncf %768 : vector<2x32xf32> to vector<2x32xbf16>
    %cst_508 = arith.constant dense<0.000000e+00> : vector<2x128xf32>
    %772 = tpu.matmul %771, %620, %cst_508 {dimension_numbers = #tpu.dot_dimension_numbers<[1], [0], [0], [1], [0, 0, 1, 1], [], []>} : vector<2x32xbf16>, vector<32x128xbf16>, vector<2x128xf32> -> vector<2x128xf32>
    %773 = arith.addf %770, %772 : vector<2x128xf32>
    %774 = vector.extract_strided_slice %773 {offsets = [0, 0], sizes = [2, 32], strides = [1, 1]} : vector<2x128xf32> to vector<2x32xf32>
    %cst_509 = arith.constant 5.000000e-01 : f32
    %775 = vector.broadcast %cst_509 : f32 to vector<2x32xf32>
    %776 = arith.mulf %775, %774 : vector<2x32xf32>
    %777 = math.tanh %776 : vector<2x32xf32>
    %cst_510 = arith.constant 5.000000e-01 : f32
    %778 = vector.broadcast %cst_510 : f32 to vector<2x32xf32>
    %779 = arith.mulf %778, %777 : vector<2x32xf32>
    %cst_511 = arith.constant 5.000000e-01 : f32
    %780 = vector.broadcast %cst_511 : f32 to vector<2x32xf32>
    %781 = arith.addf %779, %780 : vector<2x32xf32>
    %782 = vector.extract_strided_slice %773 {offsets = [0, 32], sizes = [2, 32], strides = [1, 1]} : vector<2x128xf32> to vector<2x32xf32>
    %cst_512 = arith.constant 5.000000e-01 : f32
    %783 = vector.broadcast %cst_512 : f32 to vector<2x32xf32>
    %784 = arith.mulf %783, %782 : vector<2x32xf32>
    %785 = math.tanh %784 : vector<2x32xf32>
    %cst_513 = arith.constant 5.000000e-01 : f32
    %786 = vector.broadcast %cst_513 : f32 to vector<2x32xf32>
    %787 = arith.mulf %786, %785 : vector<2x32xf32>
    %cst_514 = arith.constant 5.000000e-01 : f32
    %788 = vector.broadcast %cst_514 : f32 to vector<2x32xf32>
    %789 = arith.addf %787, %788 : vector<2x32xf32>
    %790 = vector.extract_strided_slice %773 {offsets = [0, 64], sizes = [2, 32], strides = [1, 1]} : vector<2x128xf32> to vector<2x32xf32>
    %791 = math.tanh %790 : vector<2x32xf32>
    %792 = vector.extract_strided_slice %773 {offsets = [0, 96], sizes = [2, 32], strides = [1, 1]} : vector<2x128xf32> to vector<2x32xf32>
    %cst_515 = arith.constant 5.000000e-01 : f32
    %793 = vector.broadcast %cst_515 : f32 to vector<2x32xf32>
    %794 = arith.mulf %793, %792 : vector<2x32xf32>
    %795 = math.tanh %794 : vector<2x32xf32>
    %cst_516 = arith.constant 5.000000e-01 : f32
    %796 = vector.broadcast %cst_516 : f32 to vector<2x32xf32>
    %797 = arith.mulf %796, %795 : vector<2x32xf32>
    %cst_517 = arith.constant 5.000000e-01 : f32
    %798 = vector.broadcast %cst_517 : f32 to vector<2x32xf32>
    %799 = arith.addf %797, %798 : vector<2x32xf32>
    %800 = arith.mulf %789, %766 : vector<2x32xf32>
    %801 = arith.mulf %781, %791 : vector<2x32xf32>
    %802 = arith.addf %800, %801 : vector<2x32xf32>
    %803 = math.tanh %802 : vector<2x32xf32>
    %804 = arith.mulf %799, %803 : vector<2x32xf32>
    %c3_518 = arith.constant 3 : index
    %c0_519 = arith.constant 0 : index
    %c0_520 = arith.constant 0 : index
    %805 = vector.load %arg15[%c3_518, %c0_519, %c0_520] : memref<8x2x128xf32, #tpu.memory_space<vmem>>, vector<1x2x128xf32>
    %806 = vector.shape_cast %805 : vector<1x2x128xf32> to vector<2x128xf32>
    %807 = arith.truncf %804 : vector<2x32xf32> to vector<2x32xbf16>
    %cst_521 = arith.constant dense<0.000000e+00> : vector<2x128xf32>
    %808 = tpu.matmul %807, %620, %cst_521 {dimension_numbers = #tpu.dot_dimension_numbers<[1], [0], [0], [1], [0, 0, 1, 1], [], []>} : vector<2x32xbf16>, vector<32x128xbf16>, vector<2x128xf32> -> vector<2x128xf32>
    %809 = arith.addf %806, %808 : vector<2x128xf32>
    %810 = vector.extract_strided_slice %809 {offsets = [0, 0], sizes = [2, 32], strides = [1, 1]} : vector<2x128xf32> to vector<2x32xf32>
    %cst_522 = arith.constant 5.000000e-01 : f32
    %811 = vector.broadcast %cst_522 : f32 to vector<2x32xf32>
    %812 = arith.mulf %811, %810 : vector<2x32xf32>
    %813 = math.tanh %812 : vector<2x32xf32>
    %cst_523 = arith.constant 5.000000e-01 : f32
    %814 = vector.broadcast %cst_523 : f32 to vector<2x32xf32>
    %815 = arith.mulf %814, %813 : vector<2x32xf32>
    %cst_524 = arith.constant 5.000000e-01 : f32
    %816 = vector.broadcast %cst_524 : f32 to vector<2x32xf32>
    %817 = arith.addf %815, %816 : vector<2x32xf32>
    %818 = vector.extract_strided_slice %809 {offsets = [0, 32], sizes = [2, 32], strides = [1, 1]} : vector<2x128xf32> to vector<2x32xf32>
    %cst_525 = arith.constant 5.000000e-01 : f32
    %819 = vector.broadcast %cst_525 : f32 to vector<2x32xf32>
    %820 = arith.mulf %819, %818 : vector<2x32xf32>
    %821 = math.tanh %820 : vector<2x32xf32>
    %cst_526 = arith.constant 5.000000e-01 : f32
    %822 = vector.broadcast %cst_526 : f32 to vector<2x32xf32>
    %823 = arith.mulf %822, %821 : vector<2x32xf32>
    %cst_527 = arith.constant 5.000000e-01 : f32
    %824 = vector.broadcast %cst_527 : f32 to vector<2x32xf32>
    %825 = arith.addf %823, %824 : vector<2x32xf32>
    %826 = vector.extract_strided_slice %809 {offsets = [0, 64], sizes = [2, 32], strides = [1, 1]} : vector<2x128xf32> to vector<2x32xf32>
    %827 = math.tanh %826 : vector<2x32xf32>
    %828 = vector.extract_strided_slice %809 {offsets = [0, 96], sizes = [2, 32], strides = [1, 1]} : vector<2x128xf32> to vector<2x32xf32>
    %cst_528 = arith.constant 5.000000e-01 : f32
    %829 = vector.broadcast %cst_528 : f32 to vector<2x32xf32>
    %830 = arith.mulf %829, %828 : vector<2x32xf32>
    %831 = math.tanh %830 : vector<2x32xf32>
    %cst_529 = arith.constant 5.000000e-01 : f32
    %832 = vector.broadcast %cst_529 : f32 to vector<2x32xf32>
    %833 = arith.mulf %832, %831 : vector<2x32xf32>
    %cst_530 = arith.constant 5.000000e-01 : f32
    %834 = vector.broadcast %cst_530 : f32 to vector<2x32xf32>
    %835 = arith.addf %833, %834 : vector<2x32xf32>
    %836 = arith.mulf %825, %802 : vector<2x32xf32>
    %837 = arith.mulf %817, %827 : vector<2x32xf32>
    %838 = arith.addf %836, %837 : vector<2x32xf32>
    %839 = math.tanh %838 : vector<2x32xf32>
    %840 = arith.mulf %835, %839 : vector<2x32xf32>
    %c4_531 = arith.constant 4 : index
    %c0_532 = arith.constant 0 : index
    %c0_533 = arith.constant 0 : index
    %841 = vector.load %arg15[%c4_531, %c0_532, %c0_533] : memref<8x2x128xf32, #tpu.memory_space<vmem>>, vector<1x2x128xf32>
    %842 = vector.shape_cast %841 : vector<1x2x128xf32> to vector<2x128xf32>
    %843 = arith.truncf %840 : vector<2x32xf32> to vector<2x32xbf16>
    %cst_534 = arith.constant dense<0.000000e+00> : vector<2x128xf32>
    %844 = tpu.matmul %843, %620, %cst_534 {dimension_numbers = #tpu.dot_dimension_numbers<[1], [0], [0], [1], [0, 0, 1, 1], [], []>} : vector<2x32xbf16>, vector<32x128xbf16>, vector<2x128xf32> -> vector<2x128xf32>
    %845 = arith.addf %842, %844 : vector<2x128xf32>
    %846 = vector.extract_strided_slice %845 {offsets = [0, 0], sizes = [2, 32], strides = [1, 1]} : vector<2x128xf32> to vector<2x32xf32>
    %cst_535 = arith.constant 5.000000e-01 : f32
    %847 = vector.broadcast %cst_535 : f32 to vector<2x32xf32>
    %848 = arith.mulf %847, %846 : vector<2x32xf32>
    %849 = math.tanh %848 : vector<2x32xf32>
    %cst_536 = arith.constant 5.000000e-01 : f32
    %850 = vector.broadcast %cst_536 : f32 to vector<2x32xf32>
    %851 = arith.mulf %850, %849 : vector<2x32xf32>
    %cst_537 = arith.constant 5.000000e-01 : f32
    %852 = vector.broadcast %cst_537 : f32 to vector<2x32xf32>
    %853 = arith.addf %851, %852 : vector<2x32xf32>
    %854 = vector.extract_strided_slice %845 {offsets = [0, 32], sizes = [2, 32], strides = [1, 1]} : vector<2x128xf32> to vector<2x32xf32>
    %cst_538 = arith.constant 5.000000e-01 : f32
    %855 = vector.broadcast %cst_538 : f32 to vector<2x32xf32>
    %856 = arith.mulf %855, %854 : vector<2x32xf32>
    %857 = math.tanh %856 : vector<2x32xf32>
    %cst_539 = arith.constant 5.000000e-01 : f32
    %858 = vector.broadcast %cst_539 : f32 to vector<2x32xf32>
    %859 = arith.mulf %858, %857 : vector<2x32xf32>
    %cst_540 = arith.constant 5.000000e-01 : f32
    %860 = vector.broadcast %cst_540 : f32 to vector<2x32xf32>
    %861 = arith.addf %859, %860 : vector<2x32xf32>
    %862 = vector.extract_strided_slice %845 {offsets = [0, 64], sizes = [2, 32], strides = [1, 1]} : vector<2x128xf32> to vector<2x32xf32>
    %863 = math.tanh %862 : vector<2x32xf32>
    %864 = vector.extract_strided_slice %845 {offsets = [0, 96], sizes = [2, 32], strides = [1, 1]} : vector<2x128xf32> to vector<2x32xf32>
    %cst_541 = arith.constant 5.000000e-01 : f32
    %865 = vector.broadcast %cst_541 : f32 to vector<2x32xf32>
    %866 = arith.mulf %865, %864 : vector<2x32xf32>
    %867 = math.tanh %866 : vector<2x32xf32>
    %cst_542 = arith.constant 5.000000e-01 : f32
    %868 = vector.broadcast %cst_542 : f32 to vector<2x32xf32>
    %869 = arith.mulf %868, %867 : vector<2x32xf32>
    %cst_543 = arith.constant 5.000000e-01 : f32
    %870 = vector.broadcast %cst_543 : f32 to vector<2x32xf32>
    %871 = arith.addf %869, %870 : vector<2x32xf32>
    %872 = arith.mulf %861, %838 : vector<2x32xf32>
    %873 = arith.mulf %853, %863 : vector<2x32xf32>
    %874 = arith.addf %872, %873 : vector<2x32xf32>
    %875 = math.tanh %874 : vector<2x32xf32>
    %876 = arith.mulf %871, %875 : vector<2x32xf32>
    %c5_544 = arith.constant 5 : index
    %c0_545 = arith.constant 0 : index
    %c0_546 = arith.constant 0 : index
    %877 = vector.load %arg15[%c5_544, %c0_545, %c0_546] : memref<8x2x128xf32, #tpu.memory_space<vmem>>, vector<1x2x128xf32>
    %878 = vector.shape_cast %877 : vector<1x2x128xf32> to vector<2x128xf32>
    %879 = arith.truncf %876 : vector<2x32xf32> to vector<2x32xbf16>
    %cst_547 = arith.constant dense<0.000000e+00> : vector<2x128xf32>
    %880 = tpu.matmul %879, %620, %cst_547 {dimension_numbers = #tpu.dot_dimension_numbers<[1], [0], [0], [1], [0, 0, 1, 1], [], []>} : vector<2x32xbf16>, vector<32x128xbf16>, vector<2x128xf32> -> vector<2x128xf32>
    %881 = arith.addf %878, %880 : vector<2x128xf32>
    %882 = vector.extract_strided_slice %881 {offsets = [0, 0], sizes = [2, 32], strides = [1, 1]} : vector<2x128xf32> to vector<2x32xf32>
    %cst_548 = arith.constant 5.000000e-01 : f32
    %883 = vector.broadcast %cst_548 : f32 to vector<2x32xf32>
    %884 = arith.mulf %883, %882 : vector<2x32xf32>
    %885 = math.tanh %884 : vector<2x32xf32>
    %cst_549 = arith.constant 5.000000e-01 : f32
    %886 = vector.broadcast %cst_549 : f32 to vector<2x32xf32>
    %887 = arith.mulf %886, %885 : vector<2x32xf32>
    %cst_550 = arith.constant 5.000000e-01 : f32
    %888 = vector.broadcast %cst_550 : f32 to vector<2x32xf32>
    %889 = arith.addf %887, %888 : vector<2x32xf32>
    %890 = vector.extract_strided_slice %881 {offsets = [0, 32], sizes = [2, 32], strides = [1, 1]} : vector<2x128xf32> to vector<2x32xf32>
    %cst_551 = arith.constant 5.000000e-01 : f32
    %891 = vector.broadcast %cst_551 : f32 to vector<2x32xf32>
    %892 = arith.mulf %891, %890 : vector<2x32xf32>
    %893 = math.tanh %892 : vector<2x32xf32>
    %cst_552 = arith.constant 5.000000e-01 : f32
    %894 = vector.broadcast %cst_552 : f32 to vector<2x32xf32>
    %895 = arith.mulf %894, %893 : vector<2x32xf32>
    %cst_553 = arith.constant 5.000000e-01 : f32
    %896 = vector.broadcast %cst_553 : f32 to vector<2x32xf32>
    %897 = arith.addf %895, %896 : vector<2x32xf32>
    %898 = vector.extract_strided_slice %881 {offsets = [0, 64], sizes = [2, 32], strides = [1, 1]} : vector<2x128xf32> to vector<2x32xf32>
    %899 = math.tanh %898 : vector<2x32xf32>
    %900 = vector.extract_strided_slice %881 {offsets = [0, 96], sizes = [2, 32], strides = [1, 1]} : vector<2x128xf32> to vector<2x32xf32>
    %cst_554 = arith.constant 5.000000e-01 : f32
    %901 = vector.broadcast %cst_554 : f32 to vector<2x32xf32>
    %902 = arith.mulf %901, %900 : vector<2x32xf32>
    %903 = math.tanh %902 : vector<2x32xf32>
    %cst_555 = arith.constant 5.000000e-01 : f32
    %904 = vector.broadcast %cst_555 : f32 to vector<2x32xf32>
    %905 = arith.mulf %904, %903 : vector<2x32xf32>
    %cst_556 = arith.constant 5.000000e-01 : f32
    %906 = vector.broadcast %cst_556 : f32 to vector<2x32xf32>
    %907 = arith.addf %905, %906 : vector<2x32xf32>
    %908 = arith.mulf %897, %874 : vector<2x32xf32>
    %909 = arith.mulf %889, %899 : vector<2x32xf32>
    %910 = arith.addf %908, %909 : vector<2x32xf32>
    %911 = math.tanh %910 : vector<2x32xf32>
    %912 = arith.mulf %907, %911 : vector<2x32xf32>
    %c6_557 = arith.constant 6 : index
    %c0_558 = arith.constant 0 : index
    %c0_559 = arith.constant 0 : index
    %913 = vector.load %arg15[%c6_557, %c0_558, %c0_559] : memref<8x2x128xf32, #tpu.memory_space<vmem>>, vector<1x2x128xf32>
    %914 = vector.shape_cast %913 : vector<1x2x128xf32> to vector<2x128xf32>
    %915 = arith.truncf %912 : vector<2x32xf32> to vector<2x32xbf16>
    %cst_560 = arith.constant dense<0.000000e+00> : vector<2x128xf32>
    %916 = tpu.matmul %915, %620, %cst_560 {dimension_numbers = #tpu.dot_dimension_numbers<[1], [0], [0], [1], [0, 0, 1, 1], [], []>} : vector<2x32xbf16>, vector<32x128xbf16>, vector<2x128xf32> -> vector<2x128xf32>
    %917 = arith.addf %914, %916 : vector<2x128xf32>
    %918 = vector.extract_strided_slice %917 {offsets = [0, 0], sizes = [2, 32], strides = [1, 1]} : vector<2x128xf32> to vector<2x32xf32>
    %cst_561 = arith.constant 5.000000e-01 : f32
    %919 = vector.broadcast %cst_561 : f32 to vector<2x32xf32>
    %920 = arith.mulf %919, %918 : vector<2x32xf32>
    %921 = math.tanh %920 : vector<2x32xf32>
    %cst_562 = arith.constant 5.000000e-01 : f32
    %922 = vector.broadcast %cst_562 : f32 to vector<2x32xf32>
    %923 = arith.mulf %922, %921 : vector<2x32xf32>
    %cst_563 = arith.constant 5.000000e-01 : f32
    %924 = vector.broadcast %cst_563 : f32 to vector<2x32xf32>
    %925 = arith.addf %923, %924 : vector<2x32xf32>
    %926 = vector.extract_strided_slice %917 {offsets = [0, 32], sizes = [2, 32], strides = [1, 1]} : vector<2x128xf32> to vector<2x32xf32>
    %cst_564 = arith.constant 5.000000e-01 : f32
    %927 = vector.broadcast %cst_564 : f32 to vector<2x32xf32>
    %928 = arith.mulf %927, %926 : vector<2x32xf32>
    %929 = math.tanh %928 : vector<2x32xf32>
    %cst_565 = arith.constant 5.000000e-01 : f32
    %930 = vector.broadcast %cst_565 : f32 to vector<2x32xf32>
    %931 = arith.mulf %930, %929 : vector<2x32xf32>
    %cst_566 = arith.constant 5.000000e-01 : f32
    %932 = vector.broadcast %cst_566 : f32 to vector<2x32xf32>
    %933 = arith.addf %931, %932 : vector<2x32xf32>
    %934 = vector.extract_strided_slice %917 {offsets = [0, 64], sizes = [2, 32], strides = [1, 1]} : vector<2x128xf32> to vector<2x32xf32>
    %935 = math.tanh %934 : vector<2x32xf32>
    %936 = vector.extract_strided_slice %917 {offsets = [0, 96], sizes = [2, 32], strides = [1, 1]} : vector<2x128xf32> to vector<2x32xf32>
    %cst_567 = arith.constant 5.000000e-01 : f32
    %937 = vector.broadcast %cst_567 : f32 to vector<2x32xf32>
    %938 = arith.mulf %937, %936 : vector<2x32xf32>
    %939 = math.tanh %938 : vector<2x32xf32>
    %cst_568 = arith.constant 5.000000e-01 : f32
    %940 = vector.broadcast %cst_568 : f32 to vector<2x32xf32>
    %941 = arith.mulf %940, %939 : vector<2x32xf32>
    %cst_569 = arith.constant 5.000000e-01 : f32
    %942 = vector.broadcast %cst_569 : f32 to vector<2x32xf32>
    %943 = arith.addf %941, %942 : vector<2x32xf32>
    %944 = arith.mulf %933, %910 : vector<2x32xf32>
    %945 = arith.mulf %925, %935 : vector<2x32xf32>
    %946 = arith.addf %944, %945 : vector<2x32xf32>
    %947 = math.tanh %946 : vector<2x32xf32>
    %948 = arith.mulf %943, %947 : vector<2x32xf32>
    %c7_570 = arith.constant 7 : index
    %c0_571 = arith.constant 0 : index
    %c0_572 = arith.constant 0 : index
    %949 = vector.load %arg15[%c7_570, %c0_571, %c0_572] : memref<8x2x128xf32, #tpu.memory_space<vmem>>, vector<1x2x128xf32>
    %950 = vector.shape_cast %949 : vector<1x2x128xf32> to vector<2x128xf32>
    %951 = arith.truncf %948 : vector<2x32xf32> to vector<2x32xbf16>
    %cst_573 = arith.constant dense<0.000000e+00> : vector<2x128xf32>
    %952 = tpu.matmul %951, %620, %cst_573 {dimension_numbers = #tpu.dot_dimension_numbers<[1], [0], [0], [1], [0, 0, 1, 1], [], []>} : vector<2x32xbf16>, vector<32x128xbf16>, vector<2x128xf32> -> vector<2x128xf32>
    %953 = arith.addf %950, %952 : vector<2x128xf32>
    %954 = vector.extract_strided_slice %953 {offsets = [0, 0], sizes = [2, 32], strides = [1, 1]} : vector<2x128xf32> to vector<2x32xf32>
    %cst_574 = arith.constant 5.000000e-01 : f32
    %955 = vector.broadcast %cst_574 : f32 to vector<2x32xf32>
    %956 = arith.mulf %955, %954 : vector<2x32xf32>
    %957 = math.tanh %956 : vector<2x32xf32>
    %cst_575 = arith.constant 5.000000e-01 : f32
    %958 = vector.broadcast %cst_575 : f32 to vector<2x32xf32>
    %959 = arith.mulf %958, %957 : vector<2x32xf32>
    %cst_576 = arith.constant 5.000000e-01 : f32
    %960 = vector.broadcast %cst_576 : f32 to vector<2x32xf32>
    %961 = arith.addf %959, %960 : vector<2x32xf32>
    %962 = vector.extract_strided_slice %953 {offsets = [0, 32], sizes = [2, 32], strides = [1, 1]} : vector<2x128xf32> to vector<2x32xf32>
    %cst_577 = arith.constant 5.000000e-01 : f32
    %963 = vector.broadcast %cst_577 : f32 to vector<2x32xf32>
    %964 = arith.mulf %963, %962 : vector<2x32xf32>
    %965 = math.tanh %964 : vector<2x32xf32>
    %cst_578 = arith.constant 5.000000e-01 : f32
    %966 = vector.broadcast %cst_578 : f32 to vector<2x32xf32>
    %967 = arith.mulf %966, %965 : vector<2x32xf32>
    %cst_579 = arith.constant 5.000000e-01 : f32
    %968 = vector.broadcast %cst_579 : f32 to vector<2x32xf32>
    %969 = arith.addf %967, %968 : vector<2x32xf32>
    %970 = vector.extract_strided_slice %953 {offsets = [0, 64], sizes = [2, 32], strides = [1, 1]} : vector<2x128xf32> to vector<2x32xf32>
    %971 = math.tanh %970 : vector<2x32xf32>
    %972 = vector.extract_strided_slice %953 {offsets = [0, 96], sizes = [2, 32], strides = [1, 1]} : vector<2x128xf32> to vector<2x32xf32>
    %cst_580 = arith.constant 5.000000e-01 : f32
    %973 = vector.broadcast %cst_580 : f32 to vector<2x32xf32>
    %974 = arith.mulf %973, %972 : vector<2x32xf32>
    %975 = math.tanh %974 : vector<2x32xf32>
    %cst_581 = arith.constant 5.000000e-01 : f32
    %976 = vector.broadcast %cst_581 : f32 to vector<2x32xf32>
    %977 = arith.mulf %976, %975 : vector<2x32xf32>
    %cst_582 = arith.constant 5.000000e-01 : f32
    %978 = vector.broadcast %cst_582 : f32 to vector<2x32xf32>
    %979 = arith.addf %977, %978 : vector<2x32xf32>
    %980 = arith.mulf %969, %946 : vector<2x32xf32>
    %981 = arith.mulf %961, %971 : vector<2x32xf32>
    %982 = arith.addf %980, %981 : vector<2x32xf32>
    %983 = math.tanh %982 : vector<2x32xf32>
    %984 = arith.mulf %979, %983 : vector<2x32xf32>
    %c0_583 = arith.constant 0 : index
    %c0_584 = arith.constant 0 : index
    %985 = vector.load %arg11[%c0_583, %c0_584] : memref<32x4xbf16, #tpu.memory_space<vmem>>, vector<32x4xbf16>
    %c0_585 = arith.constant 0 : index
    %c0_586 = arith.constant 0 : index
    %986 = vector.load %arg12[%c0_585, %c0_586] : memref<1x4xf32, #tpu.memory_space<vmem>>, vector<1x4xf32>
    %c0_587 = arith.constant 0 : index
    %c0_588 = arith.constant 0 : index
    %987 = vector.load %arg2[%c0_587, %c0_588] : memref<2x4xf32, #tpu.memory_space<vmem>>, vector<2x4xf32>
    %988 = arith.truncf %987 : vector<2x4xf32> to vector<2x4xbf16>
    %c0_589 = arith.constant 0 : index
    %c0_590 = arith.constant 0 : index
    %989 = vector.load %arg8[%c0_589, %c0_590] : memref<4x128xbf16, #tpu.memory_space<vmem>>, vector<4x128xbf16>
    %cst_591 = arith.constant dense<0.000000e+00> : vector<2x128xf32>
    %990 = tpu.matmul %988, %989, %cst_591 {dimension_numbers = #tpu.dot_dimension_numbers<[1], [0], [0], [1], [0, 0, 1, 1], [], []>} : vector<2x4xbf16>, vector<4x128xbf16>, vector<2x128xf32> -> vector<2x128xf32>
    %991 = arith.truncf %984 : vector<2x32xf32> to vector<2x32xbf16>
    %c0_592 = arith.constant 0 : index
    %c0_593 = arith.constant 0 : index
    %992 = vector.load %arg9[%c0_592, %c0_593] : memref<32x128xbf16, #tpu.memory_space<vmem>>, vector<32x128xbf16>
    %cst_594 = arith.constant dense<0.000000e+00> : vector<2x128xf32>
    %993 = tpu.matmul %991, %992, %cst_594 {dimension_numbers = #tpu.dot_dimension_numbers<[1], [0], [0], [1], [0, 0, 1, 1], [], []>} : vector<2x32xbf16>, vector<32x128xbf16>, vector<2x128xf32> -> vector<2x128xf32>
    %994 = arith.addf %990, %993 : vector<2x128xf32>
    %c0_595 = arith.constant 0 : index
    %c0_596 = arith.constant 0 : index
    %995 = vector.load %arg10[%c0_595, %c0_596] : memref<1x128xf32, #tpu.memory_space<vmem>>, vector<1x128xf32>
    %996 = vector.broadcast %995 : vector<1x128xf32> to vector<2x128xf32>
    %997 = arith.addf %994, %996 : vector<2x128xf32>
    %998 = vector.extract_strided_slice %997 {offsets = [0, 0], sizes = [2, 32], strides = [1, 1]} : vector<2x128xf32> to vector<2x32xf32>
    %cst_597 = arith.constant 5.000000e-01 : f32
    %999 = vector.broadcast %cst_597 : f32 to vector<2x32xf32>
    %1000 = arith.mulf %999, %998 : vector<2x32xf32>
    %1001 = math.tanh %1000 : vector<2x32xf32>
    %cst_598 = arith.constant 5.000000e-01 : f32
    %1002 = vector.broadcast %cst_598 : f32 to vector<2x32xf32>
    %1003 = arith.mulf %1002, %1001 : vector<2x32xf32>
    %cst_599 = arith.constant 5.000000e-01 : f32
    %1004 = vector.broadcast %cst_599 : f32 to vector<2x32xf32>
    %1005 = arith.addf %1003, %1004 : vector<2x32xf32>
    %1006 = vector.extract_strided_slice %997 {offsets = [0, 32], sizes = [2, 32], strides = [1, 1]} : vector<2x128xf32> to vector<2x32xf32>
    %cst_600 = arith.constant 5.000000e-01 : f32
    %1007 = vector.broadcast %cst_600 : f32 to vector<2x32xf32>
    %1008 = arith.mulf %1007, %1006 : vector<2x32xf32>
    %1009 = math.tanh %1008 : vector<2x32xf32>
    %cst_601 = arith.constant 5.000000e-01 : f32
    %1010 = vector.broadcast %cst_601 : f32 to vector<2x32xf32>
    %1011 = arith.mulf %1010, %1009 : vector<2x32xf32>
    %cst_602 = arith.constant 5.000000e-01 : f32
    %1012 = vector.broadcast %cst_602 : f32 to vector<2x32xf32>
    %1013 = arith.addf %1011, %1012 : vector<2x32xf32>
    %1014 = vector.extract_strided_slice %997 {offsets = [0, 64], sizes = [2, 32], strides = [1, 1]} : vector<2x128xf32> to vector<2x32xf32>
    %1015 = math.tanh %1014 : vector<2x32xf32>
    %1016 = vector.extract_strided_slice %997 {offsets = [0, 96], sizes = [2, 32], strides = [1, 1]} : vector<2x128xf32> to vector<2x32xf32>
    %cst_603 = arith.constant 5.000000e-01 : f32
    %1017 = vector.broadcast %cst_603 : f32 to vector<2x32xf32>
    %1018 = arith.mulf %1017, %1016 : vector<2x32xf32>
    %1019 = math.tanh %1018 : vector<2x32xf32>
    %cst_604 = arith.constant 5.000000e-01 : f32
    %1020 = vector.broadcast %cst_604 : f32 to vector<2x32xf32>
    %1021 = arith.mulf %1020, %1019 : vector<2x32xf32>
    %cst_605 = arith.constant 5.000000e-01 : f32
    %1022 = vector.broadcast %cst_605 : f32 to vector<2x32xf32>
    %1023 = arith.addf %1021, %1022 : vector<2x32xf32>
    %1024 = arith.mulf %1013, %982 : vector<2x32xf32>
    %1025 = arith.mulf %1005, %1015 : vector<2x32xf32>
    %1026 = arith.addf %1024, %1025 : vector<2x32xf32>
    %1027 = math.tanh %1026 : vector<2x32xf32>
    %1028 = arith.mulf %1023, %1027 : vector<2x32xf32>
    %1029 = arith.truncf %1028 : vector<2x32xf32> to vector<2x32xbf16>
    %cst_606 = arith.constant dense<0.000000e+00> : vector<2x4xf32>
    %1030 = tpu.matmul %1029, %985, %cst_606 {dimension_numbers = #tpu.dot_dimension_numbers<[1], [0], [0], [1], [0, 0, 1, 1], [], []>} : vector<2x32xbf16>, vector<32x4xbf16>, vector<2x4xf32> -> vector<2x4xf32>
    %1031 = vector.broadcast %986 : vector<1x4xf32> to vector<2x4xf32>
    %1032 = arith.addf %1030, %1031 : vector<2x4xf32>
    %1033 = arith.truncf %1032 : vector<2x4xf32> to vector<2x4xbf16>
    %c0_607 = arith.constant 0 : index
    %c0_608 = arith.constant 0 : index
    %1034 = vector.load %arg8[%c0_607, %c0_608] : memref<4x128xbf16, #tpu.memory_space<vmem>>, vector<4x128xbf16>
    %cst_609 = arith.constant dense<0.000000e+00> : vector<2x128xf32>
    %1035 = tpu.matmul %1033, %1034, %cst_609 {dimension_numbers = #tpu.dot_dimension_numbers<[1], [0], [0], [1], [0, 0, 1, 1], [], []>} : vector<2x4xbf16>, vector<4x128xbf16>, vector<2x128xf32> -> vector<2x128xf32>
    %1036 = arith.truncf %1028 : vector<2x32xf32> to vector<2x32xbf16>
    %c0_610 = arith.constant 0 : index
    %c0_611 = arith.constant 0 : index
    %1037 = vector.load %arg9[%c0_610, %c0_611] : memref<32x128xbf16, #tpu.memory_space<vmem>>, vector<32x128xbf16>
    %cst_612 = arith.constant dense<0.000000e+00> : vector<2x128xf32>
    %1038 = tpu.matmul %1036, %1037, %cst_612 {dimension_numbers = #tpu.dot_dimension_numbers<[1], [0], [0], [1], [0, 0, 1, 1], [], []>} : vector<2x32xbf16>, vector<32x128xbf16>, vector<2x128xf32> -> vector<2x128xf32>
    %1039 = arith.addf %1035, %1038 : vector<2x128xf32>
    %c0_613 = arith.constant 0 : index
    %c0_614 = arith.constant 0 : index
    %1040 = vector.load %arg10[%c0_613, %c0_614] : memref<1x128xf32, #tpu.memory_space<vmem>>, vector<1x128xf32>
    %1041 = vector.broadcast %1040 : vector<1x128xf32> to vector<2x128xf32>
    %1042 = arith.addf %1039, %1041 : vector<2x128xf32>
    %1043 = vector.extract_strided_slice %1042 {offsets = [0, 0], sizes = [2, 32], strides = [1, 1]} : vector<2x128xf32> to vector<2x32xf32>
    %cst_615 = arith.constant 5.000000e-01 : f32
    %1044 = vector.broadcast %cst_615 : f32 to vector<2x32xf32>
    %1045 = arith.mulf %1044, %1043 : vector<2x32xf32>
    %1046 = math.tanh %1045 : vector<2x32xf32>
    %cst_616 = arith.constant 5.000000e-01 : f32
    %1047 = vector.broadcast %cst_616 : f32 to vector<2x32xf32>
    %1048 = arith.mulf %1047, %1046 : vector<2x32xf32>
    %cst_617 = arith.constant 5.000000e-01 : f32
    %1049 = vector.broadcast %cst_617 : f32 to vector<2x32xf32>
    %1050 = arith.addf %1048, %1049 : vector<2x32xf32>
    %1051 = vector.extract_strided_slice %1042 {offsets = [0, 32], sizes = [2, 32], strides = [1, 1]} : vector<2x128xf32> to vector<2x32xf32>
    %cst_618 = arith.constant 5.000000e-01 : f32
    %1052 = vector.broadcast %cst_618 : f32 to vector<2x32xf32>
    %1053 = arith.mulf %1052, %1051 : vector<2x32xf32>
    %1054 = math.tanh %1053 : vector<2x32xf32>
    %cst_619 = arith.constant 5.000000e-01 : f32
    %1055 = vector.broadcast %cst_619 : f32 to vector<2x32xf32>
    %1056 = arith.mulf %1055, %1054 : vector<2x32xf32>
    %cst_620 = arith.constant 5.000000e-01 : f32
    %1057 = vector.broadcast %cst_620 : f32 to vector<2x32xf32>
    %1058 = arith.addf %1056, %1057 : vector<2x32xf32>
    %1059 = vector.extract_strided_slice %1042 {offsets = [0, 64], sizes = [2, 32], strides = [1, 1]} : vector<2x128xf32> to vector<2x32xf32>
    %1060 = math.tanh %1059 : vector<2x32xf32>
    %1061 = vector.extract_strided_slice %1042 {offsets = [0, 96], sizes = [2, 32], strides = [1, 1]} : vector<2x128xf32> to vector<2x32xf32>
    %cst_621 = arith.constant 5.000000e-01 : f32
    %1062 = vector.broadcast %cst_621 : f32 to vector<2x32xf32>
    %1063 = arith.mulf %1062, %1061 : vector<2x32xf32>
    %1064 = math.tanh %1063 : vector<2x32xf32>
    %cst_622 = arith.constant 5.000000e-01 : f32
    %1065 = vector.broadcast %cst_622 : f32 to vector<2x32xf32>
    %1066 = arith.mulf %1065, %1064 : vector<2x32xf32>
    %cst_623 = arith.constant 5.000000e-01 : f32
    %1067 = vector.broadcast %cst_623 : f32 to vector<2x32xf32>
    %1068 = arith.addf %1066, %1067 : vector<2x32xf32>
    %1069 = arith.mulf %1058, %1026 : vector<2x32xf32>
    %1070 = arith.mulf %1050, %1060 : vector<2x32xf32>
    %1071 = arith.addf %1069, %1070 : vector<2x32xf32>
    %1072 = math.tanh %1071 : vector<2x32xf32>
    %1073 = arith.mulf %1068, %1072 : vector<2x32xf32>
    %1074 = arith.truncf %1073 : vector<2x32xf32> to vector<2x32xbf16>
    %cst_624 = arith.constant dense<0.000000e+00> : vector<2x4xf32>
    %1075 = tpu.matmul %1074, %985, %cst_624 {dimension_numbers = #tpu.dot_dimension_numbers<[1], [0], [0], [1], [0, 0, 1, 1], [], []>} : vector<2x32xbf16>, vector<32x4xbf16>, vector<2x4xf32> -> vector<2x4xf32>
    %1076 = vector.broadcast %986 : vector<1x4xf32> to vector<2x4xf32>
    %1077 = arith.addf %1075, %1076 : vector<2x4xf32>
    %1078 = arith.truncf %1077 : vector<2x4xf32> to vector<2x4xbf16>
    %c0_625 = arith.constant 0 : index
    %c0_626 = arith.constant 0 : index
    %1079 = vector.load %arg8[%c0_625, %c0_626] : memref<4x128xbf16, #tpu.memory_space<vmem>>, vector<4x128xbf16>
    %cst_627 = arith.constant dense<0.000000e+00> : vector<2x128xf32>
    %1080 = tpu.matmul %1078, %1079, %cst_627 {dimension_numbers = #tpu.dot_dimension_numbers<[1], [0], [0], [1], [0, 0, 1, 1], [], []>} : vector<2x4xbf16>, vector<4x128xbf16>, vector<2x128xf32> -> vector<2x128xf32>
    %1081 = arith.truncf %1073 : vector<2x32xf32> to vector<2x32xbf16>
    %c0_628 = arith.constant 0 : index
    %c0_629 = arith.constant 0 : index
    %1082 = vector.load %arg9[%c0_628, %c0_629] : memref<32x128xbf16, #tpu.memory_space<vmem>>, vector<32x128xbf16>
    %cst_630 = arith.constant dense<0.000000e+00> : vector<2x128xf32>
    %1083 = tpu.matmul %1081, %1082, %cst_630 {dimension_numbers = #tpu.dot_dimension_numbers<[1], [0], [0], [1], [0, 0, 1, 1], [], []>} : vector<2x32xbf16>, vector<32x128xbf16>, vector<2x128xf32> -> vector<2x128xf32>
    %1084 = arith.addf %1080, %1083 : vector<2x128xf32>
    %c0_631 = arith.constant 0 : index
    %c0_632 = arith.constant 0 : index
    %1085 = vector.load %arg10[%c0_631, %c0_632] : memref<1x128xf32, #tpu.memory_space<vmem>>, vector<1x128xf32>
    %1086 = vector.broadcast %1085 : vector<1x128xf32> to vector<2x128xf32>
    %1087 = arith.addf %1084, %1086 : vector<2x128xf32>
    %1088 = vector.extract_strided_slice %1087 {offsets = [0, 0], sizes = [2, 32], strides = [1, 1]} : vector<2x128xf32> to vector<2x32xf32>
    %cst_633 = arith.constant 5.000000e-01 : f32
    %1089 = vector.broadcast %cst_633 : f32 to vector<2x32xf32>
    %1090 = arith.mulf %1089, %1088 : vector<2x32xf32>
    %1091 = math.tanh %1090 : vector<2x32xf32>
    %cst_634 = arith.constant 5.000000e-01 : f32
    %1092 = vector.broadcast %cst_634 : f32 to vector<2x32xf32>
    %1093 = arith.mulf %1092, %1091 : vector<2x32xf32>
    %cst_635 = arith.constant 5.000000e-01 : f32
    %1094 = vector.broadcast %cst_635 : f32 to vector<2x32xf32>
    %1095 = arith.addf %1093, %1094 : vector<2x32xf32>
    %1096 = vector.extract_strided_slice %1087 {offsets = [0, 32], sizes = [2, 32], strides = [1, 1]} : vector<2x128xf32> to vector<2x32xf32>
    %cst_636 = arith.constant 5.000000e-01 : f32
    %1097 = vector.broadcast %cst_636 : f32 to vector<2x32xf32>
    %1098 = arith.mulf %1097, %1096 : vector<2x32xf32>
    %1099 = math.tanh %1098 : vector<2x32xf32>
    %cst_637 = arith.constant 5.000000e-01 : f32
    %1100 = vector.broadcast %cst_637 : f32 to vector<2x32xf32>
    %1101 = arith.mulf %1100, %1099 : vector<2x32xf32>
    %cst_638 = arith.constant 5.000000e-01 : f32
    %1102 = vector.broadcast %cst_638 : f32 to vector<2x32xf32>
    %1103 = arith.addf %1101, %1102 : vector<2x32xf32>
    %1104 = vector.extract_strided_slice %1087 {offsets = [0, 64], sizes = [2, 32], strides = [1, 1]} : vector<2x128xf32> to vector<2x32xf32>
    %1105 = math.tanh %1104 : vector<2x32xf32>
    %1106 = vector.extract_strided_slice %1087 {offsets = [0, 96], sizes = [2, 32], strides = [1, 1]} : vector<2x128xf32> to vector<2x32xf32>
    %cst_639 = arith.constant 5.000000e-01 : f32
    %1107 = vector.broadcast %cst_639 : f32 to vector<2x32xf32>
    %1108 = arith.mulf %1107, %1106 : vector<2x32xf32>
    %1109 = math.tanh %1108 : vector<2x32xf32>
    %cst_640 = arith.constant 5.000000e-01 : f32
    %1110 = vector.broadcast %cst_640 : f32 to vector<2x32xf32>
    %1111 = arith.mulf %1110, %1109 : vector<2x32xf32>
    %cst_641 = arith.constant 5.000000e-01 : f32
    %1112 = vector.broadcast %cst_641 : f32 to vector<2x32xf32>
    %1113 = arith.addf %1111, %1112 : vector<2x32xf32>
    %1114 = arith.mulf %1103, %1071 : vector<2x32xf32>
    %1115 = arith.mulf %1095, %1105 : vector<2x32xf32>
    %1116 = arith.addf %1114, %1115 : vector<2x32xf32>
    %1117 = math.tanh %1116 : vector<2x32xf32>
    %1118 = arith.mulf %1113, %1117 : vector<2x32xf32>
    %1119 = arith.truncf %1118 : vector<2x32xf32> to vector<2x32xbf16>
    %cst_642 = arith.constant dense<0.000000e+00> : vector<2x4xf32>
    %1120 = tpu.matmul %1119, %985, %cst_642 {dimension_numbers = #tpu.dot_dimension_numbers<[1], [0], [0], [1], [0, 0, 1, 1], [], []>} : vector<2x32xbf16>, vector<32x4xbf16>, vector<2x4xf32> -> vector<2x4xf32>
    %1121 = vector.broadcast %986 : vector<1x4xf32> to vector<2x4xf32>
    %1122 = arith.addf %1120, %1121 : vector<2x4xf32>
    %1123 = arith.truncf %1122 : vector<2x4xf32> to vector<2x4xbf16>
    %c0_643 = arith.constant 0 : index
    %c0_644 = arith.constant 0 : index
    %1124 = vector.load %arg8[%c0_643, %c0_644] : memref<4x128xbf16, #tpu.memory_space<vmem>>, vector<4x128xbf16>
    %cst_645 = arith.constant dense<0.000000e+00> : vector<2x128xf32>
    %1125 = tpu.matmul %1123, %1124, %cst_645 {dimension_numbers = #tpu.dot_dimension_numbers<[1], [0], [0], [1], [0, 0, 1, 1], [], []>} : vector<2x4xbf16>, vector<4x128xbf16>, vector<2x128xf32> -> vector<2x128xf32>
    %1126 = arith.truncf %1118 : vector<2x32xf32> to vector<2x32xbf16>
    %c0_646 = arith.constant 0 : index
    %c0_647 = arith.constant 0 : index
    %1127 = vector.load %arg9[%c0_646, %c0_647] : memref<32x128xbf16, #tpu.memory_space<vmem>>, vector<32x128xbf16>
    %cst_648 = arith.constant dense<0.000000e+00> : vector<2x128xf32>
    %1128 = tpu.matmul %1126, %1127, %cst_648 {dimension_numbers = #tpu.dot_dimension_numbers<[1], [0], [0], [1], [0, 0, 1, 1], [], []>} : vector<2x32xbf16>, vector<32x128xbf16>, vector<2x128xf32> -> vector<2x128xf32>
    %1129 = arith.addf %1125, %1128 : vector<2x128xf32>
    %c0_649 = arith.constant 0 : index
    %c0_650 = arith.constant 0 : index
    %1130 = vector.load %arg10[%c0_649, %c0_650] : memref<1x128xf32, #tpu.memory_space<vmem>>, vector<1x128xf32>
    %1131 = vector.broadcast %1130 : vector<1x128xf32> to vector<2x128xf32>
    %1132 = arith.addf %1129, %1131 : vector<2x128xf32>
    %1133 = vector.extract_strided_slice %1132 {offsets = [0, 0], sizes = [2, 32], strides = [1, 1]} : vector<2x128xf32> to vector<2x32xf32>
    %cst_651 = arith.constant 5.000000e-01 : f32
    %1134 = vector.broadcast %cst_651 : f32 to vector<2x32xf32>
    %1135 = arith.mulf %1134, %1133 : vector<2x32xf32>
    %1136 = math.tanh %1135 : vector<2x32xf32>
    %cst_652 = arith.constant 5.000000e-01 : f32
    %1137 = vector.broadcast %cst_652 : f32 to vector<2x32xf32>
    %1138 = arith.mulf %1137, %1136 : vector<2x32xf32>
    %cst_653 = arith.constant 5.000000e-01 : f32
    %1139 = vector.broadcast %cst_653 : f32 to vector<2x32xf32>
    %1140 = arith.addf %1138, %1139 : vector<2x32xf32>
    %1141 = vector.extract_strided_slice %1132 {offsets = [0, 32], sizes = [2, 32], strides = [1, 1]} : vector<2x128xf32> to vector<2x32xf32>
    %cst_654 = arith.constant 5.000000e-01 : f32
    %1142 = vector.broadcast %cst_654 : f32 to vector<2x32xf32>
    %1143 = arith.mulf %1142, %1141 : vector<2x32xf32>
    %1144 = math.tanh %1143 : vector<2x32xf32>
    %cst_655 = arith.constant 5.000000e-01 : f32
    %1145 = vector.broadcast %cst_655 : f32 to vector<2x32xf32>
    %1146 = arith.mulf %1145, %1144 : vector<2x32xf32>
    %cst_656 = arith.constant 5.000000e-01 : f32
    %1147 = vector.broadcast %cst_656 : f32 to vector<2x32xf32>
    %1148 = arith.addf %1146, %1147 : vector<2x32xf32>
    %1149 = vector.extract_strided_slice %1132 {offsets = [0, 64], sizes = [2, 32], strides = [1, 1]} : vector<2x128xf32> to vector<2x32xf32>
    %1150 = math.tanh %1149 : vector<2x32xf32>
    %1151 = vector.extract_strided_slice %1132 {offsets = [0, 96], sizes = [2, 32], strides = [1, 1]} : vector<2x128xf32> to vector<2x32xf32>
    %cst_657 = arith.constant 5.000000e-01 : f32
    %1152 = vector.broadcast %cst_657 : f32 to vector<2x32xf32>
    %1153 = arith.mulf %1152, %1151 : vector<2x32xf32>
    %1154 = math.tanh %1153 : vector<2x32xf32>
    %cst_658 = arith.constant 5.000000e-01 : f32
    %1155 = vector.broadcast %cst_658 : f32 to vector<2x32xf32>
    %1156 = arith.mulf %1155, %1154 : vector<2x32xf32>
    %cst_659 = arith.constant 5.000000e-01 : f32
    %1157 = vector.broadcast %cst_659 : f32 to vector<2x32xf32>
    %1158 = arith.addf %1156, %1157 : vector<2x32xf32>
    %1159 = arith.mulf %1148, %1116 : vector<2x32xf32>
    %1160 = arith.mulf %1140, %1150 : vector<2x32xf32>
    %1161 = arith.addf %1159, %1160 : vector<2x32xf32>
    %1162 = math.tanh %1161 : vector<2x32xf32>
    %1163 = arith.mulf %1158, %1162 : vector<2x32xf32>
    %1164 = arith.truncf %1163 : vector<2x32xf32> to vector<2x32xbf16>
    %cst_660 = arith.constant dense<0.000000e+00> : vector<2x4xf32>
    %1165 = tpu.matmul %1164, %985, %cst_660 {dimension_numbers = #tpu.dot_dimension_numbers<[1], [0], [0], [1], [0, 0, 1, 1], [], []>} : vector<2x32xbf16>, vector<32x4xbf16>, vector<2x4xf32> -> vector<2x4xf32>
    %1166 = vector.broadcast %986 : vector<1x4xf32> to vector<2x4xf32>
    %1167 = arith.addf %1165, %1166 : vector<2x4xf32>
    %1168 = tpu.concatenate %1032, %1077, %1122, %1167 in 1 : vector<2x4xf32>, vector<2x4xf32>, vector<2x4xf32>, vector<2x4xf32> -> vector<2x16xf32>
    %c0_661 = arith.constant 0 : index
    %c0_662 = arith.constant 0 : index
    %1169 = vector.load %arg13[%c0_661, %c0_662] : memref<2x16xf32, #tpu.memory_space<vmem>>, vector<2x16xf32>
    tpu.vector_store %arg13[%c0_661, %c0_662], %1168 {strides = array<i32>} : memref<2x16xf32, #tpu.memory_space<vmem>>, vector<2x16xf32>,
    return
  }
}

</mosaic_0001>

<bundles_post_ra>
// kernel: _lambda_.1
= control target key start
LH: loop header
LB: loop body
LE: loop exit
PB: predicated region body
PF: predicated region fallthrough
CT: control target
= control target key end

     0   :  { %18 = vsyncpa [#allocation5], 0  ;;  %s6577_s0 = inlined_call_operand.vmem [shape: f32[8,2,4], index: 0, kind: input, shape index: {}]   ;;  %s6578_s1 = inlined_call_operand.vmem [shape: f32[8,2,4], index: 1, kind: input, shape index: {}]   ;;  %s6579_s2 = inlined_call_operand.vmem [shape: f32[2,4], index: 2, kind: input, shape index: {}]   ;;  %s6580_s3 = inlined_call_operand.hbm [shape: bf16[3,4,32], index: 3, kind: input, shape index: {}]   ;;  %s6581_s4 = inlined_call_operand.vmem [shape: bf16[4,32], index: 4, kind: input, shape index: {}]   ;;  %s6582_s5 = inlined_call_operand.vmem [shape: bf16[2,32,128], index: 5, kind: input, shape index: {}]   ;;  %s6583_s6 = inlined_call_operand.vmem [shape: bf16[2,32,128], index: 6, kind: input, shape index: {}]   ;;  %s6584_s7 = inlined_call_operand.hbm [shape: f32[2,1,128], index: 7, kind: input, shape index: {}]   ;;  %s6585_s8 = inlined_call_operand.hbm [shape: bf16[4,128], index: 8, kind: input, shape index: {}]   ;;  %s6586_s9 = inlined_call_operand.vmem [shape: bf16[32,128], index: 9, kind: input, shape index: {}]   ;;  %s6587_s10 = inlined_call_operand.hbm [shape: f32[1,128], index: 10, kind: input, shape index: {}]   ;;  %s6588_s11 = inlined_call_operand.vmem [shape: bf16[32,4], index: 11, kind: input, shape index: {}]   ;;  %s6589_s12 = inlined_call_operand.hbm [shape: f32[1,4], index: 12, kind: input, shape index: {}]   ;;  %s6590_s13 = inlined_call_operand.vmem [shape: f32[2,16], index: 13, kind: output, shape index: {}]  }
   0x1   :  { %19 = vsyncpa [#allocation7], 0 }
   0x2   :  { %20 = vsyncpa [#allocation10], 0  ;;  %s5601_s25 = smov [#allocation6]   ;;  %s5485_s29 = scalar_lea.hbm %s6584_s7, 32 }
   0x3   :  { %s50_s26 = sshll.u32 %s5601_s25, 4  ;;  %p5486_p0 = scmp.ne.s32.totalorder %s6584_s7, %s5485_s29  ;;  %s51_s26 = int_to_ptr.vmem [resolvable:$true] %s50_s26 }
   0x4   :  { %p5489_p1 = scmp.lt.u32.totalorder %s5485_s29, %s6584_s7 }
   0x6   :  { %p5491_p2 = pnand %p5489_p1, %p5486_p0 }
   0x8   :  { %5494 = shalt.err (!%p5491_p2)
}
   0x9   :  { %s5495_s17 = scalar_lea.vmem %s51_s26, 32  ;;  %p5500_p4 = scmp.lt.s32.totalorder %s51_s26, %s51_s26 }
   0xa   :  { %p5496_p3 = scmp.ne.s32.totalorder %s51_s26, %s5495_s17  ;;  %p5501_p5 = scmp.lt.s32.totalorder %s5495_s17, %s5495_s17 }
   0xc   :  { %p5502_p6 = por %p5501_p5, %p5500_p4 }
   0xe   :  { %p5503_p7 = pnand %p5502_p6, %p5496_p3 }
  0x10   :  { %5506 = shalt.err (!%p5503_p7)
}
  0x11   :  { %s5602_s18 = smov 16   ;;  %s5603_s19 = smov 1  }
  0x12   :  { %56 = dma.hbm_to_vmem [thread:$0]  %s6584_s7, 32, %s51_s26, [#allocation7], %s5602_s18, %s5602_s18, %s5603_s19  }
  0x13   :  { %s5604_s22 = smov [#allocation9]   ;;  %s5605_s24 = smov [#allocation4]  }
  0x14   :  { %s75_s23 = sshll.u32 %s5604_s22, 4  ;;  %s32_s25 = sshll.u32 %s5605_s24, 4  ;;  %s76_s23 = int_to_ptr.vmem [resolvable:$true] %s75_s23  ;;  %s33_s25 = int_to_ptr.vmem [resolvable:$true] %s32_s25 }
  0x15   :  { %s5507_s29 = scalar_lea.hbm %s6587_s10, 16 }
  0x16   :  { %p5508_p8 = scmp.ne.s32.totalorder %s6587_s10, %s5507_s29  ;;  %p5511_p9 = scmp.lt.u32.totalorder %s5507_s29, %s6587_s10 }
  0x18   :  { %p5513_p10 = pnand %p5511_p9, %p5508_p8 }
  0x1a   :  { %5516 = shalt.err (!%p5513_p10)
}
  0x1b   :  { %s5517_s7 = scalar_lea.vmem %s76_s23, 16  ;;  %s5521_s26 = scalar_lea.vmem %s76_s23, 32 }
  0x1c   :  { %p5518_p11 = scmp.ne.s32.totalorder %s76_s23, %s5517_s7  ;;  %p5522_p12 = scmp.lt.s32.totalorder %s76_s23, %s76_s23 }
  0x1d   :  { %p5523_p13 = scmp.lt.s32.totalorder %s5521_s26, %s5517_s7 }
  0x1f   :  { %p5524_p0 = por %p5523_p13, %p5522_p12 }
  0x21   :  { %p5525_p1 = pnand %p5524_p0, %p5518_p11 }
  0x23   :  { %5528 = shalt.err (!%p5525_p1)
}
  0x24   :  { %78 = dma.hbm_to_vmem [thread:$0]  %s6587_s10, 16, %s76_s23, [#allocation10]  }
  0x25   :  { %s5529_s21 = scalar_lea.hbm %s6580_s3, 96 }
  0x26   :  { %p5530_p2 = scmp.ne.s32.totalorder %s6580_s3, %s5529_s21  ;;  %p5533_p3 = scmp.lt.u32.totalorder %s5529_s21, %s6580_s3 }
  0x28   :  { %p5535_p4 = pnand %p5533_p3, %p5530_p2 }
  0x2a   :  { %5538 = shalt.err (!%p5535_p4)
}
  0x2b   :  { %s5539_s29 = scalar_lea.vmem %s33_s25, 96  ;;  %p5544_p6 = scmp.lt.s32.totalorder %s33_s25, %s33_s25 }
  0x2c   :  { %p5540_p5 = scmp.ne.s32.totalorder %s33_s25, %s5539_s29  ;;  %p5545_p7 = scmp.lt.s32.totalorder %s5539_s29, %s5539_s29 }
  0x2e   :  { %p5546_p8 = por %p5545_p7, %p5544_p6 }
  0x30   :  { %p5547_p9 = pnand %p5546_p8, %p5540_p5 }
  0x32   :  { %5550 = shalt.err (!%p5547_p9)
}
  0x33   :  { %s5606_s10 = smov 32   ;;  %s5607_s23 = smov 2  }
  0x34   :  { %38 = dma.hbm_to_vmem [thread:$0]  %s6580_s3, 96, %s33_s25, [#allocation5], %s5606_s10, %s5606_s10, %s5607_s23  }
  0x35   :  { %s5608_s15 = smov [#allocation8]   ;;  %s5609_s7 = smov [#allocation11]  }
  0x36   :  { %s63_s16 = sshll.u32 %s5608_s15, 4  ;;  %s87_s26 = sshll.u32 %s5609_s7, 4  ;;  %s64_s16 = int_to_ptr.vmem [resolvable:$true] %s63_s16  ;;  %s88_s26 = int_to_ptr.vmem [resolvable:$true] %s87_s26 }
  0x37   :  { %s5551_s19 = scalar_lea.hbm %s6585_s8, 32 }
  0x38   :  { %p5552_p10 = scmp.ne.s32.totalorder %s6585_s8, %s5551_s19  ;;  %p5555_p11 = scmp.lt.u32.totalorder %s5551_s19, %s6585_s8 }
  0x3a   :  { %p5557_p12 = pnand %p5555_p11, %p5552_p10 }
  0x3c   :  { %5560 = shalt.err (!%p5557_p12)
}
  0x3d   :  { %s5561_s3 = scalar_lea.vmem %s64_s16, 32  ;;  %p5566_p0 = scmp.lt.s32.totalorder %s64_s16, %s64_s16 }
  0x3e   :  { %p5562_p13 = scmp.ne.s32.totalorder %s64_s16, %s5561_s3  ;;  %p5567_p1 = scmp.lt.s32.totalorder %s5561_s3, %s5561_s3 }
  0x40   :  { %p5568_p2 = por %p5567_p1, %p5566_p0 }
  0x42   :  { %p5569_p3 = pnand %p5568_p2, %p5562_p13 }
  0x44   :  { %5572 = shalt.err (!%p5569_p3)
}
  0x45   :  { %66 = dma.hbm_to_vmem [thread:$0]  %s6585_s8, 32, %s64_s16, [#allocation7]  }
  0x46   :  { %s5573_s23 = scalar_lea.hbm %s6589_s12, 16 }
  0x47   :  { %p5574_p4 = scmp.ne.s32.totalorder %s6589_s12, %s5573_s23  ;;  %p5577_p5 = scmp.lt.u32.totalorder %s5573_s23, %s6589_s12 }
  0x49   :  { %p5579_p6 = pnand %p5577_p5, %p5574_p4 }
  0x4b   :  { %5582 = shalt.err (!%p5579_p6)
}
  0x4c   :  { %s5583_s17 = scalar_lea.vmem %s88_s26, 16  ;;  %s5587_s18 = scalar_lea.vmem %s88_s26, 32 }
  0x4d   :  { %p5584_p7 = scmp.ne.s32.totalorder %s88_s26, %s5583_s17  ;;  %p5588_p8 = scmp.lt.s32.totalorder %s88_s26, %s88_s26 }
  0x4e   :  { %p5589_p9 = scmp.lt.s32.totalorder %s5587_s18, %s5583_s17 }
  0x50   :  { %p5590_p10 = por %p5589_p9, %p5588_p8 }
  0x52   :  { %p5591_p11 = pnand %p5590_p10, %p5584_p7 }
  0x54   :  { %5594 = shalt.err (!%p5591_p11)
}
  0x55   :  { %90 = dma.hbm_to_vmem [thread:$0]  %s6589_s12, 16, %s88_s26, [#allocation10]  }
  0x56   :  { %5595 = dma.done.wait [#allocation5], 96  }
  0x57   :  { %5596 = vsyncadd [#allocation5], 4294967200 }
  0x58   :  { %5597 = dma.done.wait [#allocation7], 64  }
  0x59   :  { %5598 = vsyncadd [#allocation7], 4294967232 }
  0x5a   :  { %5599 = dma.done.wait [#allocation10], 32  }
  0x5b   :  { %5600 = vsyncadd [#allocation10], 4294967264  ;;  %v5610_v0 = vmov 0.0   ;;  %vm5611_vm0 = vmmov 0   ;;  %vm118_vm1 = vcmask 1041408   ;;  %vm114_vm2 = vcmask 31744  }
  0x5c   :  { %4705 = vmatprep.subr.bf16.mxu0 %v5610_v0  ;;  %4707 = vmatprep.mubr.msk.bf16.mxu0 %vm5611_vm0, %v5610_v0  ;;  %v113_v1 = vld [vmem:[#allocation4] sm:$0x3]  ;;  %v4387_v2 = vld [vmem:[%s6577_s0 + $0xe] sm:$0x3]  ;;  %v211_v7 = vld [vmem:[#allocation4 + $0x2] sm:$0x3] }
  0x5d   :  { %4729 = vmatprep.subr.bf16.mxu1 %v5610_v0  ;;  %4731 = vmatprep.mubr.msk.bf16.mxu1 %vm5611_vm0, %v5610_v0  ;;  %v107_v3 = vld [vmem:[%s6581_s4] sm:$0x3]  ;;  %v120_v4 = vsel %vm118_vm1, %v113_v1, 0  ;;  %v112_v5 = vpack.c.bf16 %v4387_v2, %v4387_v2  ;;  %v216_v9 = vsel %vm118_vm1, %v211_v7, 0  ;;  %v263_v12 = vld [vmem:[#allocation4 + $0x4] sm:$0x3] }
  0x5e   :  { %4706 = vmatpush3.bf16.msra.mxu0 %v120_v4  ;;  %v5764_v6 = vsel %vm118_vm1, %v107_v3, 0  ;;  %v108_v8 = vld [vmem:[%s6578_s1] sm:$0x3]  ;;  %v268_v14 = vsel %vm118_vm1, %v263_v12, 0  ;;  %v4391_v15 = vld [vmem:[%s6577_s0 + $0x2] sm:$0x3] }
  0x5f   :  { %4711 = vmatprep.subr.bf16.mxu0 %v5610_v0  ;;  %v109_v10 = vpack.c.bf16 %v108_v8, %v108_v8  ;;  %v208_v11 = vld [vmem:[%s6577_s0] sm:$0x3]  ;;  %v261_v17 = vpack.c.bf16 %v4391_v15, %v4391_v15  ;;  %v4401_v19 = vld [vmem:[%s6577_s0 + $0x2] sm:$0x3]  ;;  %v4400_v21 = vld [vmem:[%s6578_s1 + $0x4] sm:$0x3] }
  0x60   :  { %v209_v13 = vpack.c.bf16 %v208_v11, %v208_v11  ;;  %v516_v16 = vld [vmem:[#allocation4] sm:$0x3]  ;;  %v515_v20 = vpack.c.bf16 %v4401_v19, %v4401_v19  ;;  %v608_v22 = vld [vmem:[#allocation4 + $0x2] sm:$0x3]  ;;  %v513_v23 = vpack.c.bf16 %v4400_v21, %v4400_v21  ;;  %v4404_v25 = vld [vmem:[%s6577_s0 + $0x4] sm:$0x3] }
  0x61   :  { %4708 = vmatmul.mubr.msk.bf16.vlgmr.msra.gmra.mrb[0].mxu0 %vm114_vm2, %v112_v5  ;;  %v521_v18 = vsel %vm118_vm1, %v516_v16, 0  ;;  %v613_v24 = vsel %vm118_vm1, %v608_v22, 0  ;;  %v659_v26 = vld [vmem:[#allocation4 + $0x4] sm:$0x3]  ;;  %v607_v27 = vpack.c.bf16 %v4404_v25, %v4404_v25  ;;  %v4406_v29 = vld [vmem:[%s6577_s0 + $0x6] sm:$0x3] }
  0x62   :  { %4712 = vmatpush3.bf16.msra.mxu0 %v5764_v6  ;;  %4713 = vmatprep.mubr.msk.bf16.mxu0 %vm5611_vm0, %v5610_v0  ;;  %v664_v28 = vsel %vm118_vm1, %v659_v26, 0  ;;  %v912_v30 = vld [vmem:[#allocation4] sm:$0x3]  ;;  %v658_v31 = vpack.c.bf16 %v4406_v29, %v4406_v29  ;;  %v4417_v33 = vld [vmem:[%s6577_s0 + $0x6] sm:$0x3]  ;;  %v5896_v60 = vld [vmem:[%s6582_s5 + $0x8] sm:$0xff]  }
  0x63   :  { %4717 = vmatprep.subr.bf16.mxu0 %v5610_v0  ;;  %v917_v32 = vsel %vm118_vm1, %v912_v30, 0  ;;  %v911_v34 = vpack.c.bf16 %v4417_v33, %v4417_v33  ;;  %v4416_v35 = vld [vmem:[%s6578_s1 + $0x8] sm:$0x3]  ;;  %v1004_v36 = vld [vmem:[#allocation4 + $0x2] sm:$0x3]  ;;  %vm311_vm3 = vcmask 254976  }
  0x64   :  { %v909_v37 = vpack.c.bf16 %v4416_v35, %v4416_v35  ;;  %v1009_v38 = vsel %vm118_vm1, %v1004_v36, 0  ;;  %v4420_v39 = vld [vmem:[%s6577_s0 + $0x8] sm:$0x3]  ;;  %v1055_v40 = vld [vmem:[#allocation4 + $0x4] sm:$0x3]  ;;  %vm1726_vm4 = vcmask 261120  }
  0x65   :  { %v1003_v41 = vpack.c.bf16 %v4420_v39, %v4420_v39  ;;  %v1060_v42 = vsel %vm118_vm1, %v1055_v40, 0  ;;  %v4422_v43 = vld [vmem:[%s6577_s0 + $0xa] sm:$0x3]  ;;  %v1308_v44 = vld [vmem:[#allocation4] sm:$0x3]  ;;  %v5612_v25 = vmov 0  }
  0x66   :  { %v1054_v45 = vpack.c.bf16 %v4422_v43, %v4422_v43  ;;  %v1313_v46 = vsel %vm118_vm1, %v1308_v44, 0  ;;  %v4433_v47 = vld [vmem:[%s6577_s0 + $0xa] sm:$0x3]  ;;  %v4432_v49 = vld [vmem:[%s6578_s1 + $0xc] sm:$0x3]  ;;  %v5889_v59 = vld [vmem:[%s6582_s5] sm:$0xff]  }
  0x67   :  { %v1307_v48 = vpack.c.bf16 %v4433_v47, %v4433_v47  ;;  %v1400_v50 = vld [vmem:[#allocation4 + $0x2] sm:$0x3]  ;;  %v1305_v51 = vpack.c.bf16 %v4432_v49, %v4432_v49  ;;  %v4436_v53 = vld [vmem:[%s6577_s0 + $0xc] sm:$0x3]  ;;  %v1450_v54 = vld [vmem:[#allocation4 + $0x4] sm:$0x3] }
  0x68   :  { %v1405_v52 = vsel %vm118_vm1, %v1400_v50, 0  ;;  %v1399_v55 = vpack.c.bf16 %v4436_v53, %v4436_v53  ;;  %v1455_v56 = vsel %vm118_vm1, %v1450_v54, 0  ;;  %v4438_v57 = vld [vmem:[%s6577_s0 + $0xe] sm:$0x3]  ;;  %v5931_v22 = vld [vmem:[%s6583_s6] sm:$0xff]   ;;  %s5613_s15 = smov 64  }
  0x69   :  { %v1449_v58 = vpack.c.bf16 %v4438_v57, %v4438_v57  ;;  %v5952_v26 = vld [vmem:[#allocation6] ss:$0 sm:$0xff]  ;;  %v316_v33 = vld [vmem:[%s6577_s0] sm:$0x3]  ;;  %v4393_v36 = vld [vmem:[%s6578_s1 + $0x2] sm:$0x3] }
  0x6a   :  { %v317_v35 = vpack.c.bf16 %v316_v33, %v316_v33  ;;  %v4398_v49 = vld [vmem:[%s6577_s0 + $0x4] sm:$0x3]  ;;  %v714_v50 = vld [vmem:[#allocation4] sm:$0x3]  ;;  %s5615_s12 = smov 8   ;;  %s5616_s26 = smov 12  }
  0x6b   :  { %v4409_v53 = vld [vmem:[%s6577_s0 + $0x4] sm:$0x3]  ;;  %vm4374_vm5 = vcmask 64512   ;;  %vm4376_vm6 = vcmask 97280   ;;  %vm4378_vm7 = vcmask 123904  }
  0x6c   :  { %v713_v54 = vpack.c.bf16 %v4409_v53, %v4409_v53 }
  0x6d   :  { %4714 = vmatmul.mubr.msk.bf16.vlgmr.msra.gmra.mrb[0].mxu0 %vm114_vm2, %v109_v10 }
  0x6e   :  { %4718 = vmatpush3.bf16.msra.mxu0 %v216_v9  ;;  %4719 = vmatprep.mubr.msk.bf16.mxu0 %vm5611_vm0, %v5610_v0 }
  0x6f   :  { %4723 = vmatprep.subr.bf16.mxu0 %v5610_v0 }
  0x79   :  { %4720 = vmatmul.mubr.msk.bf16.vlgmr.msra.gmra.mrb[0].mxu0 %vm114_vm2, %v209_v13 }
  0x7a   :  { %4724 = vmatpush3.bf16.msra.mxu0 %v268_v14  ;;  %4725 = vmatprep.mubr.msk.bf16.mxu0 %vm5611_vm0, %v5610_v0 }
  0x7b   :  { %4753 = vmatprep.subr.bf16.mxu0 %v5610_v0 }
  0x85   :  { %4726 = vmatmul.mubr.msk.bf16.vlgmr.msra.gmra.mrb[0].mxu0 %vm114_vm2, %v261_v17 }
  0x86   :  { %4754 = vmatpush3.bf16.msra.mxu0 %v521_v18  ;;  %4755 = vmatprep.mubr.msk.bf16.mxu0 %vm5611_vm0, %v5610_v0 }
  0x87   :  { %4759 = vmatprep.subr.bf16.mxu0 %v5610_v0 }
  0x8d   :  { %4756 = vmatmul.mubr.msk.bf16.vlgmr.msra.gmra.mrb[4].mxu0 %vm114_vm2, %v515_v20 }
  0x8e   :  { %4760 = vmatpush3.bf16.msra.mxu0 %v5764_v6  ;;  %4761 = vmatprep.mubr.msk.bf16.mxu0 %vm5611_vm0, %v5610_v0 }
  0x8f   :  { %4765 = vmatprep.subr.bf16.mxu0 %v5610_v0 }
  0x99   :  { %4762 = vmatmul.mubr.msk.bf16.vlgmr.msra.gmra.mrb[4].mxu0 %vm114_vm2, %v513_v23 }
  0x9a   :  { %4766 = vmatpush3.bf16.msra.mxu0 %v613_v24  ;;  %4767 = vmatprep.mubr.msk.bf16.mxu0 %vm5611_vm0, %v5610_v0  ;;  %v5938_v24 = vld [vmem:[%s6583_s6 + $0x8] sm:$0xff]  }
  0x9b   :  { %4771 = vmatprep.subr.bf16.mxu0 %v5610_v0 }
  0xa5   :  { %4768 = vmatmul.mubr.msk.bf16.vlgmr.msra.gmra.mrb[4].mxu0 %vm114_vm2, %v607_v27 }
  0xa6   :  { %4772 = vmatpush3.bf16.msra.mxu0 %v664_v28  ;;  %4773 = vmatprep.mubr.msk.bf16.mxu0 %vm5611_vm0, %v5610_v0 }
  0xa7   :  { %4801 = vmatprep.subr.bf16.mxu0 %v5610_v0 }
  0xb1   :  { %4774 = vmatmul.mubr.msk.bf16.vlgmr.msra.gmra.mrb[4].mxu0 %vm114_vm2, %v658_v31 }
  0xb2   :  { %4802 = vmatpush3.bf16.msra.mxu0 %v917_v32  ;;  %4803 = vmatprep.mubr.msk.bf16.mxu0 %vm5611_vm0, %v5610_v0  ;;  %v318_v32 = vld [vmem:[#allocation4] sm:$0x3] }
  0xb3   :  { %4807 = vmatprep.subr.bf16.mxu0 %v5610_v0 }
  0xb9   :  { %4804 = vmatmul.mubr.msk.bf16.vlgmr.msra.gmra.mrb[8].mxu0 %vm114_vm2, %v911_v34  ;;  %v323_v34 = vsel %vm118_vm1, %v318_v32, 0 }
  0xba   :  { %4808 = vmatpush3.bf16.msra.mxu0 %v5764_v6  ;;  %4809 = vmatprep.mubr.msk.bf16.mxu0 %vm5611_vm0, %v5610_v0 }
  0xbb   :  { %4813 = vmatprep.subr.bf16.mxu0 %v5610_v0  ;;  %4730 = vmatpush3.bf16.msra.mxu1 %v323_v34  ;;  %v4428_v34 = vld [vmem:[%s6577_s0 + $0xa] sm:$0x3] }
  0xbc   :  { %4735 = vmatprep.subr.bf16.mxu1 %v5610_v0 }
  0xbe   :  { %4732 = vmatmul.mubr.msk.bf16.vlgmr.msra.gmra.mrb[0].mxu1 %vm114_vm2, %v317_v35  ;;  %v1253_v35 = vld [vmem:[#allocation4 + $0x4] sm:$0x3] }
  0xbf   :  { %4736 = vmatpush3.bf16.msra.mxu1 %v5764_v6  ;;  %4737 = vmatprep.mubr.msk.bf16.mxu1 %vm5611_vm0, %v5610_v0 }
  0xc0   :  { %4741 = vmatprep.subr.bf16.mxu1 %v5610_v0 }
  0xc5   :  { %4810 = vmatmul.mubr.msk.bf16.vlgmr.msra.gmra.mrb[8].mxu0 %vm114_vm2, %v909_v37  ;;  %v410_v37 = vld [vmem:[#allocation4 + $0x2] sm:$0x3] }
  0xc6   :  { %4814 = vmatpush3.bf16.msra.mxu0 %v1009_v38  ;;  %4815 = vmatprep.mubr.msk.bf16.mxu0 %vm5611_vm0, %v5610_v0  ;;  %v315_v38 = vpack.c.bf16 %v4393_v36, %v4393_v36  ;;  %v415_v39 = vsel %vm118_vm1, %v410_v37, 0  ;;  %v1201_v36 = vpack.c.bf16 %v4428_v34, %v4428_v34  ;;  %v1258_v37 = vsel %vm118_vm1, %v1253_v35, 0 }
  0xc7   :  { %4819 = vmatprep.subr.bf16.mxu0 %v5610_v0 }
  0xca   :  { %4738 = vmatmul.mubr.msk.bf16.vlgmr.msra.gmra.mrb[0].mxu1 %vm114_vm2, %v315_v38  ;;  %v4430_v38 = vld [vmem:[%s6577_s0 + $0xc] sm:$0x3] }
  0xcb   :  { %4742 = vmatpush3.bf16.msra.mxu1 %v415_v39  ;;  %4743 = vmatprep.mubr.msk.bf16.mxu1 %vm5611_vm0, %v5610_v0  ;;  %v1505_v39 = vld [vmem:[#allocation4] sm:$0x3] }
  0xcc   :  { %4747 = vmatprep.subr.bf16.mxu1 %v5610_v0 }
  0xd1   :  { %4816 = vmatmul.mubr.msk.bf16.vlgmr.msra.gmra.mrb[8].mxu0 %vm114_vm2, %v1003_v41 }
  0xd2   :  { %4820 = vmatpush3.bf16.msra.mxu0 %v1060_v42  ;;  %4821 = vmatprep.mubr.msk.bf16.mxu0 %vm5611_vm0, %v5610_v0 }
  0xd3   :  { %4849 = vmatprep.subr.bf16.mxu0 %v5610_v0 }
  0xdd   :  { %4822 = vmatmul.mubr.msk.bf16.vlgmr.msra.gmra.mrb[8].mxu0 %vm114_vm2, %v1054_v45  ;;  %v4396_v45 = vld [vmem:[%s6577_s0 + $0x2] sm:$0x3] }
  0xde   :  { %4850 = vmatpush3.bf16.msra.mxu0 %v1313_v46  ;;  %4851 = vmatprep.mubr.msk.bf16.mxu0 %vm5611_vm0, %v5610_v0  ;;  %v461_v46 = vld [vmem:[#allocation4 + $0x4] sm:$0x3]  ;;  %v409_v47 = vpack.c.bf16 %v4396_v45, %v4396_v45  ;;  %v1597_v45 = vld [vmem:[#allocation4 + $0x2] sm:$0x3] }
  0xdf   :  { %4855 = vmatprep.subr.bf16.mxu0 %v5610_v0 }
  0xe0   :  { %4744 = vmatmul.mubr.msk.bf16.vlgmr.msra.gmra.mrb[0].mxu1 %vm114_vm2, %v409_v47  ;;  %v1602_v47 = vsel %vm118_vm1, %v1597_v45, 0 }
  0xe1   :  { %4749 = vmatprep.mubr.msk.bf16.mxu1 %vm5611_vm0, %v5610_v0 }
  0xe5   :  { %4852 = vmatmul.mubr.msk.bf16.vlgmr.msra.gmra.mrb[12].mxu0 %vm114_vm2, %v1307_v48  ;;  %v466_v48 = vsel %vm118_vm1, %v461_v46, 0 }
  0xe6   :  { %4856 = vmatpush3.bf16.msra.mxu0 %v5764_v6  ;;  %4857 = vmatprep.mubr.msk.bf16.mxu0 %vm5611_vm0, %v5610_v0 }
  0xe7   :  { %4861 = vmatprep.subr.bf16.mxu0 %v5610_v0  ;;  %4748 = vmatpush3.bf16.msra.mxu1 %v466_v48  ;;  %v1647_v48 = vld [vmem:[#allocation4 + $0x4] sm:$0x3] }
  0xe8   :  { %4777 = vmatprep.subr.bf16.mxu1 %v5610_v0 }
  0xf1   :  { %4858 = vmatmul.mubr.msk.bf16.vlgmr.msra.gmra.mrb[12].mxu0 %vm114_vm2, %v1305_v51  ;;  %v460_v51 = vpack.c.bf16 %v4398_v49, %v4398_v49 }
  0xf2   :  { %4862 = vmatpush3.bf16.msra.mxu0 %v1405_v52  ;;  %4863 = vmatprep.mubr.msk.bf16.mxu0 %vm5611_vm0, %v5610_v0  ;;  %v719_v52 = vsel %vm118_vm1, %v714_v50, 0  ;;  %v1652_v50 = vsel %vm118_vm1, %v1647_v48, 0 }
  0xf3   :  { %4867 = vmatprep.subr.bf16.mxu0 %v5610_v0  ;;  %4750 = vmatmul.mubr.msk.bf16.vlgmr.msra.gmra.mrb[0].mxu1 %vm114_vm2, %v460_v51  ;;  %v1645_v51 = vld [vmem:[%s6577_s0] sm:$0x3] }
  0xf4   :  { %4778 = vmatpush3.bf16.msra.mxu1 %v719_v52  ;;  %4779 = vmatprep.mubr.msk.bf16.mxu1 %vm5611_vm0, %v5610_v0  ;;  %v1646_v52 = vpack.c.bf16 %v1645_v51, %v1645_v51 }
  0xf5   :  { %4783 = vmatprep.subr.bf16.mxu1 %v5610_v0 }
  0xfb   :  { %4780 = vmatmul.mubr.msk.bf16.vlgmr.msra.gmra.mrb[4].mxu1 %vm114_vm2, %v713_v54 }
  0xfc   :  { %4784 = vmatpush3.bf16.msra.mxu1 %v5764_v6  ;;  %4785 = vmatprep.mubr.msk.bf16.mxu1 %vm5611_vm0, %v5610_v0 }
  0xfd   :  { %4864 = vmatmul.mubr.msk.bf16.vlgmr.msra.gmra.mrb[12].mxu0 %vm114_vm2, %v1399_v55  ;;  %4789 = vmatprep.subr.bf16.mxu1 %v5610_v0  ;;  %v4408_v55 = vld [vmem:[%s6578_s1 + $0x6] sm:$0x3] }
  0xfe   :  { %4868 = vmatpush3.bf16.msra.mxu0 %v1455_v56  ;;  %4869 = vmatprep.mubr.msk.bf16.mxu0 %vm5611_vm0, %v5610_v0  ;;  %v806_v56 = vld [vmem:[#allocation4 + $0x2] sm:$0x3]  ;;  %v711_v57 = vpack.c.bf16 %v4408_v55, %v4408_v55 }
  0xff   :  { %4897 = vmatprep.subr.bf16.mxu0 %v5610_v0 }
 0x107   :  { %4786 = vmatmul.mubr.msk.bf16.vlgmr.msra.gmra.mrb[4].mxu1 %vm114_vm2, %v711_v57 }
 0x108   :  { %4791 = vmatprep.mubr.msk.bf16.mxu1 %vm5611_vm0, %v5610_v0 }
 0x109   :  { %4870 = vmatmul.mubr.msk.bf16.vlgmr.msra.gmra.mrb[12].mxu0 %vm114_vm2, %v1449_v58  ;;  %v811_v58 = vsel %vm118_vm1, %v806_v56, 0 }
 0x10a   :  { %4898 = vmatpush3.bf16.msra.mxu0 %v5889_v59  ;;  %4901 = vmatprep.mubr.msk.bf16.mxu0 %vm5611_vm0, %v5610_v0 }
 0x10b   :  { %4899 = vmatprep.subr.bf16.mxu0 %v5610_v0  ;;  %4790 = vmatpush3.bf16.msra.mxu1 %v811_v58 }
 0x10c   :  { %4795 = vmatprep.subr.bf16.mxu1 %v5610_v0 }
 0x10e   :  { %4900 = vmatpush3.bf16.msra.mxu0 %v5896_v60 }
 0x10f   :  { %4913 = vmatprep.subr.bf16.mxu0 %v5610_v0 }
 0x158   :  { %v304_v61 = vpop.f32.mrb[0].mxu0 }
 0x159   :  { %312 = vst.msk [vmem:[#allocation2] sm:$0x3] %vm311_vm3, %v304_v61  ;;  %v4727_v62 = vpop.f32.mrb[1].mxu0 }
 0x15a   :  { %v307_v63 = vpop.f32.mrb[2].mxu0 }
 0x15b   :  { %v4728_v1 = vpop.f32.mrb[3].mxu0 }
 0x160   :  { %v1706_v2 = vld [vmem:[#allocation2] sm:$0x3] }
 0x161   :  { %v1707_v3 = vpack.c.bf16 %v1706_v2, %v1706_v2 }
 0x163   :  { %4902 = vmatmul.mubr.msk.bf16.vlgmr.msra.gmra.mrb[16].mxu0 %vm1726_vm4, %v1707_v3  ;;  %v4412_v3 = vld [vmem:[%s6577_s0 + $0x6] sm:$0x3] }
 0x164   :  { %4914 = vmatpush3.bf16.msra.mxu0 %v5889_v59  ;;  %4917 = vmatprep.mubr.msk.bf16.mxu0 %vm5611_vm0, %v5610_v0 }
 0x165   :  { %4915 = vmatprep.subr.bf16.mxu0 %v5610_v0 }
 0x168   :  { %4916 = vmatpush3.bf16.msra.mxu0 %v5896_v60 }
 0x169   :  { %4929 = vmatprep.subr.bf16.mxu0 %v5610_v0 }
 0x184   :  { %v700_v4 = vpop.f32.mrb[4].mxu0 }
 0x185   :  { %708 = vst.msk [vmem:[#allocation2 + $0x4] sm:$0x3] %vm311_vm3, %v700_v4  ;;  %v4775_v5 = vpop.f32.mrb[5].mxu0  ;;  %v805_v4 = vpack.c.bf16 %v4412_v3, %v4412_v3 }
 0x186   :  { %v703_v7 = vpop.f32.mrb[6].mxu0 }
 0x187   :  { %v4776_v8 = vpop.f32.mrb[7].mxu0  ;;  %4792 = vmatmul.mubr.msk.bf16.vlgmr.msra.gmra.mrb[4].mxu1 %vm114_vm2, %v805_v4 }
 0x188   :  { %4797 = vmatprep.mubr.msk.bf16.mxu1 %vm5611_vm0, %v5610_v0 }
 0x18c   :  { %v1818_v9 = vld [vmem:[#allocation2 + $0x4] sm:$0x3] }
 0x18d   :  { %v1819_v10 = vpack.c.bf16 %v1818_v9, %v1818_v9 }
 0x18f   :  { %4918 = vmatmul.mubr.msk.bf16.vlgmr.msra.gmra.mrb[20].mxu0 %vm1726_vm4, %v1819_v10 }
 0x190   :  { %4930 = vmatpush3.bf16.msra.mxu0 %v5889_v59  ;;  %4933 = vmatprep.mubr.msk.bf16.mxu0 %vm5611_vm0, %v5610_v0 }
 0x191   :  { %4931 = vmatprep.subr.bf16.mxu0 %v5610_v0 }
 0x194   :  { %4932 = vmatpush3.bf16.msra.mxu0 %v5896_v60 }
 0x195   :  { %4945 = vmatprep.subr.bf16.mxu0 %v5610_v0 }
 0x1b0   :  { %v1096_v11 = vpop.f32.mrb[8].mxu0 }
 0x1b1   :  { %1104 = vst.msk [vmem:[#allocation2 + $0x8] sm:$0x3] %vm311_vm3, %v1096_v11  ;;  %v4823_v12 = vpop.f32.mrb[9].mxu0 }
 0x1b2   :  { %v1099_v13 = vpop.f32.mrb[10].mxu0 }
 0x1b3   :  { %v4824_v14 = vpop.f32.mrb[11].mxu0 }
 0x1b8   :  { %v1912_v15 = vld [vmem:[#allocation2 + $0x8] sm:$0x3] }
 0x1b9   :  { %v1913_v16 = vpack.c.bf16 %v1912_v15, %v1912_v15 }
 0x1bb   :  { %4934 = vmatmul.mubr.msk.bf16.vlgmr.msra.gmra.mrb[24].mxu0 %vm1726_vm4, %v1913_v16 }
 0x1bc   :  { %4946 = vmatpush3.bf16.msra.mxu0 %v5889_v59  ;;  %4949 = vmatprep.mubr.msk.bf16.mxu0 %vm5611_vm0, %v5610_v0 }
 0x1bd   :  { %4947 = vmatprep.subr.bf16.mxu0 %v5610_v0 }
 0x1c0   :  { %4948 = vmatpush3.bf16.msra.mxu0 %v5896_v60 }
 0x1c1   :  { %4961 = vmatprep.subr.bf16.mxu0 %v5610_v0 }
 0x1dc   :  { %v1491_v17 = vpop.f32.mrb[12].mxu0 }
 0x1dd   :  { %1499 = vst.msk [vmem:[#allocation2 + $0xc] sm:$0x3] %vm311_vm3, %v1491_v17  ;;  %v4871_v18 = vpop.f32.mrb[13].mxu0  ;;  %v857_v17 = vld [vmem:[#allocation4 + $0x4] sm:$0x3] }
 0x1de   :  { %v1494_v19 = vpop.f32.mrb[14].mxu0  ;;  %v4414_v18 = vld [vmem:[%s6577_s0 + $0x8] sm:$0x3] }
 0x1df   :  { %v4872_v20 = vpop.f32.mrb[15].mxu0  ;;  %v862_v19 = vsel %vm118_vm1, %v857_v17, 0 }
 0x1e0   :  { %v856_v20 = vpack.c.bf16 %v4414_v18, %v4414_v18  ;;  %4796 = vmatpush3.bf16.msra.mxu1 %v862_v19 }
 0x1e1   :  { %4825 = vmatprep.subr.bf16.mxu1 %v5610_v0 }
 0x1e3   :  { %4798 = vmatmul.mubr.msk.bf16.vlgmr.msra.gmra.mrb[4].mxu1 %vm114_vm2, %v856_v20 }
 0x1e4   :  { %v2006_v21 = vld [vmem:[#allocation2 + $0xc] sm:$0x3]  ;;  %4827 = vmatprep.mubr.msk.bf16.mxu1 %vm5611_vm0, %v5610_v0 }
 0x1e5   :  { %v2007_v23 = vpack.c.bf16 %v2006_v21, %v2006_v21  ;;  %v1110_v21 = vld [vmem:[#allocation4] sm:$0x3] }
 0x1e7   :  { %4950 = vmatmul.mubr.msk.bf16.vlgmr.msra.gmra.mrb[28].mxu0 %vm1726_vm4, %v2007_v23  ;;  %v1115_v23 = vsel %vm118_vm1, %v1110_v21, 0 }
 0x1e8   :  { %4962 = vmatpush3.bf16.msra.mxu0 %v5931_v22  ;;  %4965 = vmatprep.mubr.msk.bf16.mxu0 %vm5611_vm0, %v5610_v0 }
 0x1e9   :  { %4963 = vmatprep.subr.bf16.mxu0 %v5610_v0  ;;  %4826 = vmatpush3.bf16.msra.mxu1 %v1115_v23 }
 0x1ea   :  { %4831 = vmatprep.subr.bf16.mxu1 %v5610_v0 }
 0x1ec   :  { %4964 = vmatpush3.bf16.msra.mxu0 %v5938_v24 }
 0x1ed   :  { %4977 = vmatprep.subr.bf16.mxu0 %v5610_v0 }
 0x1ef   :  { %4966 = vmatmul.mubr.bf16.vlgmr.msra.gmra.mrb[32].mxu0 %v5612_v25 }
 0x1f0   :  { %4978 = vmatpush3.bf16.msra.mxu0 %v5931_v22  ;;  %4981 = vmatprep.mubr.msk.bf16.mxu0 %vm5611_vm0, %v5610_v0 }
 0x1f1   :  { %4979 = vmatprep.subr.bf16.mxu0 %v5610_v0 }
 0x1f4   :  { %4980 = vmatpush3.bf16.msra.mxu0 %v5938_v24 }
 0x1f5   :  { %4993 = vmatprep.subr.bf16.mxu0 %v5610_v0 }
 0x236   :  { %v1764_v27 = vpop.f32.mrb[16].mxu0 }
 0x237   :  { %v1765_v28 = vadd.f32 %v5952_v26, %v1764_v27  ;;  %v4903_v29 = vpop.f32.mrb[17].mxu0  ;;  %v4425_v27 = vld [vmem:[%s6577_s0 + $0x8] sm:$0x3] }
 0x238   :  { %v1767_v30 = vpop.f32.mrb[18].mxu0 }
 0x239   :  { %1770 = vst [vmem:[#allocation3] sm:$0x3] %v1765_v28  ;;  %v4904_v31 = vpop.f32.mrb[19].mxu0  ;;  %v1109_v28 = vpack.c.bf16 %v4425_v27, %v4425_v27  ;;  %v4424_v30 = vld [vmem:[%s6578_s1 + $0xa] sm:$0x3] }
 0x23a   :  { %v1202_v31 = vld [vmem:[#allocation4 + $0x2] sm:$0x3]  ;;  %v1107_v32 = vpack.c.bf16 %v4424_v30, %v4424_v30 }
 0x23b   :  { %4828 = vmatmul.mubr.msk.bf16.vlgmr.msra.gmra.mrb[8].mxu1 %vm114_vm2, %v1109_v28  ;;  %v1207_v33 = vsel %vm118_vm1, %v1202_v31, 0 }
 0x23c   :  { %4832 = vmatpush3.bf16.msra.mxu1 %v5764_v6  ;;  %4833 = vmatprep.mubr.msk.bf16.mxu1 %vm5611_vm0, %v5610_v0 }
 0x23d   :  { %4837 = vmatprep.subr.bf16.mxu1 %v5610_v0 }
 0x240   :  { %v2100_v11 = vld [vmem:[#allocation3] sm:$0x3] }
 0x247   :  { %4834 = vmatmul.mubr.msk.bf16.vlgmr.msra.gmra.mrb[8].mxu1 %vm114_vm2, %v1107_v32 }
 0x248   :  { %4838 = vmatpush3.bf16.msra.mxu1 %v1207_v33  ;;  %4839 = vmatprep.mubr.msk.bf16.mxu1 %vm5611_vm0, %v5610_v0 }
 0x249   :  { %4843 = vmatprep.subr.bf16.mxu1 %v5610_v0 }
 0x253   :  { %4840 = vmatmul.mubr.msk.bf16.vlgmr.msra.gmra.mrb[8].mxu1 %vm114_vm2, %v1201_v36 }
 0x254   :  { %4844 = vmatpush3.bf16.msra.mxu1 %v1258_v37  ;;  %4845 = vmatprep.mubr.msk.bf16.mxu1 %vm5611_vm0, %v5610_v0 }
 0x255   :  { %4873 = vmatprep.subr.bf16.mxu1 %v5610_v0 }
 0x262   :  { %v1857_v40 = vpop.f32.mrb[20].mxu0 }
 0x263   :  { %v1858_v41 = vadd.f32 %v5952_v26, %v1857_v40  ;;  %v4919_v42 = vpop.f32.mrb[21].mxu0  ;;  %v1252_v40 = vpack.c.bf16 %v4430_v38, %v4430_v38 }
 0x264   :  { %v1860_v43 = vpop.f32.mrb[22].mxu0  ;;  %v4441_v42 = vld [vmem:[%s6577_s0 + $0xc] sm:$0x3] }
 0x265   :  { %1864 = vst [vmem:[#allocation3 + $0x4] sm:$0x3] %v1858_v41  ;;  %v4920_v44 = vpop.f32.mrb[23].mxu0  ;;  %v1510_v41 = vsel %vm118_vm1, %v1505_v39, 0  ;;  %4846 = vmatmul.mubr.msk.bf16.vlgmr.msra.gmra.mrb[8].mxu1 %vm114_vm2, %v1252_v40  ;;  %v1504_v43 = vpack.c.bf16 %v4441_v42, %v4441_v42 }
 0x266   :  { %4874 = vmatpush3.bf16.msra.mxu1 %v1510_v41  ;;  %4875 = vmatprep.mubr.msk.bf16.mxu1 %vm5611_vm0, %v5610_v0  ;;  %v4440_v44 = vld [vmem:[%s6578_s1 + $0xe] sm:$0x3] }
 0x267   :  { %4879 = vmatprep.subr.bf16.mxu1 %v5610_v0  ;;  %v1502_v46 = vpack.c.bf16 %v4440_v44, %v4440_v44 }
 0x26d   :  { %4876 = vmatmul.mubr.msk.bf16.vlgmr.msra.gmra.mrb[12].mxu1 %vm114_vm2, %v1504_v43 }
 0x26e   :  { %4880 = vmatpush3.bf16.msra.mxu1 %v5764_v6  ;;  %4881 = vmatprep.mubr.msk.bf16.mxu1 %vm5611_vm0, %v5610_v0  ;;  %v4444_v6 = vld [vmem:[%s6577_s0 + $0xe] sm:$0x3] }
 0x26f   :  { %4885 = vmatprep.subr.bf16.mxu1 %v5610_v0  ;;  %v1596_v49 = vpack.c.bf16 %v4444_v6, %v4444_v6 }
 0x279   :  { %4882 = vmatmul.mubr.msk.bf16.vlgmr.msra.gmra.mrb[12].mxu1 %vm114_vm2, %v1502_v46 }
 0x27a   :  { %4886 = vmatpush3.bf16.msra.mxu1 %v1602_v47  ;;  %4887 = vmatprep.mubr.msk.bf16.mxu1 %vm5611_vm0, %v5610_v0 }
 0x27b   :  { %4891 = vmatprep.subr.bf16.mxu1 %v5610_v0 }
 0x285   :  { %4888 = vmatmul.mubr.msk.bf16.vlgmr.msra.gmra.mrb[12].mxu1 %vm114_vm2, %v1596_v49 }
 0x286   :  { %4892 = vmatpush3.bf16.msra.mxu1 %v1652_v50  ;;  %4893 = vmatprep.mubr.msk.bf16.mxu1 %vm5611_vm0, %v5610_v0 }
 0x287   :  { %4905 = vmatprep.subr.bf16.mxu1 %v5610_v0 }
 0x28e   :  { %v1951_v61 = vpop.f32.mrb[24].mxu0 }
 0x28f   :  { %v1952_v62 = vadd.f32 %v5952_v26, %v1951_v61  ;;  %v4935_v63 = vpop.f32.mrb[25].mxu0  ;;  %v502_v61 = vpop.f32.mrb[0].mxu1 }
 0x290   :  { %v1954_v1 = vpop.f32.mrb[26].mxu0  ;;  %510 = vst.msk [vmem:[#allocation2 + $0x2] sm:$0x3] %vm311_vm3, %v502_v61 }
 0x291   :  { %1958 = vst [vmem:[#allocation3 + $0x8] sm:$0x3] %v1952_v62  ;;  %v4936_v2 = vpop.f32.mrb[27].mxu0  ;;  %4894 = vmatmul.mubr.msk.bf16.vlgmr.msra.gmra.mrb[12].mxu1 %vm114_vm2, %v1646_v52  ;;  %v4751_v62 = vpop.f32.mrb[1].mxu1 }
 0x292   :  { %4906 = vmatpush3.bf16.msra.mxu1 %v5889_v59  ;;  %4909 = vmatprep.mubr.msk.bf16.mxu1 %vm5611_vm0, %v5610_v0  ;;  %v505_v63 = vpop.f32.mrb[2].mxu1 }
 0x293   :  { %4907 = vmatprep.subr.bf16.mxu1 %v5610_v0  ;;  %v4752_v1 = vpop.f32.mrb[3].mxu1 }
 0x296   :  { %4908 = vmatpush3.bf16.msra.mxu1 %v5896_v60 }
 0x297   :  { %4921 = vmatprep.subr.bf16.mxu1 %v5610_v0  ;;  %v1771_v2 = vld [vmem:[#allocation2 + $0x2] sm:$0x3] }
 0x298   :  { %v1772_v3 = vpack.c.bf16 %v1771_v2, %v1771_v2 }
 0x29a   :  { %4910 = vmatmul.mubr.msk.bf16.vlgmr.msra.gmra.mrb[16].mxu1 %vm1726_vm4, %v1772_v3 }
 0x29b   :  { %4922 = vmatpush3.bf16.msra.mxu1 %v5889_v59  ;;  %4925 = vmatprep.mubr.msk.bf16.mxu1 %vm5611_vm0, %v5610_v0 }
 0x29c   :  { %4923 = vmatprep.subr.bf16.mxu1 %v5610_v0 }
 0x29f   :  { %4924 = vmatpush3.bf16.msra.mxu1 %v5896_v60 }
 0x2a0   :  { %4937 = vmatprep.subr.bf16.mxu1 %v5610_v0 }
 0x2b6   :  { %v898_v4 = vpop.f32.mrb[4].mxu1 }
 0x2b7   :  { %906 = vst.msk [vmem:[#allocation2 + $0x6] sm:$0x3] %vm311_vm3, %v898_v4 }
 0x2ba   :  { %v2045_v5 = vpop.f32.mrb[28].mxu0 }
 0x2bb   :  { %v2046_v7 = vadd.f32 %v5952_v26, %v2045_v5  ;;  %v4951_v8 = vpop.f32.mrb[29].mxu0  ;;  %v4799_v5 = vpop.f32.mrb[5].mxu1 }
 0x2bc   :  { %v2048_v9 = vpop.f32.mrb[30].mxu0 }
 0x2bd   :  { %2052 = vst [vmem:[#allocation3 + $0xc] sm:$0x3] %v2046_v7  ;;  %v4952_v10 = vpop.f32.mrb[31].mxu0  ;;  %v901_v7 = vpop.f32.mrb[6].mxu1 }
 0x2be   :  { %v4800_v8 = vpop.f32.mrb[7].mxu1  ;;  %v1865_v9 = vld [vmem:[#allocation2 + $0x6] sm:$0x3] }
 0x2bf   :  { %v1866_v10 = vpack.c.bf16 %v1865_v9, %v1865_v9 }
 0x2c1   :  { %4926 = vmatmul.mubr.msk.bf16.vlgmr.msra.gmra.mrb[20].mxu1 %vm1726_vm4, %v1866_v10 }
 0x2c2   :  { %v2150_v12 = vpop.f32.mrb[32].mxu0  ;;  %4938 = vmatpush3.bf16.msra.mxu1 %v5889_v59  ;;  %4941 = vmatprep.mubr.msk.bf16.mxu1 %vm5611_vm0, %v5610_v0 }
 0x2c3   :  { %v6014_v13 = vadd.f32 %v2150_v12, %v2100_v11  ;;  %v4967_v14 = vpop.f32.mrb[33].mxu0  ;;  %4939 = vmatprep.subr.bf16.mxu1 %v5610_v0 }
 0x2c4   :  { %v2153_v15 = vpop.f32.mrb[34].mxu0 }
 0x2c5   :  { %5365 = vtanh.f32 %v6014_v13  ;;  %v4968_v16 = vpop.f32.mrb[35].mxu0  ;;  %v2157_v53 = vmul.f32 0.5, %v6014_v13 }
 0x2c6   :  { %4940 = vmatpush3.bf16.msra.mxu1 %v5896_v60 }
 0x2c7   :  { %5367 = vtanh.f32 %v2157_v53  ;;  %4953 = vmatprep.subr.bf16.mxu1 %v5610_v0 }
 0x2cf   :  { %v5366_v29 = vpop.eup %5365 }
 0x2d0   :  { %2164 = vrot.lane.b32.xlu0 %v5366_v29, %s5613_s15 }
 0x2d1   :  { %v5368_v54 = vpop.eup %5367 }
 0x2d2   :  { %v2159_v55 = vmul.f32 0.5, %v5368_v54 }
 0x2d4   :  { %v6095_v56 = vadd.f32 0.5, %v2159_v55 }
 0x2d6   :  { %v2162_v11 = vmul.f32 0.0, %v6095_v56 }
 0x338   :  { %v1294_v15 = vpop.f32.mrb[8].mxu1 }
 0x339   :  { %1302 = vst.msk [vmem:[#allocation2 + $0xa] sm:$0x3] %vm311_vm3, %v1294_v15  ;;  %v4847_v16 = vpop.f32.mrb[9].mxu1 }
 0x33a   :  { %v1297_v17 = vpop.f32.mrb[10].mxu1 }
 0x33b   :  { %v4848_v18 = vpop.f32.mrb[11].mxu1 }
 0x340   :  { %v1959_v19 = vld [vmem:[#allocation2 + $0xa] sm:$0x3] }
 0x341   :  { %v1960_v20 = vpack.c.bf16 %v1959_v19, %v1959_v19 }
 0x342   :  { %v2165_v57 = vpop.permute.xlu0 %2164 }
 0x343   :  { %v2167_v58 = vmul.f32 %v2165_v57, %v6095_v56  ;;  %4942 = vmatmul.mubr.msk.bf16.vlgmr.msra.gmra.mrb[24].mxu1 %vm1726_vm4, %v1960_v20 }
 0x344   :  { %4954 = vmatpush3.bf16.msra.mxu1 %v5889_v59  ;;  %4957 = vmatprep.mubr.msk.bf16.mxu1 %vm5611_vm0, %v5610_v0 }
 0x345   :  { %2169 = vrot.lane.b32.xlu0 %v2167_v58, %s5606_s10  ;;  %4955 = vmatprep.subr.bf16.mxu1 %v5610_v0 }
 0x348   :  { %4956 = vmatpush3.bf16.msra.mxu1 %v5896_v60 }
 0x349   :  { %4969 = vmatprep.subr.bf16.mxu1 %v5610_v0 }
 0x364   :  { %v1688_v21 = vpop.f32.mrb[12].mxu1 }
 0x365   :  { %1696 = vst.msk [vmem:[#allocation2 + $0xe] sm:$0x3] %vm311_vm3, %v1688_v21  ;;  %v4895_v23 = vpop.f32.mrb[13].mxu1 }
 0x366   :  { %v1691_v27 = vpop.f32.mrb[14].mxu1 }
 0x367   :  { %v4896_v28 = vpop.f32.mrb[15].mxu1 }
 0x36c   :  { %v2053_v29 = vld [vmem:[#allocation2 + $0xe] sm:$0x3] }
 0x36d   :  { %v2054_v30 = vpack.c.bf16 %v2053_v29, %v2053_v29  ;;  %v1810_v59 = vpop.f32.mrb[16].mxu1 }
 0x36e   :  { %v1811_v60 = vadd.f32 %v5952_v26, %v1810_v59  ;;  %v4911_v31 = vpop.f32.mrb[17].mxu1 }
 0x36f   :  { %4958 = vmatmul.mubr.msk.bf16.vlgmr.msra.gmra.mrb[28].mxu1 %vm1726_vm4, %v2054_v30  ;;  %v1813_v32 = vpop.f32.mrb[18].mxu1 }
 0x370   :  { %4970 = vmatpush3.bf16.msra.mxu1 %v5931_v22  ;;  %4973 = vmatprep.mubr.msk.bf16.mxu1 %vm5611_vm0, %v5610_v0  ;;  %1817 = vst [vmem:[#allocation3 + $0x2] sm:$0x3] %v1811_v60  ;;  %v4912_v33 = vpop.f32.mrb[19].mxu1 }
 0x371   :  { %4971 = vmatprep.subr.bf16.mxu1 %v5610_v0 }
 0x374   :  { %4972 = vmatpush3.bf16.msra.mxu1 %v5938_v24 }
 0x375   :  { %4985 = vmatprep.subr.bf16.mxu1 %v5610_v0 }
 0x377   :  { %v2184_v52 = vld [vmem:[#allocation3 + $0x2] sm:$0x3] }
 0x394   :  { %v1904_v37 = vpop.f32.mrb[20].mxu1 }
 0x395   :  { %v1905_v38 = vadd.f32 %v5952_v26, %v1904_v37  ;;  %v4927_v39 = vpop.f32.mrb[21].mxu1 }
 0x396   :  { %v1907_v40 = vpop.f32.mrb[22].mxu1 }
 0x397   :  { %1911 = vst [vmem:[#allocation3 + $0x6] sm:$0x3] %v1905_v38  ;;  %v4928_v41 = vpop.f32.mrb[23].mxu1 }
 0x3b7   :  { %v2170_v12 = vpop.permute.xlu0 %2169 }
 0x3b8   :  { %v6116_v13 = vadd.f32 %v2170_v12, %v2162_v11  ;;  %v2260_v12 = vld [vmem:[#allocation3 + $0x4] sm:$0x3] }
 0x3ba   :  { %5369 = vtanh.f32 %v6116_v13 }
 0x3c4   :  { %v5370_v14 = vpop.eup %5369 }
 0x3c5   :  { %2175 = vrot.lane.b32.xlu1 %v5370_v14, %s5613_s15 }
 0x416   :  { %v1998_v42 = vpop.f32.mrb[24].mxu1 }
 0x417   :  { %v1999_v43 = vadd.f32 %v5952_v26, %v1998_v42  ;;  %v4943_v44 = vpop.f32.mrb[25].mxu1 }
 0x418   :  { %v2001_v45 = vpop.f32.mrb[26].mxu1 }
 0x419   :  { %2005 = vst [vmem:[#allocation3 + $0xa] sm:$0x3] %v1999_v43  ;;  %v4944_v46 = vpop.f32.mrb[27].mxu1 }
 0x437   :  { %v2176_v34 = vpop.permute.xlu1 %2175 }
 0x438   :  { %v6138_v35 = vmul.f32 %v2176_v34, %v6095_v56 }
 0x43a   :  { %v2185_v36 = vpack.c.bf16 %v6138_v35, %v6138_v35 }
 0x43c   :  { %2187 = vrot.lane.b32.xlu1 %v2185_v36, %s5606_s10  ;;  %v2336_v36 = vld [vmem:[#allocation3 + $0x6] sm:$0x3] }
 0x442   :  { %v2092_v6 = vpop.f32.mrb[28].mxu1 }
 0x443   :  { %v2093_v48 = vadd.f32 %v5952_v26, %v2092_v6  ;;  %v4959_v49 = vpop.f32.mrb[29].mxu1 }
 0x444   :  { %v2095_v50 = vpop.f32.mrb[30].mxu1 }
 0x445   :  { %2099 = vst [vmem:[#allocation3 + $0xe] sm:$0x3] %v2093_v48  ;;  %v4960_v51 = vpop.f32.mrb[31].mxu1 }
 0x4ae   :  { %v2188_v47 = vpop.permute.xlu1 %2187 }
 0x4af   :  { %4974 = vmatmul.mubr.msk.bf16.vlgmr.msra.gmra.mrb[32].mxu1 %vm1726_vm4, %v2188_v47 }
 0x4b0   :  { %4986 = vmatpush3.bf16.msra.mxu1 %v5931_v22  ;;  %4989 = vmatprep.mubr.msk.bf16.mxu1 %vm5611_vm0, %v5610_v0 }
 0x4b1   :  { %4987 = vmatprep.subr.bf16.mxu1 %v5610_v0 }
 0x4b4   :  { %4988 = vmatpush3.bf16.msra.mxu1 %v5938_v24 }
 0x4b5   :  { %5001 = vmatprep.subr.bf16.mxu1 %v5610_v0 }
 0x582   :  { %v2226_v53 = vpop.f32.mrb[32].mxu1 }
 0x583   :  { %v2232_v54 = vadd.f32 %v2226_v53, %v2184_v52  ;;  %v4975_v55 = vpop.f32.mrb[33].mxu1 }
 0x584   :  { %v2229_v56 = vpop.f32.mrb[34].mxu1 }
 0x585   :  { %5371 = vtanh.f32 %v2232_v54  ;;  %v4976_v57 = vpop.f32.mrb[35].mxu1  ;;  %v2233_v61 = vmul.f32 0.5, %v2232_v54  ;;  %v2412_v56 = vld [vmem:[#allocation3 + $0x8] sm:$0x3] }
 0x587   :  { %5373 = vtanh.f32 %v2233_v61 }
 0x58f   :  { %v5372_v58 = vpop.eup %5371 }
 0x590   :  { %2240 = vrot.lane.b32.xlu0 %v5372_v58, %s5613_s15 }
 0x591   :  { %v5374_v62 = vpop.eup %5373 }
 0x592   :  { %v2235_v63 = vmul.f32 0.5, %v5374_v62 }
 0x594   :  { %v2236_v1 = vadd.f32 0.5, %v2235_v63 }
 0x596   :  { %v2238_v3 = vmul.f32 %v2236_v1, %v6116_v13 }
 0x602   :  { %v2241_v26 = vpop.permute.xlu0 %2240 }
 0x603   :  { %v2243_v2 = vmul.f32 %v2241_v26, %v2236_v1 }
 0x605   :  { %2245 = vrot.lane.b32.xlu1 %v2243_v2, %s5606_s10 }
 0x677   :  { %v2246_v4 = vpop.permute.xlu1 %2245 }
 0x678   :  { %v2248_v5 = vadd.f32 %v2246_v4, %v2238_v3 }
 0x67a   :  { %5375 = vtanh.f32 %v2248_v5 }
 0x684   :  { %v5376_v7 = vpop.eup %5375 }
 0x685   :  { %2251 = vrot.lane.b32.xlu0 %v5376_v7, %s5613_s15 }
 0x6f7   :  { %v2252_v8 = vpop.permute.xlu0 %2251 }
 0x6f8   :  { %v6157_v9 = vmul.f32 %v2252_v8, %v2236_v1 }
 0x6fa   :  { %v2261_v10 = vpack.c.bf16 %v6157_v9, %v6157_v9 }
 0x6fc   :  { %2263 = vrot.lane.b32.xlu1 %v2261_v10, %s5606_s10 }
 0x76e   :  { %v2264_v11 = vpop.permute.xlu1 %2263 }
 0x76f   :  { %4982 = vmatmul.mubr.msk.bf16.vlgmr.msra.gmra.mrb[36].mxu0 %vm1726_vm4, %v2264_v11 }
 0x770   :  { %4994 = vmatpush3.bf16.msra.mxu0 %v5931_v22  ;;  %4997 = vmatprep.mubr.msk.bf16.mxu0 %vm5611_vm0, %v5610_v0 }
 0x771   :  { %4995 = vmatprep.subr.bf16.mxu0 %v5610_v0 }
 0x774   :  { %4996 = vmatpush3.bf16.msra.mxu0 %v5938_v24 }
 0x775   :  { %5009 = vmatprep.subr.bf16.mxu0 %v5610_v0 }
 0x842   :  { %v2302_v13 = vpop.f32.mrb[36].mxu0 }
 0x843   :  { %v2308_v14 = vadd.f32 %v2302_v13, %v2260_v12  ;;  %v4983_v15 = vpop.f32.mrb[37].mxu0 }
 0x844   :  { %v2305_v16 = vpop.f32.mrb[38].mxu0 }
 0x845   :  { %5377 = vtanh.f32 %v2308_v14  ;;  %v4984_v17 = vpop.f32.mrb[39].mxu0  ;;  %v2309_v19 = vmul.f32 0.5, %v2308_v14 }
 0x846   :  { %v2488_v17 = vld [vmem:[#allocation3 + $0xa] sm:$0x3] }
 0x847   :  { %5379 = vtanh.f32 %v2309_v19 }
 0x84f   :  { %v5378_v18 = vpop.eup %5377 }
 0x850   :  { %2316 = vrot.lane.b32.xlu0 %v5378_v18, %s5613_s15 }
 0x851   :  { %v5380_v20 = vpop.eup %5379 }
 0x852   :  { %v2311_v21 = vmul.f32 0.5, %v5380_v20 }
 0x854   :  { %v2312_v23 = vadd.f32 0.5, %v2311_v21 }
 0x856   :  { %v2314_v29 = vmul.f32 %v2312_v23, %v2248_v5 }
 0x8c2   :  { %v2317_v27 = vpop.permute.xlu0 %2316 }
 0x8c3   :  { %v2319_v28 = vmul.f32 %v2317_v27, %v2312_v23 }
 0x8c5   :  { %2321 = vrot.lane.b32.xlu1 %v2319_v28, %s5606_s10 }
 0x937   :  { %v2322_v30 = vpop.permute.xlu1 %2321 }
 0x938   :  { %v2324_v59 = vadd.f32 %v2322_v30, %v2314_v29 }
 0x93a   :  { %5381 = vtanh.f32 %v2324_v59 }
 0x944   :  { %v5382_v60 = vpop.eup %5381 }
 0x945   :  { %2327 = vrot.lane.b32.xlu0 %v5382_v60, %s5613_s15 }
 0x9b7   :  { %v2328_v31 = vpop.permute.xlu0 %2327 }
 0x9b8   :  { %v6172_v32 = vmul.f32 %v2328_v31, %v2312_v23 }
 0x9ba   :  { %v2337_v33 = vpack.c.bf16 %v6172_v32, %v6172_v32 }
 0x9bc   :  { %2339 = vrot.lane.b32.xlu1 %v2337_v33, %s5606_s10 }
 0xa2e   :  { %v2340_v34 = vpop.permute.xlu1 %2339 }
 0xa2f   :  { %4990 = vmatmul.mubr.msk.bf16.vlgmr.msra.gmra.mrb[36].mxu1 %vm1726_vm4, %v2340_v34 }
 0xa30   :  { %5002 = vmatpush3.bf16.msra.mxu1 %v5931_v22  ;;  %5005 = vmatprep.mubr.msk.bf16.mxu1 %vm5611_vm0, %v5610_v0 }
 0xa31   :  { %5003 = vmatprep.subr.bf16.mxu1 %v5610_v0 }
 0xa34   :  { %5004 = vmatpush3.bf16.msra.mxu1 %v5938_v24 }
 0xa35   :  { %5017 = vmatprep.subr.bf16.mxu1 %v5610_v0 }
 0xb02   :  { %v2378_v37 = vpop.f32.mrb[36].mxu1 }
 0xb03   :  { %v2384_v38 = vadd.f32 %v2378_v37, %v2336_v36  ;;  %v4991_v39 = vpop.f32.mrb[37].mxu1 }
 0xb04   :  { %v2381_v40 = vpop.f32.mrb[38].mxu1 }
 0xb05   :  { %5383 = vtanh.f32 %v2384_v38  ;;  %v4992_v41 = vpop.f32.mrb[39].mxu1  ;;  %v2385_v43 = vmul.f32 0.5, %v2384_v38  ;;  %v2564_v40 = vld [vmem:[#allocation3 + $0xc] sm:$0x3] }
 0xb07   :  { %5385 = vtanh.f32 %v2385_v43 }
 0xb0f   :  { %v5384_v42 = vpop.eup %5383 }
 0xb10   :  { %2392 = vrot.lane.b32.xlu0 %v5384_v42, %s5613_s15 }
 0xb11   :  { %v5386_v44 = vpop.eup %5385 }
 0xb12   :  { %v2387_v45 = vmul.f32 0.5, %v5386_v44 }
 0xb14   :  { %v2388_v46 = vadd.f32 0.5, %v2387_v45 }
 0xb16   :  { %v2390_v48 = vmul.f32 %v2388_v46, %v2324_v59 }
 0xb82   :  { %v2393_v47 = vpop.permute.xlu0 %2392 }
 0xb83   :  { %v2395_v6 = vmul.f32 %v2393_v47, %v2388_v46 }
 0xb85   :  { %2397 = vrot.lane.b32.xlu1 %v2395_v6, %s5606_s10 }
 0xbf7   :  { %v2398_v49 = vpop.permute.xlu1 %2397 }
 0xbf8   :  { %v2400_v50 = vadd.f32 %v2398_v49, %v2390_v48  ;;  %v6229_v48 = vld [vmem:[%s6582_s5 + $0x10] sm:$0xff]  }
 0xbfa   :  { %5387 = vtanh.f32 %v2400_v50 }
 0xc04   :  { %v5388_v51 = vpop.eup %5387 }
 0xc05   :  { %2403 = vrot.lane.b32.xlu0 %v5388_v51, %s5613_s15 }
 0xc77   :  { %v2404_v52 = vpop.permute.xlu0 %2403 }
 0xc78   :  { %v6187_v53 = vmul.f32 %v2404_v52, %v2388_v46 }
 0xc7a   :  { %v2413_v54 = vpack.c.bf16 %v6187_v53, %v6187_v53 }
 0xc7c   :  { %2415 = vrot.lane.b32.xlu1 %v2413_v54, %s5606_s10 }
 0xcee   :  { %v2416_v55 = vpop.permute.xlu1 %2415 }
 0xcef   :  { %4998 = vmatmul.mubr.msk.bf16.vlgmr.msra.gmra.mrb[40].mxu0 %vm1726_vm4, %v2416_v55 }
 0xcf0   :  { %5010 = vmatpush3.bf16.msra.mxu0 %v5931_v22  ;;  %5013 = vmatprep.mubr.msk.bf16.mxu0 %vm5611_vm0, %v5610_v0 }
 0xcf1   :  { %5011 = vmatprep.subr.bf16.mxu0 %v5610_v0 }
 0xcf4   :  { %5012 = vmatpush3.bf16.msra.mxu0 %v5938_v24 }
 0xcf5   :  { %5025 = vmatprep.subr.bf16.mxu0 %v5610_v0 }
 0xdc2   :  { %v2454_v57 = vpop.f32.mrb[40].mxu0 }
 0xdc3   :  { %v2460_v58 = vadd.f32 %v2454_v57, %v2412_v56  ;;  %v4999_v61 = vpop.f32.mrb[41].mxu0 }
 0xdc4   :  { %v2457_v62 = vpop.f32.mrb[42].mxu0 }
 0xdc5   :  { %5389 = vtanh.f32 %v2460_v58  ;;  %v5000_v63 = vpop.f32.mrb[43].mxu0  ;;  %v2461_v26 = vmul.f32 0.5, %v2460_v58 }
 0xdc7   :  { %5391 = vtanh.f32 %v2461_v26 }
 0xdcf   :  { %v5390_v1 = vpop.eup %5389 }
 0xdd0   :  { %2468 = vrot.lane.b32.xlu0 %v5390_v1, %s5613_s15 }
 0xdd1   :  { %v5392_v2 = vpop.eup %5391 }
 0xdd2   :  { %v2463_v3 = vmul.f32 0.5, %v5392_v2 }
 0xdd4   :  { %v2464_v4 = vadd.f32 0.5, %v2463_v3 }
 0xdd6   :  { %v2466_v8 = vmul.f32 %v2464_v4, %v2400_v50  ;;  %v6236_v50 = vld [vmem:[%s6582_s5 + $0x18] sm:$0xff]  }
 0xe42   :  { %v2469_v5 = vpop.permute.xlu0 %2468 }
 0xe43   :  { %v2471_v7 = vmul.f32 %v2469_v5, %v2464_v4 }
 0xe45   :  { %2473 = vrot.lane.b32.xlu1 %v2471_v7, %s5606_s10 }
 0xeb7   :  { %v2474_v10 = vpop.permute.xlu1 %2473 }
 0xeb8   :  { %v2476_v11 = vadd.f32 %v2474_v10, %v2466_v8  ;;  %v6277_v8 = vld [vmem:[#allocation6 + $0x1] ss:$0 sm:$0xff] }
 0xeba   :  { %5393 = vtanh.f32 %v2476_v11 }
 0xec4   :  { %v5394_v12 = vpop.eup %5393 }
 0xec5   :  { %2479 = vrot.lane.b32.xlu0 %v5394_v12, %s5613_s15 }
 0xf37   :  { %v2480_v13 = vpop.permute.xlu0 %2479 }
 0xf38   :  { %v6202_v14 = vmul.f32 %v2480_v13, %v2464_v4 }
 0xf3a   :  { %v2489_v15 = vpack.c.bf16 %v6202_v14, %v6202_v14 }
 0xf3c   :  { %2491 = vrot.lane.b32.xlu1 %v2489_v15, %s5606_s10 }
 0xfae   :  { %v2492_v16 = vpop.permute.xlu1 %2491 }
 0xfaf   :  { %5006 = vmatmul.mubr.msk.bf16.vlgmr.msra.gmra.mrb[40].mxu1 %vm1726_vm4, %v2492_v16 }
 0xfb0   :  { %5018 = vmatpush3.bf16.msra.mxu1 %v5931_v22  ;;  %5021 = vmatprep.mubr.msk.bf16.mxu1 %vm5611_vm0, %v5610_v0 }
 0xfb1   :  { %5019 = vmatprep.subr.bf16.mxu1 %v5610_v0 }
 0xfb4   :  { %5020 = vmatpush3.bf16.msra.mxu1 %v5938_v24 }
 0xfb5   :  { %5033 = vmatprep.subr.bf16.mxu1 %v5610_v0 }
0x1082   :  { %v2530_v18 = vpop.f32.mrb[40].mxu1 }
0x1083   :  { %v2536_v19 = vadd.f32 %v2530_v18, %v2488_v17  ;;  %v5007_v20 = vpop.f32.mrb[41].mxu1  ;;  %v6289_v18 = vld [vmem:[%s6583_s6 + $0x10] sm:$0xff]  }
0x1084   :  { %v2533_v21 = vpop.f32.mrb[42].mxu1  ;;  %v6298_v20 = vld [vmem:[%s6583_s6 + $0x18] sm:$0xff]  }
0x1085   :  { %5395 = vtanh.f32 %v2536_v19  ;;  %v5008_v23 = vpop.f32.mrb[43].mxu1  ;;  %v2537_v22 = vmul.f32 0.5, %v2536_v19 }
0x1087   :  { %5397 = vtanh.f32 %v2537_v22 }
0x108f   :  { %v5396_v27 = vpop.eup %5395 }
0x1090   :  { %2544 = vrot.lane.b32.xlu0 %v5396_v27, %s5613_s15 }
0x1091   :  { %v5398_v28 = vpop.eup %5397 }
0x1092   :  { %v2539_v29 = vmul.f32 0.5, %v5398_v28 }
0x1094   :  { %v2540_v30 = vadd.f32 0.5, %v2539_v29 }
0x1096   :  { %v2542_v24 = vmul.f32 %v2540_v30, %v2476_v11 }
0x1102   :  { %v2545_v59 = vpop.permute.xlu0 %2544 }
0x1103   :  { %v2547_v60 = vmul.f32 %v2545_v59, %v2540_v30 }
0x1105   :  { %2549 = vrot.lane.b32.xlu1 %v2547_v60, %s5606_s10 }
0x1177   :  { %v2550_v31 = vpop.permute.xlu1 %2549 }
0x1178   :  { %v2552_v33 = vadd.f32 %v2550_v31, %v2542_v24  ;;  %v2640_v24 = vld [vmem:[#allocation3 + $0xe] sm:$0x3] }
0x117a   :  { %5399 = vtanh.f32 %v2552_v33 }
0x1184   :  { %v5400_v34 = vpop.eup %5399 }
0x1185   :  { %2555 = vrot.lane.b32.xlu0 %v5400_v34, %s5613_s15 }
0x11f7   :  { %v2556_v36 = vpop.permute.xlu0 %2555 }
0x11f8   :  { %v6217_v37 = vmul.f32 %v2556_v36, %v2540_v30 }
0x11fa   :  { %v2565_v38 = vpack.c.bf16 %v6217_v37, %v6217_v37 }
0x11fc   :  { %2567 = vrot.lane.b32.xlu1 %v2565_v38, %s5606_s10 }
0x126e   :  { %v2568_v39 = vpop.permute.xlu1 %2567 }
0x126f   :  { %5014 = vmatmul.mubr.msk.bf16.vlgmr.msra.gmra.mrb[44].mxu0 %vm1726_vm4, %v2568_v39 }
0x1270   :  { %5029 = vmatprep.mubr.msk.bf16.mxu0 %vm5611_vm0, %v5610_v0  ;;  %5026 = vmatpush3.bf16.msra.mxu0 %v6229_v48 }
0x1271   :  { %5027 = vmatprep.subr.bf16.mxu0 %v5610_v0 }
0x1274   :  { %5028 = vmatpush3.bf16.msra.mxu0 %v6236_v50 }
0x1275   :  { %5041 = vmatprep.subr.bf16.mxu0 %v5610_v0 }
0x1342   :  { %v2606_v41 = vpop.f32.mrb[44].mxu0 }
0x1343   :  { %v2612_v42 = vadd.f32 %v2606_v41, %v2564_v40  ;;  %v5015_v43 = vpop.f32.mrb[45].mxu0 }
0x1344   :  { %v2609_v44 = vpop.f32.mrb[46].mxu0 }
0x1345   :  { %5401 = vtanh.f32 %v2612_v42  ;;  %v5016_v45 = vpop.f32.mrb[47].mxu0  ;;  %v2613_v47 = vmul.f32 0.5, %v2612_v42 }
0x1347   :  { %5403 = vtanh.f32 %v2613_v47 }
0x134f   :  { %v5402_v46 = vpop.eup %5401 }
0x1350   :  { %2620 = vrot.lane.b32.xlu0 %v5402_v46, %s5613_s15 }
0x1351   :  { %v5404_v6 = vpop.eup %5403 }
0x1352   :  { %v2615_v49 = vmul.f32 0.5, %v5404_v6 }
0x1354   :  { %v2616_v51 = vadd.f32 0.5, %v2615_v49 }
0x1356   :  { %v2618_v55 = vmul.f32 %v2616_v51, %v2552_v33 }
0x13c2   :  { %v2621_v52 = vpop.permute.xlu0 %2620 }
0x13c3   :  { %v2623_v54 = vmul.f32 %v2621_v52, %v2616_v51 }
0x13c5   :  { %2625 = vrot.lane.b32.xlu1 %v2623_v54, %s5606_s10 }
0x13c9   :  { %2180 = vrot.lane.b32.xlu1 %v6138_v35, %s5606_s10 }
0x13cd   :  { %2484 = vrot.lane.b32.xlu1 %v6202_v14, %s5606_s10 }
0x1437   :  { %v2626_v56 = vpop.permute.xlu1 %2625 }
0x1438   :  { %v6245_v57 = vadd.f32 %v2626_v56, %v2618_v55 }
0x143a   :  { %5405 = vtanh.f32 %v6245_v57 }
0x143b   :  { %v2181_v58 = vpop.permute.xlu1 %2180 }
0x143c   :  { %2183 = vst.msk [vmem:[#allocation2] sm:$0x3] %vm311_vm3, %v2181_v58 }
0x143f   :  { %v2485_v61 = vpop.permute.xlu1 %2484 }
0x1440   :  { %2487 = vst.msk [vmem:[#allocation2 + $0x8] sm:$0x3] %vm311_vm3, %v2485_v61 }
0x1443   :  { %v2728_v62 = vld [vmem:[#allocation2] sm:$0x3] }
0x1444   :  { %v5406_v63 = vpop.eup %5405  ;;  %v2729_v1 = vpack.c.bf16 %v2728_v62, %v2728_v62 }
0x1445   :  { %2631 = vrot.lane.b32.xlu0 %v5406_v63, %s5613_s15 }
0x1446   :  { %5030 = vmatmul.mubr.msk.bf16.vlgmr.msra.gmra.mrb[48].mxu0 %vm1726_vm4, %v2729_v1 }
0x1447   :  { %5042 = vmatpush3.bf16.msra.mxu0 %v6229_v48  ;;  %5045 = vmatprep.mubr.msk.bf16.mxu0 %vm5611_vm0, %v5610_v0 }
0x1448   :  { %5043 = vmatprep.subr.bf16.mxu0 %v5610_v0 }
0x1449   :  { %2332 = vrot.lane.b32.xlu0 %v6172_v32, %s5606_s10  ;;  %v2930_v32 = vld [vmem:[#allocation2 + $0x8] sm:$0x3] }
0x144a   :  { %v2931_v7 = vpack.c.bf16 %v2930_v32, %v2930_v32 }
0x144b   :  { %5044 = vmatpush3.bf16.msra.mxu0 %v6236_v50 }
0x144c   :  { %5057 = vmatprep.subr.bf16.mxu0 %v5610_v0 }
0x14b7   :  { %v2632_v35 = vpop.permute.xlu0 %2631 }
0x14b8   :  { %v2634_v26 = vmul.f32 %v2632_v35, %v2616_v51 }
0x14ba   :  { %2636 = vrot.lane.b32.xlu0 %v2634_v26, %s5606_s10  ;;  %v2641_v2 = vpack.c.bf16 %v2634_v26, %v2634_v26 }
0x14bb   :  { %v2333_v3 = vpop.permute.xlu0 %2332 }
0x14bc   :  { %2335 = vst.msk [vmem:[#allocation2 + $0x4] sm:$0x3] %vm311_vm3, %v2333_v3  ;;  %2643 = vrot.lane.b32.xlu1 %v2641_v2, %s5606_s10 }
0x14c3   :  { %v2838_v4 = vld [vmem:[#allocation2 + $0x4] sm:$0x3] }
0x14c4   :  { %v2839_v5 = vpack.c.bf16 %v2838_v4, %v2838_v4 }
0x14c6   :  { %5046 = vmatmul.mubr.msk.bf16.vlgmr.msra.gmra.mrb[52].mxu0 %vm1726_vm4, %v2839_v5 }
0x14c7   :  { %5058 = vmatpush3.bf16.msra.mxu0 %v6229_v48  ;;  %5061 = vmatprep.mubr.msk.bf16.mxu0 %vm5611_vm0, %v5610_v0 }
0x14c8   :  { %5059 = vmatprep.subr.bf16.mxu0 %v5610_v0 }
0x14cb   :  { %5060 = vmatpush3.bf16.msra.mxu0 %v6236_v50 }
0x14cc   :  { %5073 = vmatprep.subr.bf16.mxu0 %v5610_v0 }
0x14ce   :  { %5062 = vmatmul.mubr.msk.bf16.vlgmr.msra.gmra.mrb[56].mxu0 %vm1726_vm4, %v2931_v7 }
0x14cf   :  { %5074 = vmatpush3.bf16.msra.mxu0 %v6229_v48  ;;  %5077 = vmatprep.mubr.msk.bf16.mxu0 %vm5611_vm0, %v5610_v0 }
0x14d0   :  { %5075 = vmatprep.subr.bf16.mxu0 %v5610_v0 }
0x14d3   :  { %5076 = vmatpush3.bf16.msra.mxu0 %v6236_v50 }
0x14d4   :  { %5089 = vmatprep.subr.bf16.mxu0 %v5610_v0 }
0x1519   :  { %v2785_v10 = vpop.f32.mrb[48].mxu0 }
0x151a   :  { %v2786_v11 = vadd.f32 %v6277_v8, %v2785_v10  ;;  %v5031_v12 = vpop.f32.mrb[49].mxu0 }
0x151b   :  { %v2788_v13 = vpop.f32.mrb[50].mxu0 }
0x151c   :  { %2791 = vst [vmem:[#allocation3] sm:$0x3] %v2786_v11  ;;  %v5032_v14 = vpop.f32.mrb[51].mxu0 }
0x1523   :  { %v3114_v45 = vld [vmem:[#allocation3] sm:$0x3] }
0x152c   :  { %v2637_v15 = vpop.permute.xlu0 %2636 }
0x152d   :  { %2639 = vst.msk [vmem:[#allocation2 + $0xc] sm:$0x3] %vm311_vm3, %v2637_v15 }
0x152e   :  { %v2644_v16 = vpop.permute.xlu1 %2643 }
0x152f   :  { %5022 = vmatmul.mubr.msk.bf16.vlgmr.msra.gmra.mrb[44].mxu1 %vm1726_vm4, %v2644_v16 }
0x1530   :  { %5034 = vmatpush3.bf16.msra.mxu1 %v6229_v48  ;;  %5037 = vmatprep.mubr.msk.bf16.mxu1 %vm5611_vm0, %v5610_v0 }
0x1531   :  { %5035 = vmatprep.subr.bf16.mxu1 %v5610_v0 }
0x1534   :  { %v3022_v17 = vld [vmem:[#allocation2 + $0xc] sm:$0x3]  ;;  %5036 = vmatpush3.bf16.msra.mxu1 %v6236_v50 }
0x1535   :  { %v3023_v19 = vpack.c.bf16 %v3022_v17, %v3022_v17  ;;  %5049 = vmatprep.subr.bf16.mxu1 %v5610_v0 }
0x1537   :  { %5078 = vmatmul.mubr.msk.bf16.vlgmr.msra.gmra.mrb[60].mxu0 %vm1726_vm4, %v3023_v19 }
0x1538   :  { %5090 = vmatpush3.bf16.msra.mxu0 %v6289_v18  ;;  %5093 = vmatprep.mubr.msk.bf16.mxu0 %vm5611_vm0, %v5610_v0 }
0x1539   :  { %5091 = vmatprep.subr.bf16.mxu0 %v5610_v0 }
0x153c   :  { %5092 = vmatpush3.bf16.msra.mxu0 %v6298_v20 }
0x153d   :  { %5105 = vmatprep.subr.bf16.mxu0 %v5610_v0 }
0x153f   :  { %5094 = vmatmul.mubr.bf16.vlgmr.msra.gmra.mrb[64].mxu0 %v5612_v25 }
0x1540   :  { %5106 = vmatpush3.bf16.msra.mxu0 %v6289_v18  ;;  %5109 = vmatprep.mubr.msk.bf16.mxu0 %vm5611_vm0, %v5610_v0 }
0x1541   :  { %5107 = vmatprep.subr.bf16.mxu0 %v5610_v0 }
0x1544   :  { %5108 = vmatpush3.bf16.msra.mxu0 %v6298_v20 }
0x1545   :  { %5121 = vmatprep.subr.bf16.mxu0 %v5610_v0 }
0x1599   :  { %v2877_v21 = vpop.f32.mrb[52].mxu0 }
0x159a   :  { %v2878_v23 = vadd.f32 %v6277_v8, %v2877_v21  ;;  %v5047_v27 = vpop.f32.mrb[53].mxu0 }
0x159b   :  { %v2880_v22 = vpop.f32.mrb[54].mxu0 }
0x159c   :  { %2883 = vst [vmem:[#allocation3 + $0x4] sm:$0x3] %v2878_v23  ;;  %v5048_v28 = vpop.f32.mrb[55].mxu0 }
0x15a1   :  { %v2969_v29 = vpop.f32.mrb[56].mxu0 }
0x15a2   :  { %v2970_v25 = vadd.f32 %v6277_v8, %v2969_v29  ;;  %v5063_v30 = vpop.f32.mrb[57].mxu0 }
0x15a3   :  { %v2972_v59 = vpop.f32.mrb[58].mxu0 }
0x15a4   :  { %2975 = vst [vmem:[#allocation3 + $0x8] sm:$0x3] %v2970_v25  ;;  %v5064_v60 = vpop.f32.mrb[59].mxu0 }
0x1602   :  { %v2682_v31 = vpop.f32.mrb[44].mxu1 }
0x1603   :  { %v2688_v33 = vadd.f32 %v2682_v31, %v2640_v24  ;;  %v5023_v34 = vpop.f32.mrb[45].mxu1 }
0x1604   :  { %v2685_v36 = vpop.f32.mrb[46].mxu1 }
0x1605   :  { %5407 = vtanh.f32 %v2688_v33  ;;  %v5024_v38 = vpop.f32.mrb[47].mxu1  ;;  %v2689_v54 = vmul.f32 0.5, %v2688_v33 }
0x160a   :  { %v3061_v39 = vpop.f32.mrb[60].mxu0 }
0x160b   :  { %v3062_v40 = vadd.f32 %v6277_v8, %v3061_v39  ;;  %v5079_v41 = vpop.f32.mrb[61].mxu0 }
0x160c   :  { %v3064_v42 = vpop.f32.mrb[62].mxu0 }
0x160d   :  { %3067 = vst [vmem:[#allocation3 + $0xc] sm:$0x3] %v3062_v40  ;;  %v5080_v43 = vpop.f32.mrb[63].mxu0 }
0x160f   :  { %v5408_v44 = vpop.eup %5407 }
0x1610   :  { %2696 = vrot.lane.b32.xlu0 %v5408_v44, %s5613_s15 }
0x1612   :  { %v3161_v46 = vpop.f32.mrb[64].mxu0 }
0x1613   :  { %v3167_v47 = vadd.f32 %v3161_v46, %v3114_v45  ;;  %v5095_v6 = vpop.f32.mrb[65].mxu0 }
0x1614   :  { %v3164_v49 = vpop.f32.mrb[66].mxu0 }
0x1615   :  { %5409 = vtanh.f32 %v3167_v47  ;;  %v5096_v51 = vpop.f32.mrb[67].mxu0  ;;  %v3168_v56 = vmul.f32 0.5, %v3167_v47 }
0x1616   :  { %5411 = vtanh.f32 %v2689_v54 }
0x1617   :  { %5413 = vtanh.f32 %v3168_v56 }
0x161f   :  { %v5410_v52 = vpop.eup %5409 }
0x1620   :  { %3175 = vrot.lane.b32.xlu1 %v5410_v52, %s5613_s15  ;;  %v5412_v55 = vpop.eup %5411 }
0x1621   :  { %v2691_v58 = vmul.f32 0.5, %v5412_v55  ;;  %v5414_v1 = vpop.eup %5413 }
0x1622   :  { %v3170_v35 = vmul.f32 0.5, %v5414_v1 }
0x1623   :  { %v2692_v61 = vadd.f32 0.5, %v2691_v58 }
0x1624   :  { %v3171_v26 = vadd.f32 0.5, %v3170_v35 }
0x1625   :  { %v2694_v4 = vmul.f32 %v2692_v61, %v6245_v57 }
0x1626   :  { %v3173_v10 = vmul.f32 0.0, %v3171_v26 }
0x1682   :  { %v2697_v62 = vpop.permute.xlu0 %2696 }
0x1683   :  { %v2699_v63 = vmul.f32 %v2697_v62, %v2692_v61 }
0x1685   :  { %2701 = vrot.lane.b32.xlu0 %v2699_v63, %s5606_s10 }
0x1692   :  { %v3176_v2 = vpop.permute.xlu1 %3175 }
0x1693   :  { %v3178_v3 = vmul.f32 %v3176_v2, %v3171_v26 }
0x1695   :  { %3180 = vrot.lane.b32.xlu1 %v3178_v3, %s5606_s10 }
0x16f7   :  { %v2702_v5 = vpop.permute.xlu0 %2701 }
0x16f8   :  { %v2704_v32 = vadd.f32 %v2702_v5, %v2694_v4 }
0x16fa   :  { %5415 = vtanh.f32 %v2704_v32 }
0x1704   :  { %v5416_v7 = vpop.eup %5415 }
0x1705   :  { %2707 = vrot.lane.b32.xlu0 %v5416_v7, %s5613_s15 }
0x1707   :  { %v3181_v11 = vpop.permute.xlu1 %3180 }
0x1708   :  { %v6321_v12 = vadd.f32 %v3181_v11, %v3173_v10 }
0x1709   :  { %2256 = vrot.lane.b32.xlu0 %v6157_v9, %s5606_s10 }
0x170a   :  { %5417 = vtanh.f32 %v6321_v12 }
0x170d   :  { %2560 = vrot.lane.b32.xlu0 %v6217_v37, %s5606_s10 }
0x1714   :  { %v5418_v13 = vpop.eup %5417 }
0x1715   :  { %3186 = vrot.lane.b32.xlu1 %v5418_v13, %s5613_s15 }
0x1719   :  { %2408 = vrot.lane.b32.xlu1 %v6187_v53, %s5606_s10 }
0x1777   :  { %v2708_v57 = vpop.permute.xlu0 %2707 }
0x1778   :  { %v2710_v14 = vmul.f32 %v2708_v57, %v2692_v61 }
0x177a   :  { %2712 = vrot.lane.b32.xlu1 %v2710_v14, %s5606_s10 }
0x177b   :  { %v2257_v15 = vpop.permute.xlu0 %2256 }
0x177c   :  { %2259 = vst.msk [vmem:[#allocation2 + $0x2] sm:$0x3] %vm311_vm3, %v2257_v15 }
0x177f   :  { %v2561_v16 = vpop.permute.xlu0 %2560 }
0x1780   :  { %2563 = vst.msk [vmem:[#allocation2 + $0xa] sm:$0x3] %vm311_vm3, %v2561_v16 }
0x1783   :  { %v2792_v9 = vld [vmem:[#allocation2 + $0x2] sm:$0x3] }
0x1784   :  { %v2793_v17 = vpack.c.bf16 %v2792_v9, %v2792_v9 }
0x1786   :  { %5038 = vmatmul.mubr.msk.bf16.vlgmr.msra.gmra.mrb[48].mxu1 %vm1726_vm4, %v2793_v17 }
0x1787   :  { %v3187_v37 = vpop.permute.xlu1 %3186  ;;  %5050 = vmatpush3.bf16.msra.mxu1 %v6229_v48  ;;  %5053 = vmatprep.mubr.msk.bf16.mxu1 %vm5611_vm0, %v5610_v0  ;;  %v2976_v22 = vld [vmem:[#allocation2 + $0xa] sm:$0x3] }
0x1788   :  { %v3189_v53 = vmul.f32 %v3187_v37, %v3171_v26  ;;  %5051 = vmatprep.subr.bf16.mxu1 %v5610_v0  ;;  %v2977_v28 = vpack.c.bf16 %v2976_v22, %v2976_v22 }
0x178a   :  { %v3191_v19 = vpack.c.bf16 %v3189_v53, %v3189_v53 }
0x178b   :  { %v2409_v21 = vpop.permute.xlu1 %2408  ;;  %5052 = vmatpush3.bf16.msra.mxu1 %v6236_v50 }
0x178c   :  { %2411 = vst.msk [vmem:[#allocation2 + $0x6] sm:$0x3] %vm311_vm3, %v2409_v21  ;;  %3193 = vrot.lane.b32.xlu0 %v3191_v19, %s5606_s10  ;;  %5065 = vmatprep.subr.bf16.mxu1 %v5610_v0 }
0x1793   :  { %v2884_v23 = vld [vmem:[#allocation2 + $0x6] sm:$0x3] }
0x1794   :  { %v2885_v27 = vpack.c.bf16 %v2884_v23, %v2884_v23 }
0x1796   :  { %5054 = vmatmul.mubr.msk.bf16.vlgmr.msra.gmra.mrb[52].mxu1 %vm1726_vm4, %v2885_v27 }
0x1797   :  { %5066 = vmatpush3.bf16.msra.mxu1 %v6229_v48  ;;  %5069 = vmatprep.mubr.msk.bf16.mxu1 %vm5611_vm0, %v5610_v0 }
0x1798   :  { %5067 = vmatprep.subr.bf16.mxu1 %v5610_v0 }
0x179b   :  { %5068 = vmatpush3.bf16.msra.mxu1 %v6236_v50 }
0x179c   :  { %5081 = vmatprep.subr.bf16.mxu1 %v5610_v0 }
0x179e   :  { %5070 = vmatmul.mubr.msk.bf16.vlgmr.msra.gmra.mrb[56].mxu1 %vm1726_vm4, %v2977_v28 }
0x179f   :  { %5082 = vmatpush3.bf16.msra.mxu1 %v6229_v48  ;;  %5085 = vmatprep.mubr.msk.bf16.mxu1 %vm5611_vm0, %v5610_v0 }
0x17a0   :  { %5083 = vmatprep.subr.bf16.mxu1 %v5610_v0 }
0x17a3   :  { %5084 = vmatpush3.bf16.msra.mxu1 %v6236_v50 }
0x17a4   :  { %5097 = vmatprep.subr.bf16.mxu1 %v5610_v0 }
0x17ec   :  { %v2713_v29 = vpop.permute.xlu1 %2712 }
0x17ed   :  { %2715 = vst.msk [vmem:[#allocation2 + $0xe] sm:$0x3] %vm311_vm3, %v2713_v29 }
0x17f4   :  { %v3068_v25 = vld [vmem:[#allocation2 + $0xe] sm:$0x3] }
0x17f5   :  { %v3069_v30 = vpack.c.bf16 %v3068_v25, %v3068_v25 }
0x17f7   :  { %5086 = vmatmul.mubr.msk.bf16.vlgmr.msra.gmra.mrb[60].mxu1 %vm1726_vm4, %v3069_v30 }
0x17f8   :  { %5098 = vmatpush3.bf16.msra.mxu1 %v6289_v18  ;;  %5101 = vmatprep.mubr.msk.bf16.mxu1 %vm5611_vm0, %v5610_v0 }
0x17f9   :  { %5099 = vmatprep.subr.bf16.mxu1 %v5610_v0 }
0x17fc   :  { %5100 = vmatpush3.bf16.msra.mxu1 %v6298_v20 }
0x17fd   :  { %5113 = vmatprep.subr.bf16.mxu1 %v5610_v0 }
0x17fe   :  { %v3194_v48 = vpop.permute.xlu0 %3193 }
0x17ff   :  { %5102 = vmatmul.mubr.msk.bf16.vlgmr.msra.gmra.mrb[64].mxu1 %vm1726_vm4, %v3194_v48 }
0x1800   :  { %5114 = vmatpush3.bf16.msra.mxu1 %v6289_v18  ;;  %5117 = vmatprep.mubr.msk.bf16.mxu1 %vm5611_vm0, %v5610_v0 }
0x1801   :  { %5115 = vmatprep.subr.bf16.mxu1 %v5610_v0 }
0x1804   :  { %5116 = vmatpush3.bf16.msra.mxu1 %v6298_v20 }
0x1805   :  { %5129 = vmatprep.subr.bf16.mxu1 %v5610_v0 }
0x1859   :  { %v2831_v50 = vpop.f32.mrb[48].mxu1 }
0x185a   :  { %v2832_v59 = vadd.f32 %v6277_v8, %v2831_v50  ;;  %v5039_v60 = vpop.f32.mrb[49].mxu1 }
0x185b   :  { %v2834_v24 = vpop.f32.mrb[50].mxu1 }
0x185c   :  { %2837 = vst [vmem:[#allocation3 + $0x2] sm:$0x3] %v2832_v59  ;;  %v5040_v31 = vpop.f32.mrb[51].mxu1 }
0x1863   :  { %v3190_v51 = vld [vmem:[#allocation3 + $0x2] sm:$0x3] }
0x1869   :  { %v2923_v33 = vpop.f32.mrb[52].mxu1 }
0x186a   :  { %v2924_v34 = vadd.f32 %v6277_v8, %v2923_v33  ;;  %v5055_v36 = vpop.f32.mrb[53].mxu1 }
0x186b   :  { %v2926_v38 = vpop.f32.mrb[54].mxu1 }
0x186c   :  { %2929 = vst [vmem:[#allocation3 + $0x6] sm:$0x3] %v2924_v34  ;;  %v5056_v39 = vpop.f32.mrb[55].mxu1 }
0x1871   :  { %v3015_v40 = vpop.f32.mrb[56].mxu1 }
0x1872   :  { %v3016_v41 = vadd.f32 %v6277_v8, %v3015_v40  ;;  %v5071_v42 = vpop.f32.mrb[57].mxu1 }
0x1873   :  { %v3018_v43 = vpop.f32.mrb[58].mxu1  ;;  %v3332_v59 = vld [vmem:[#allocation3 + $0x6] sm:$0x3] }
0x1874   :  { %3021 = vst [vmem:[#allocation3 + $0xa] sm:$0x3] %v3016_v41  ;;  %v5072_v44 = vpop.f32.mrb[59].mxu1 }
0x18ca   :  { %v3107_v45 = vpop.f32.mrb[60].mxu1 }
0x18cb   :  { %v3108_v46 = vadd.f32 %v6277_v8, %v3107_v45  ;;  %v5087_v47 = vpop.f32.mrb[61].mxu1 }
0x18cc   :  { %v3110_v6 = vpop.f32.mrb[62].mxu1 }
0x18cd   :  { %3113 = vst [vmem:[#allocation3 + $0xe] sm:$0x3] %v3108_v46  ;;  %v5088_v49 = vpop.f32.mrb[63].mxu1 }
0x18d2   :  { %v3232_v52 = vpop.f32.mrb[64].mxu1 }
0x18d3   :  { %v3238_v54 = vadd.f32 %v3232_v52, %v3190_v51  ;;  %v5103_v55 = vpop.f32.mrb[65].mxu1 }
0x18d4   :  { %v3235_v56 = vpop.f32.mrb[66].mxu1 }
0x18d5   :  { %5419 = vtanh.f32 %v3238_v54  ;;  %v5104_v58 = vpop.f32.mrb[67].mxu1  ;;  %v3239_v62 = vmul.f32 0.5, %v3238_v54  ;;  %v3403_v54 = vld [vmem:[#allocation3 + $0x8] sm:$0x3] }
0x18d7   :  { %5421 = vtanh.f32 %v3239_v62 }
0x18df   :  { %v5420_v61 = vpop.eup %5419 }
0x18e0   :  { %3246 = vrot.lane.b32.xlu1 %v5420_v61, %s5613_s15 }
0x18e1   :  { %v5422_v63 = vpop.eup %5421 }
0x18e2   :  { %v3241_v1 = vmul.f32 0.5, %v5422_v63 }
0x18e4   :  { %v3242_v35 = vadd.f32 0.5, %v3241_v1 }
0x18e6   :  { %v3244_v2 = vmul.f32 %v3242_v35, %v6321_v12  ;;  %v3261_v12 = vld [vmem:[#allocation3 + $0x4] sm:$0x3] }
0x1952   :  { %v3247_v8 = vpop.permute.xlu1 %3246 }
0x1953   :  { %v3249_v26 = vmul.f32 %v3247_v8, %v3242_v35 }
0x1955   :  { %3251 = vrot.lane.b32.xlu0 %v3249_v26, %s5606_s10 }
0x19c7   :  { %v3252_v3 = vpop.permute.xlu0 %3251 }
0x19c8   :  { %v3254_v4 = vadd.f32 %v3252_v3, %v3244_v2 }
0x19ca   :  { %5423 = vtanh.f32 %v3254_v4 }
0x19d4   :  { %v5424_v5 = vpop.eup %5423 }
0x19d5   :  { %3257 = vrot.lane.b32.xlu1 %v5424_v5, %s5613_s15 }
0x1a47   :  { %v3258_v32 = vpop.permute.xlu1 %3257 }
0x1a48   :  { %v3260_v7 = vmul.f32 %v3258_v32, %v3242_v35 }
0x1a4a   :  { %v3262_v10 = vpack.c.bf16 %v3260_v7, %v3260_v7 }
0x1a4c   :  { %3264 = vrot.lane.b32.xlu0 %v3262_v10, %s5606_s10 }
0x1abe   :  { %v3265_v11 = vpop.permute.xlu0 %3264 }
0x1abf   :  { %5110 = vmatmul.mubr.msk.bf16.vlgmr.msra.gmra.mrb[68].mxu0 %vm1726_vm4, %v3265_v11 }
0x1ac0   :  { %5122 = vmatpush3.bf16.msra.mxu0 %v6289_v18  ;;  %5125 = vmatprep.mubr.msk.bf16.mxu0 %vm5611_vm0, %v5610_v0 }
0x1ac1   :  { %5123 = vmatprep.subr.bf16.mxu0 %v5610_v0 }
0x1ac4   :  { %5124 = vmatpush3.bf16.msra.mxu0 %v6298_v20 }
0x1ac5   :  { %5137 = vmatprep.subr.bf16.mxu0 %v5610_v0 }
0x1b92   :  { %v3303_v13 = vpop.f32.mrb[68].mxu0 }
0x1b93   :  { %v3309_v57 = vadd.f32 %v3303_v13, %v3261_v12  ;;  %v5111_v14 = vpop.f32.mrb[69].mxu0 }
0x1b94   :  { %v3306_v15 = vpop.f32.mrb[70].mxu0 }
0x1b95   :  { %5425 = vtanh.f32 %v3309_v57  ;;  %v5112_v16 = vpop.f32.mrb[71].mxu0  ;;  %v3310_v17 = vmul.f32 0.5, %v3309_v57  ;;  %v3474_v57 = vld [vmem:[#allocation3 + $0xa] sm:$0x3] }
0x1b97   :  { %5427 = vtanh.f32 %v3310_v17 }
0x1b9f   :  { %v5426_v9 = vpop.eup %5425 }
0x1ba0   :  { %3317 = vrot.lane.b32.xlu1 %v5426_v9, %s5613_s15 }
0x1ba1   :  { %v5428_v37 = vpop.eup %5427 }
0x1ba2   :  { %v3312_v53 = vmul.f32 0.5, %v5428_v37 }
0x1ba4   :  { %v3313_v19 = vadd.f32 0.5, %v3312_v53 }
0x1ba6   :  { %v3315_v27 = vmul.f32 %v3313_v19, %v3254_v4 }
0x1c12   :  { %v3318_v21 = vpop.permute.xlu1 %3317 }
0x1c13   :  { %v3320_v23 = vmul.f32 %v3318_v21, %v3313_v19 }
0x1c15   :  { %3322 = vrot.lane.b32.xlu0 %v3320_v23, %s5606_s10 }
0x1c87   :  { %v3323_v22 = vpop.permute.xlu0 %3322 }
0x1c88   :  { %v3325_v28 = vadd.f32 %v3323_v22, %v3315_v27 }
0x1c8a   :  { %5429 = vtanh.f32 %v3325_v28 }
0x1c94   :  { %v5430_v29 = vpop.eup %5429 }
0x1c95   :  { %3328 = vrot.lane.b32.xlu1 %v5430_v29, %s5613_s15 }
0x1d07   :  { %v3329_v25 = vpop.permute.xlu1 %3328 }
0x1d08   :  { %v3331_v30 = vmul.f32 %v3329_v25, %v3313_v19 }
0x1d0a   :  { %v3333_v48 = vpack.c.bf16 %v3331_v30, %v3331_v30 }
0x1d0c   :  { %3335 = vrot.lane.b32.xlu0 %v3333_v48, %s5606_s10 }
0x1d7e   :  { %v3336_v50 = vpop.permute.xlu0 %3335 }
0x1d7f   :  { %5118 = vmatmul.mubr.msk.bf16.vlgmr.msra.gmra.mrb[68].mxu1 %vm1726_vm4, %v3336_v50 }
0x1d80   :  { %5130 = vmatpush3.bf16.msra.mxu1 %v6289_v18  ;;  %5133 = vmatprep.mubr.msk.bf16.mxu1 %vm5611_vm0, %v5610_v0 }
0x1d81   :  { %5131 = vmatprep.subr.bf16.mxu1 %v5610_v0 }
0x1d84   :  { %5132 = vmatpush3.bf16.msra.mxu1 %v6298_v20 }
0x1d85   :  { %5145 = vmatprep.subr.bf16.mxu1 %v5610_v0 }
0x1e52   :  { %v3374_v60 = vpop.f32.mrb[68].mxu1 }
0x1e53   :  { %v3380_v24 = vadd.f32 %v3374_v60, %v3332_v59  ;;  %v5119_v31 = vpop.f32.mrb[69].mxu1  ;;  %v3545_v59 = vld [vmem:[#allocation3 + $0xc] sm:$0x3] }
0x1e54   :  { %v3377_v33 = vpop.f32.mrb[70].mxu1 }
0x1e55   :  { %5431 = vtanh.f32 %v3380_v24  ;;  %v5120_v34 = vpop.f32.mrb[71].mxu1  ;;  %v3381_v38 = vmul.f32 0.5, %v3380_v24 }
0x1e57   :  { %5433 = vtanh.f32 %v3381_v38 }
0x1e5f   :  { %v5432_v36 = vpop.eup %5431 }
0x1e60   :  { %3388 = vrot.lane.b32.xlu1 %v5432_v36, %s5613_s15 }
0x1e61   :  { %v5434_v39 = vpop.eup %5433 }
0x1e62   :  { %v3383_v40 = vmul.f32 0.5, %v5434_v39 }
0x1e64   :  { %v3384_v41 = vadd.f32 0.5, %v3383_v40 }
0x1e66   :  { %v3386_v44 = vmul.f32 %v3384_v41, %v3325_v28 }
0x1ed2   :  { %v3389_v42 = vpop.permute.xlu1 %3388 }
0x1ed3   :  { %v3391_v43 = vmul.f32 %v3389_v42, %v3384_v41 }
0x1ed5   :  { %3393 = vrot.lane.b32.xlu0 %v3391_v43, %s5606_s10 }
0x1f47   :  { %v3394_v45 = vpop.permute.xlu0 %3393 }
0x1f48   :  { %v3396_v46 = vadd.f32 %v3394_v45, %v3386_v44 }
0x1f4a   :  { %5435 = vtanh.f32 %v3396_v46 }
0x1f54   :  { %v5436_v47 = vpop.eup %5435 }
0x1f55   :  { %3399 = vrot.lane.b32.xlu1 %v5436_v47, %s5613_s15 }
0x1fc7   :  { %v3400_v6 = vpop.permute.xlu1 %3399 }
0x1fc8   :  { %v3402_v49 = vmul.f32 %v3400_v6, %v3384_v41 }
0x1fca   :  { %v3404_v51 = vpack.c.bf16 %v3402_v49, %v3402_v49 }
0x1fcc   :  { %3406 = vrot.lane.b32.xlu0 %v3404_v51, %s5606_s10 }
0x203e   :  { %v3407_v52 = vpop.permute.xlu0 %3406 }
0x203f   :  { %5126 = vmatmul.mubr.msk.bf16.vlgmr.msra.gmra.mrb[72].mxu0 %vm1726_vm4, %v3407_v52 }
0x2040   :  { %5138 = vmatpush3.bf16.msra.mxu0 %v6289_v18  ;;  %5141 = vmatprep.mubr.msk.bf16.mxu0 %vm5611_vm0, %v5610_v0 }
0x2041   :  { %5139 = vmatprep.subr.bf16.mxu0 %v5610_v0 }
0x2044   :  { %5140 = vmatpush3.bf16.msra.mxu0 %v6298_v20 }
0x2045   :  { %5153 = vmatprep.subr.bf16.mxu0 %v5610_v0 }
0x2112   :  { %v3445_v55 = vpop.f32.mrb[72].mxu0 }
0x2113   :  { %v3451_v56 = vadd.f32 %v3445_v55, %v3403_v54  ;;  %v5127_v58 = vpop.f32.mrb[73].mxu0  ;;  %v3616_v54 = vld [vmem:[#allocation3 + $0xe] sm:$0x3] }
0x2114   :  { %v3448_v61 = vpop.f32.mrb[74].mxu0 }
0x2115   :  { %5437 = vtanh.f32 %v3451_v56  ;;  %v5128_v62 = vpop.f32.mrb[75].mxu0  ;;  %v3452_v1 = vmul.f32 0.5, %v3451_v56 }
0x2117   :  { %5439 = vtanh.f32 %v3452_v1 }
0x211f   :  { %v5438_v63 = vpop.eup %5437 }
0x2120   :  { %3459 = vrot.lane.b32.xlu1 %v5438_v63, %s5613_s15 }
0x2121   :  { %v5440_v35 = vpop.eup %5439 }
0x2122   :  { %v3454_v8 = vmul.f32 0.5, %v5440_v35 }
0x2124   :  { %v3455_v26 = vadd.f32 0.5, %v3454_v8 }
0x2126   :  { %v3457_v4 = vmul.f32 %v3455_v26, %v3396_v46 }
0x2192   :  { %v3460_v2 = vpop.permute.xlu1 %3459 }
0x2193   :  { %v3462_v3 = vmul.f32 %v3460_v2, %v3455_v26 }
0x2195   :  { %3464 = vrot.lane.b32.xlu0 %v3462_v3, %s5606_s10 }
0x2207   :  { %v3465_v5 = vpop.permute.xlu0 %3464 }
0x2208   :  { %v3467_v32 = vadd.f32 %v3465_v5, %v3457_v4 }
0x220a   :  { %5441 = vtanh.f32 %v3467_v32 }
0x2214   :  { %v5442_v7 = vpop.eup %5441 }
0x2215   :  { %3470 = vrot.lane.b32.xlu1 %v5442_v7, %s5613_s15  ;;  %v6440_v7 = vld [vmem:[%s6586_s9] sm:$0xff]  }
0x2287   :  { %v3471_v10 = vpop.permute.xlu1 %3470 }
0x2288   :  { %v3473_v11 = vmul.f32 %v3471_v10, %v3455_v26  ;;  %v3694_v10 = vld [vmem:[#allocation8] sm:$0x3] }
0x228a   :  { %v3475_v12 = vpack.c.bf16 %v3473_v11, %v3473_v11  ;;  %v6443_v11 = vsel %vm118_vm1, %v3694_v10, 0 }
0x228c   :  { %3477 = vrot.lane.b32.xlu0 %v3475_v12, %s5606_s10  ;;  %v3692_v12 = vld [vmem:[%s6579_s2] sm:$0x3] }
0x22fe   :  { %v3478_v13 = vpop.permute.xlu0 %3477 }
0x22ff   :  { %5134 = vmatmul.mubr.msk.bf16.vlgmr.msra.gmra.mrb[72].mxu1 %vm1726_vm4, %v3478_v13  ;;  %v6453_v13 = vld [vmem:[%s6586_s9 + $0x8] sm:$0xff]  }
0x2300   :  { %5146 = vmatpush3.bf16.msra.mxu1 %v6289_v18  ;;  %5149 = vmatprep.mubr.msk.bf16.mxu1 %vm5611_vm0, %v5610_v0 }
0x2301   :  { %5147 = vmatprep.subr.bf16.mxu1 %v5610_v0 }
0x2304   :  { %5148 = vmatpush3.bf16.msra.mxu1 %v6298_v20 }
0x2305   :  { %5161 = vmatprep.subr.bf16.mxu1 %v5610_v0 }
0x23d2   :  { %v3516_v14 = vpop.f32.mrb[72].mxu1 }
0x23d3   :  { %v3522_v15 = vadd.f32 %v3516_v14, %v3474_v57  ;;  %v5135_v16 = vpop.f32.mrb[73].mxu1  ;;  %v3693_v57 = vpack.c.bf16 %v3692_v12, %v3692_v12 }
0x23d4   :  { %v3519_v9 = vpop.f32.mrb[74].mxu1 }
0x23d5   :  { %5443 = vtanh.f32 %v3522_v15  ;;  %v5136_v17 = vpop.f32.mrb[75].mxu1  ;;  %v3523_v18 = vmul.f32 0.5, %v3522_v15 }
0x23d7   :  { %5445 = vtanh.f32 %v3523_v18 }
0x23df   :  { %v5444_v37 = vpop.eup %5443 }
0x23e0   :  { %3530 = vrot.lane.b32.xlu1 %v5444_v37, %s5613_s15 }
0x23e1   :  { %v5446_v53 = vpop.eup %5445 }
0x23e2   :  { %v3525_v19 = vmul.f32 0.5, %v5446_v53 }
0x23e4   :  { %v3526_v21 = vadd.f32 0.5, %v3525_v19 }
0x23e6   :  { %v3528_v20 = vmul.f32 %v3526_v21, %v3467_v32 }
0x2452   :  { %v3531_v23 = vpop.permute.xlu1 %3530 }
0x2453   :  { %v3533_v27 = vmul.f32 %v3531_v23, %v3526_v21  ;;  %v6471_v23 = vld [vmem:[#allocation9] ss:$0 sm:$0xff] }
0x2455   :  { %3535 = vrot.lane.b32.xlu0 %v3533_v27, %s5606_s10 }
0x24c7   :  { %v3536_v22 = vpop.permute.xlu0 %3535 }
0x24c8   :  { %v3538_v28 = vadd.f32 %v3536_v22, %v3528_v20 }
0x24ca   :  { %5447 = vtanh.f32 %v3538_v28 }
0x24d4   :  { %v5448_v29 = vpop.eup %5447 }
0x24d5   :  { %3541 = vrot.lane.b32.xlu1 %v5448_v29, %s5613_s15 }
0x2547   :  { %v3542_v25 = vpop.permute.xlu1 %3541 }
0x2548   :  { %v3544_v30 = vmul.f32 %v3542_v25, %v3526_v21 }
0x254a   :  { %v3546_v48 = vpack.c.bf16 %v3544_v30, %v3544_v30 }
0x254c   :  { %3548 = vrot.lane.b32.xlu0 %v3546_v48, %s5606_s10 }
0x25be   :  { %v3549_v50 = vpop.permute.xlu0 %3548 }
0x25bf   :  { %5142 = vmatmul.mubr.msk.bf16.vlgmr.msra.gmra.mrb[76].mxu0 %vm1726_vm4, %v3549_v50 }
0x25c0   :  { %5157 = vmatprep.mubr.msk.bf16.mxu0 %vm5611_vm0, %v5610_v0  ;;  %5154 = vmatpush3.bf16.msra.mxu0 %v6440_v7 }
0x25c1   :  { %5155 = vmatprep.subr.bf16.mxu0 %v5610_v0 }
0x25c4   :  { %5156 = vmatpush3.bf16.msra.mxu0 %v6453_v13 }
0x25c5   :  { %5167 = vmatprep.subr.bf16.mxu0 %v5610_v0 }
0x2692   :  { %v3587_v60 = vpop.f32.mrb[76].mxu0 }
0x2693   :  { %v3593_v24 = vadd.f32 %v3587_v60, %v3545_v59  ;;  %v5143_v31 = vpop.f32.mrb[77].mxu0 }
0x2694   :  { %v3590_v33 = vpop.f32.mrb[78].mxu0 }
0x2695   :  { %5449 = vtanh.f32 %v3593_v24  ;;  %v5144_v34 = vpop.f32.mrb[79].mxu0  ;;  %v3594_v38 = vmul.f32 0.5, %v3593_v24 }
0x2697   :  { %5451 = vtanh.f32 %v3594_v38  ;;  %v6485_v38 = vld [vmem:[%s6588_s11 + $0x8] sm:$0xff]  }
0x269f   :  { %v5450_v36 = vpop.eup %5449 }
0x26a0   :  { %3601 = vrot.lane.b32.xlu1 %v5450_v36, %s5613_s15  ;;  %v6479_v36 = vld [vmem:[%s6588_s11] sm:$0xff]   ;;  %s5614_s11 = smov 4  }
0x26a1   :  { %v5452_v39 = vpop.eup %5451 }
0x26a2   :  { %v3596_v40 = vmul.f32 0.5, %v5452_v39 }
0x26a4   :  { %v3597_v41 = vadd.f32 0.5, %v3596_v40 }
0x26a6   :  { %v3599_v44 = vmul.f32 %v3597_v41, %v3538_v28 }
0x2712   :  { %v3602_v42 = vpop.permute.xlu1 %3601 }
0x2713   :  { %v3604_v43 = vmul.f32 %v3602_v42, %v3597_v41 }
0x2715   :  { %3606 = vrot.lane.b32.xlu0 %v3604_v43, %s5606_s10 }
0x2787   :  { %v3607_v45 = vpop.permute.xlu0 %3606 }
0x2788   :  { %v3609_v46 = vadd.f32 %v3607_v45, %v3599_v44  ;;  %v6504_v44 = vld [vmem:[#allocation11] ss:$0 sm:$0xff] }
0x278a   :  { %5453 = vtanh.f32 %v3609_v46 }
0x2794   :  { %v5454_v47 = vpop.eup %5453 }
0x2795   :  { %3612 = vrot.lane.b32.xlu1 %v5454_v47, %s5613_s15 }
0x2807   :  { %v3613_v6 = vpop.permute.xlu1 %3612 }
0x2808   :  { %v3615_v49 = vmul.f32 %v3613_v6, %v3597_v41 }
0x280a   :  { %v3617_v51 = vpack.c.bf16 %v3615_v49, %v3615_v49 }
0x280c   :  { %3619 = vrot.lane.b32.xlu0 %v3617_v51, %s5606_s10 }
0x287e   :  { %v3620_v52 = vpop.permute.xlu0 %3619 }
0x287f   :  { %5150 = vmatmul.mubr.msk.bf16.vlgmr.msra.gmra.mrb[76].mxu1 %vm1726_vm4, %v3620_v52 }
0x2880   :  { %5163 = vmatprep.mubr.msk.bf16.mxu1 %vm5611_vm0, %v5610_v0  ;;  %5162 = vmatpush3.bf16.msra.mxu1 %v6443_v11 }
0x2881   :  { %5175 = vmatprep.subr.bf16.mxu1 %v5610_v0 }
0x2887   :  { %5164 = vmatmul.mubr.msk.bf16.vlgmr.msra.gmra.mrb[80].mxu1 %vm114_vm2, %v3693_v57 }
0x2888   :  { %5176 = vmatpush3.bf16.msra.mxu1 %v6440_v7  ;;  %5179 = vmatprep.mubr.msk.bf16.mxu1 %vm5611_vm0, %v5610_v0 }
0x2889   :  { %5177 = vmatprep.subr.bf16.mxu1 %v5610_v0 }
0x288c   :  { %5178 = vmatpush3.bf16.msra.mxu1 %v6453_v13 }
0x288d   :  { %5189 = vmatprep.subr.bf16.mxu1 %v5610_v0 }
0x2952   :  { %v3658_v55 = vpop.f32.mrb[76].mxu1 }
0x2953   :  { %v3664_v56 = vadd.f32 %v3658_v55, %v3616_v54  ;;  %v5151_v58 = vpop.f32.mrb[77].mxu1 }
0x2954   :  { %v3661_v61 = vpop.f32.mrb[78].mxu1 }
0x2955   :  { %5455 = vtanh.f32 %v3664_v56  ;;  %v5152_v62 = vpop.f32.mrb[79].mxu1  ;;  %v3665_v1 = vmul.f32 0.5, %v3664_v56 }
0x2957   :  { %5457 = vtanh.f32 %v3665_v1 }
0x295a   :  { %v3798_v17 = vpop.f32.mrb[80].mxu1 }
0x295b   :  { %v5165_v37 = vpop.f32.mrb[81].mxu1 }
0x295c   :  { %v3801_v18 = vpop.f32.mrb[82].mxu1 }
0x295d   :  { %v5166_v53 = vpop.f32.mrb[83].mxu1 }
0x295f   :  { %v5456_v63 = vpop.eup %5455 }
0x2960   :  { %3672 = vrot.lane.b32.xlu1 %v5456_v63, %s5613_s15 }
0x2961   :  { %v5458_v35 = vpop.eup %5457 }
0x2962   :  { %v3667_v8 = vmul.f32 0.5, %v5458_v35 }
0x2964   :  { %v3668_v26 = vadd.f32 0.5, %v3667_v8 }
0x2966   :  { %v3670_v4 = vmul.f32 %v3668_v26, %v3609_v46 }
0x29d2   :  { %v3673_v2 = vpop.permute.xlu1 %3672 }
0x29d3   :  { %v3675_v3 = vmul.f32 %v3673_v2, %v3668_v26 }
0x29d5   :  { %3677 = vrot.lane.b32.xlu0 %v3675_v3, %s5606_s10 }
0x2a47   :  { %v3678_v5 = vpop.permute.xlu0 %3677 }
0x2a48   :  { %v3680_v32 = vadd.f32 %v3678_v5, %v3670_v4 }
0x2a4a   :  { %5459 = vtanh.f32 %v3680_v32 }
0x2a54   :  { %v5460_v14 = vpop.eup %5459 }
0x2a55   :  { %3683 = vrot.lane.b32.xlu1 %v5460_v14, %s5613_s15 }
0x2ac7   :  { %v3684_v15 = vpop.permute.xlu1 %3683 }
0x2ac8   :  { %v3686_v16 = vmul.f32 %v3684_v15, %v3668_v26 }
0x2aca   :  { %v3695_v9 = vpack.c.bf16 %v3686_v16, %v3686_v16 }
0x2acc   :  { %3701 = vrot.lane.b32.xlu0 %v3695_v9, %s5606_s10 }
0x2b3e   :  { %v3702_v19 = vpop.permute.xlu0 %3701 }
0x2b3f   :  { %5158 = vmatmul.mubr.msk.bf16.vlgmr.msra.gmra.mrb[80].mxu0 %vm1726_vm4, %v3702_v19 }
0x2b40   :  { %5171 = vmatprep.mubr.msk.bf16.mxu0 %vm5611_vm0, %v5610_v0  ;;  %5168 = vmatpush3.bf16.msra.mxu0 %v6479_v36 }
0x2b41   :  { %5169 = vmatprep.subr.bf16.mxu0 %v5610_v0 }
0x2b44   :  { %5170 = vmatpush3.bf16.msra.mxu0 %v6485_v38 }
0x2b45   :  { %5183 = vmatprep.subr.bf16.mxu0 %v5610_v0 }
0x2c12   :  { %v3752_v21 = vpop.f32.mrb[80].mxu0 }
0x2c13   :  { %v3799_v27 = vadd.f32 %v3798_v17, %v3752_v21  ;;  %v5159_v20 = vpop.f32.mrb[81].mxu0 }
0x2c14   :  { %v3755_v22 = vpop.f32.mrb[82].mxu0 }
0x2c15   :  { %v3811_v28 = vadd.f32 %v6471_v23, %v3799_v27  ;;  %v5160_v29 = vpop.f32.mrb[83].mxu0 }
0x2c17   :  { %5461 = vtanh.f32 %v3811_v28  ;;  %v3812_v30 = vmul.f32 0.5, %v3811_v28 }
0x2c19   :  { %5463 = vtanh.f32 %v3812_v30 }
0x2c21   :  { %v5462_v25 = vpop.eup %5461 }
0x2c22   :  { %3819 = vrot.lane.b32.xlu1 %v5462_v25, %s5613_s15 }
0x2c23   :  { %v5464_v48 = vpop.eup %5463 }
0x2c24   :  { %v3814_v50 = vmul.f32 0.5, %v5464_v48 }
0x2c26   :  { %v3815_v59 = vadd.f32 0.5, %v3814_v50 }
0x2c28   :  { %v3817_v31 = vmul.f32 %v3815_v59, %v3680_v32 }
0x2c94   :  { %v3820_v60 = vpop.permute.xlu1 %3819 }
0x2c95   :  { %v3822_v24 = vmul.f32 %v3820_v60, %v3815_v59 }
0x2c97   :  { %3824 = vrot.lane.b32.xlu0 %v3822_v24, %s5606_s10 }
0x2d09   :  { %v3825_v33 = vpop.permute.xlu0 %3824 }
0x2d0a   :  { %v3827_v34 = vadd.f32 %v3825_v33, %v3817_v31 }
0x2d0c   :  { %5465 = vtanh.f32 %v3827_v34 }
0x2d16   :  { %v5466_v39 = vpop.eup %5465 }
0x2d17   :  { %3830 = vrot.lane.b32.xlu1 %v5466_v39, %s5613_s15 }
0x2d89   :  { %v3831_v40 = vpop.permute.xlu1 %3830 }
0x2d8a   :  { %v3833_v41 = vmul.f32 %v3831_v40, %v3815_v59 }
0x2d8c   :  { %v3834_v42 = vpack.c.bf16 %v3833_v41, %v3833_v41 }
0x2d8e   :  { %3842 = vrot.lane.b32.xlu0 %v3834_v42, %s5606_s10 }
0x2e00   :  { %v3843_v43 = vpop.permute.xlu0 %3842 }
0x2e01   :  { %5172 = vmatmul.mubr.msk.bf16.vlgmr.msra.gmra.mrb[84].mxu0 %vm1726_vm4, %v3843_v43  ;;  %5180 = vmatmul.mubr.msk.bf16.vlgmr.msra.gmra.mrb[84].mxu1 %vm1726_vm4, %v3843_v43 }
0x2e02   :  { %5184 = vmatpush3.bf16.msra.mxu0 %v6443_v11  ;;  %5185 = vmatprep.mubr.msk.bf16.mxu0 %vm5611_vm0, %v5610_v0 }
0x2e03   :  { %5197 = vmatprep.subr.bf16.mxu0 %v5610_v0  ;;  %5190 = vmatpush3.bf16.msra.mxu1 %v6479_v36 }
0x2e04   :  { %5191 = vmatprep.subr.bf16.mxu1 %v5610_v0  ;;  %5193 = vmatprep.mubr.msk.bf16.mxu1 %vm5611_vm0, %v5610_v0 }
0x2e07   :  { %5192 = vmatpush3.bf16.msra.mxu1 %v6485_v38 }
0x2e08   :  { %5205 = vmatprep.subr.bf16.mxu1 %v5610_v0 }
0x2ed4   :  { %v3893_v45 = vpop.f32.mrb[84].mxu0  ;;  %v3934_v46 = vpop.f32.mrb[84].mxu1 }
0x2ed5   :  { %v6507_v47 = vadd.f32 %v6504_v44, %v3893_v45  ;;  %v5173_v6 = vpop.f32.mrb[85].mxu0  ;;  %v5181_v49 = vpop.f32.mrb[85].mxu1 }
0x2ed6   :  { %v3896_v51 = vpop.f32.mrb[86].mxu0  ;;  %v3937_v52 = vpop.f32.mrb[86].mxu1 }
0x2ed7   :  { %v3899_v54 = vpack.c.bf16 %v6507_v47, %v6507_v47  ;;  %v5174_v55 = vpop.f32.mrb[87].mxu0  ;;  %v5182_v56 = vpop.f32.mrb[87].mxu1 }
0x2ed9   :  { %5186 = vmatmul.mubr.msk.bf16.vlgmr.msra.gmra.mrb[88].mxu0 %vm114_vm2, %v3899_v54 }
0x2eda   :  { %5198 = vmatpush3.bf16.msra.mxu0 %v6440_v7  ;;  %5201 = vmatprep.mubr.msk.bf16.mxu0 %vm5611_vm0, %v5610_v0 }
0x2edb   :  { %5199 = vmatprep.subr.bf16.mxu0 %v5610_v0 }
0x2ede   :  { %5200 = vmatpush3.bf16.msra.mxu0 %v6453_v13 }
0x2edf   :  { %5211 = vmatprep.subr.bf16.mxu0 %v5610_v0 }
0x2fac   :  { %v3977_v58 = vpop.f32.mrb[88].mxu0 }
0x2fad   :  { %v3978_v61 = vadd.f32 %v3977_v58, %v3934_v46  ;;  %v5187_v62 = vpop.f32.mrb[89].mxu0 }
0x2fae   :  { %v3980_v63 = vpop.f32.mrb[90].mxu0 }
0x2faf   :  { %v3983_v1 = vadd.f32 %v6471_v23, %v3978_v61  ;;  %v5188_v35 = vpop.f32.mrb[91].mxu0 }
0x2fb1   :  { %5467 = vtanh.f32 %v3983_v1  ;;  %v3984_v26 = vmul.f32 0.5, %v3983_v1 }
0x2fb3   :  { %5469 = vtanh.f32 %v3984_v26 }
0x2fbb   :  { %v5468_v8 = vpop.eup %5467 }
0x2fbc   :  { %3991 = vrot.lane.b32.xlu1 %v5468_v8, %s5613_s15 }
0x2fbd   :  { %v5470_v2 = vpop.eup %5469 }
0x2fbe   :  { %v3986_v3 = vmul.f32 0.5, %v5470_v2 }
0x2fc0   :  { %v3987_v4 = vadd.f32 0.5, %v3986_v3 }
0x2fc2   :  { %v3989_v10 = vmul.f32 %v3987_v4, %v3827_v34 }
0x302e   :  { %v3992_v5 = vpop.permute.xlu1 %3991 }
0x302f   :  { %v3994_v32 = vmul.f32 %v3992_v5, %v3987_v4 }
0x3031   :  { %3996 = vrot.lane.b32.xlu0 %v3994_v32, %s5606_s10 }
0x30a3   :  { %v3997_v12 = vpop.permute.xlu0 %3996 }
0x30a4   :  { %v3999_v57 = vadd.f32 %v3997_v12, %v3989_v10 }
0x30a6   :  { %5471 = vtanh.f32 %v3999_v57 }
0x30b0   :  { %v5472_v14 = vpop.eup %5471 }
0x30b1   :  { %4002 = vrot.lane.b32.xlu1 %v5472_v14, %s5613_s15 }
0x3123   :  { %v4003_v15 = vpop.permute.xlu1 %4002 }
0x3124   :  { %v4005_v16 = vmul.f32 %v4003_v15, %v3987_v4 }
0x3126   :  { %v4006_v9 = vpack.c.bf16 %v4005_v16, %v4005_v16 }
0x3128   :  { %4008 = vrot.lane.b32.xlu0 %v4006_v9, %s5606_s10 }
0x319a   :  { %v4009_v17 = vpop.permute.xlu0 %4008 }
0x319b   :  { %5194 = vmatmul.mubr.msk.bf16.vlgmr.msra.gmra.mrb[88].mxu1 %vm1726_vm4, %v4009_v17  ;;  %5202 = vmatmul.mubr.msk.bf16.vlgmr.msra.gmra.mrb[92].mxu0 %vm1726_vm4, %v4009_v17 }
0x319c   :  { %5206 = vmatpush3.bf16.msra.mxu1 %v6443_v11  ;;  %5207 = vmatprep.mubr.msk.bf16.mxu1 %vm5611_vm0, %v5610_v0 }
0x319d   :  { %5219 = vmatprep.subr.bf16.mxu1 %v5610_v0  ;;  %5212 = vmatpush3.bf16.msra.mxu0 %v6479_v36 }
0x319e   :  { %5213 = vmatprep.subr.bf16.mxu0 %v5610_v0  ;;  %5215 = vmatprep.mubr.msk.bf16.mxu0 %vm5611_vm0, %v5610_v0 }
0x31a1   :  { %5214 = vmatpush3.bf16.msra.mxu0 %v6485_v38 }
0x31a2   :  { %5227 = vmatprep.subr.bf16.mxu0 %v5610_v0 }
0x326e   :  { %v4047_v37 = vpop.f32.mrb[88].mxu1  ;;  %v4088_v18 = vpop.f32.mrb[92].mxu0 }
0x326f   :  { %v6536_v53 = vadd.f32 %v6504_v44, %v4047_v37  ;;  %v5195_v19 = vpop.f32.mrb[89].mxu1  ;;  %v5203_v21 = vpop.f32.mrb[93].mxu0 }
0x3270   :  { %v4050_v27 = vpop.f32.mrb[90].mxu1  ;;  %v4091_v20 = vpop.f32.mrb[94].mxu0 }
0x3271   :  { %v4053_v22 = vpack.c.bf16 %v6536_v53, %v6536_v53  ;;  %v5196_v28 = vpop.f32.mrb[91].mxu1  ;;  %v5204_v29 = vpop.f32.mrb[95].mxu0 }
0x3273   :  { %5208 = vmatmul.mubr.msk.bf16.vlgmr.msra.gmra.mrb[92].mxu1 %vm114_vm2, %v4053_v22 }
0x3274   :  { %5220 = vmatpush3.bf16.msra.mxu1 %v6440_v7  ;;  %5223 = vmatprep.mubr.msk.bf16.mxu1 %vm5611_vm0, %v5610_v0 }
0x3275   :  { %5221 = vmatprep.subr.bf16.mxu1 %v5610_v0 }
0x3278   :  { %5222 = vmatpush3.bf16.msra.mxu1 %v6453_v13 }
0x3279   :  { %5233 = vmatprep.subr.bf16.mxu1 %v5610_v0 }
0x3346   :  { %v4131_v25 = vpop.f32.mrb[92].mxu1 }
0x3347   :  { %v4132_v30 = vadd.f32 %v4131_v25, %v4088_v18  ;;  %v5209_v48 = vpop.f32.mrb[93].mxu1 }
0x3348   :  { %v4134_v50 = vpop.f32.mrb[94].mxu1 }
0x3349   :  { %v4137_v59 = vadd.f32 %v6471_v23, %v4132_v30  ;;  %v5210_v60 = vpop.f32.mrb[95].mxu1 }
0x334b   :  { %5473 = vtanh.f32 %v4137_v59  ;;  %v4138_v7 = vmul.f32 0.5, %v4137_v59 }
0x334d   :  { %5475 = vtanh.f32 %v4138_v7 }
0x3355   :  { %v5474_v24 = vpop.eup %5473 }
0x3356   :  { %4145 = vrot.lane.b32.xlu1 %v5474_v24, %s5613_s15 }
0x3357   :  { %v5476_v31 = vpop.eup %5475 }
0x3358   :  { %v4140_v33 = vmul.f32 0.5, %v5476_v31 }
0x335a   :  { %v4141_v34 = vadd.f32 0.5, %v4140_v33 }
0x335c   :  { %v4143_v40 = vmul.f32 %v4141_v34, %v3999_v57 }
0x33c8   :  { %v4146_v39 = vpop.permute.xlu1 %4145 }
0x33c9   :  { %v4148_v13 = vmul.f32 %v4146_v39, %v4141_v34 }
0x33cb   :  { %4150 = vrot.lane.b32.xlu0 %v4148_v13, %s5606_s10 }
0x343d   :  { %v4151_v41 = vpop.permute.xlu0 %4150 }
0x343e   :  { %v4153_v42 = vadd.f32 %v4151_v41, %v4143_v40 }
0x3440   :  { %5477 = vtanh.f32 %v4153_v42 }
0x344a   :  { %v5478_v43 = vpop.eup %5477 }
0x344b   :  { %4156 = vrot.lane.b32.xlu1 %v5478_v43, %s5613_s15 }
0x34bd   :  { %v4157_v45 = vpop.permute.xlu1 %4156 }
0x34be   :  { %v4159_v46 = vmul.f32 %v4157_v45, %v4141_v34 }
0x34c0   :  { %v4160_v6 = vpack.c.bf16 %v4159_v46, %v4159_v46 }
0x34c2   :  { %4162 = vrot.lane.b32.xlu0 %v4160_v6, %s5606_s10 }
0x3534   :  { %v4163_v49 = vpop.permute.xlu0 %4162 }
0x3535   :  { %5216 = vmatmul.mubr.msk.bf16.vlgmr.msra.gmra.mrb[96].mxu0 %vm1726_vm4, %v4163_v49  ;;  %5224 = vmatmul.mubr.msk.bf16.vlgmr.msra.gmra.mrb[96].mxu1 %vm1726_vm4, %v4163_v49 }
0x3536   :  { %5228 = vmatpush3.bf16.msra.mxu0 %v6443_v11  ;;  %5229 = vmatprep.mubr.msk.bf16.mxu0 %vm5611_vm0, %v5610_v0 }
0x3537   :  { %5234 = vmatpush3.bf16.msra.mxu1 %v6479_v36  ;;  %5237 = vmatprep.mubr.msk.bf16.mxu1 %vm5611_vm0, %v5610_v0 }
0x3538   :  { %5235 = vmatprep.subr.bf16.mxu1 %v5610_v0 }
0x353b   :  { %5236 = vmatpush3.bf16.msra.mxu1 %v6485_v38 }
0x3608   :  { %v4201_v51 = vpop.f32.mrb[96].mxu0  ;;  %v4242_v52 = vpop.f32.mrb[96].mxu1 }
0x3609   :  { %v4202_v54 = vadd.f32 %v6504_v44, %v4201_v51  ;;  %v5217_v55 = vpop.f32.mrb[97].mxu0  ;;  %v5225_v56 = vpop.f32.mrb[97].mxu1 }
0x360a   :  { %v4204_v58 = vpop.f32.mrb[98].mxu0  ;;  %v4245_v11 = vpop.f32.mrb[98].mxu1 }
0x360b   :  { %v4207_v61 = vpack.c.bf16 %v4202_v54, %v4202_v54  ;;  %v5218_v62 = vpop.f32.mrb[99].mxu0  ;;  %v5226_v63 = vpop.f32.mrb[99].mxu1 }
0x360d   :  { %5230 = vmatmul.mubr.msk.bf16.vlgmr.msra.gmra.mrb[100].mxu0 %vm114_vm2, %v4207_v61 }
0x36e0   :  { %v4285_v36 = vpop.f32.mrb[100].mxu0 }
0x36e1   :  { %v4286_v1 = vadd.f32 %v4285_v36, %v4242_v52  ;;  %v5231_v35 = vpop.f32.mrb[101].mxu0 }
0x36e2   :  { %v4288_v8 = vpop.f32.mrb[102].mxu0 }
0x36e3   :  { %v4291_v0 = vadd.f32 %v6471_v23, %v4286_v1  ;;  %v5232_v38 = vpop.f32.mrb[103].mxu0 }
0x36e5   :  { %5479 = vtanh.f32 %v4291_v0  ;;  %v4292_v2 = vmul.f32 0.5, %v4291_v0 }
0x36e7   :  { %5481 = vtanh.f32 %v4292_v2 }
0x36ef   :  { %v5480_v26 = vpop.eup %5479 }
0x36f0   :  { %4299 = vrot.lane.b32.xlu1 %v5480_v26, %s5613_s15 }
0x36f1   :  { %v5482_v3 = vpop.eup %5481 }
0x36f2   :  { %v4294_v4 = vmul.f32 0.5, %v5482_v3 }
0x36f4   :  { %v4295_v5 = vadd.f32 0.5, %v4294_v4 }
0x36f6   :  { %v4297_v12 = vmul.f32 %v4295_v5, %v4153_v42 }
0x3762   :  { %v4300_v32 = vpop.permute.xlu1 %4299 }
0x3763   :  { %v4302_v10 = vmul.f32 %v4300_v32, %v4295_v5 }
0x3765   :  { %4304 = vrot.lane.b32.xlu0 %v4302_v10, %s5606_s10 }
0x37d7   :  { %v4305_v57 = vpop.permute.xlu0 %4304 }
0x37d8   :  { %v4307_v14 = vadd.f32 %v4305_v57, %v4297_v12 }
0x37da   :  { %5483 = vtanh.f32 %v4307_v14 }
0x37e4   :  { %v5484_v15 = vpop.eup %5483 }
0x37e5   :  { %4310 = vrot.lane.b32.xlu1 %v5484_v15, %s5613_s15 }
0x37e9   :  { %4362 = vrot.lane.b32.xlu1 %v6536_v53, %s5614_s11 }
0x3857   :  { %v4311_v23 = vpop.permute.xlu1 %4310 }
0x3858   :  { %v4313_v16 = vmul.f32 %v4311_v23, %v4295_v5 }
0x385a   :  { %v4314_v9 = vpack.c.bf16 %v4313_v16, %v4313_v16 }
0x385b   :  { %v4363_v20 = vpop.permute.xlu1 %4362 }
0x385c   :  { %4316 = vrot.lane.b32.xlu0 %v4314_v9, %s5606_s10  ;;  %v4373_v22 = vsel %vm114_vm2, %v6507_v47, %v4363_v20 }
0x3860   :  { %4366 = vrot.lane.b32.xlu0 %v4202_v54, %s5615_s12 }
0x38ce   :  { %v4317_v17 = vpop.permute.xlu0 %4316 }
0x38cf   :  { %5238 = vmatmul.mubr.msk.bf16.vlgmr.msra.gmra.mrb[100].mxu1 %vm1726_vm4, %v4317_v17 }
0x38d2   :  { %v4367_v53 = vpop.permute.xlu0 %4366 }
0x38d3   :  { %v4375_v28 = vsel %vm4374_vm5, %v4373_v22, %v4367_v53 }
0x39a2   :  { %v4355_v37 = vpop.f32.mrb[100].mxu1 }
0x39a3   :  { %v4356_v18 = vadd.f32 %v6504_v44, %v4355_v37  ;;  %v5239_v19 = vpop.f32.mrb[101].mxu1 }
0x39a4   :  { %v4358_v21 = vpop.f32.mrb[102].mxu1 }
0x39a5   :  { %4370 = vrot.lane.b32.xlu1 %v4356_v18, %s5616_s26  ;;  %v5240_v27 = vpop.f32.mrb[103].mxu1 }
0x3a17   :  { %v4371_v29 = vpop.permute.xlu1 %4370 }
0x3a18   :  { %v4377_v25 = vsel %vm4376_vm6, %v4375_v28, %v4371_v29 }
0x3a19   :  { %4379 = vst.msk [vmem:[%s6590_s13] sm:$0x3] %vm4378_vm7, %v4377_v25 }
0x3a1a   :  { %4384 = vsyncpa [#allocation5], 1 }
0x3a1b   :  { %4385 = vsyncpa [#allocation7], 1 }
0x3a1c   :  { %4386 = vsyncpa [#allocation10], 1 }

</bundles_post_ra>
